<compile_context>
chip_gen: v5e
topology: v5e:2x2
jax: 0.10.0
libtpu: 0.0.40
codegen_flags: <defaults>
</compile_context>

<pallas_src>
import functools

import jax
import jax.numpy as jnp
import numpy as np
from jax import lax
from jax.experimental import pallas as pl
from jax.experimental.pallas import tpu as pltpu

BN_EPS = 1e-5


def _round_up(x, m):
    return ((x + m - 1) // m) * m


# ---------------------------------------------------------------------------
# Kernel 1: KHxKW stride-1 conv (+ folded BN + ReLU) that WRITES the zero-
# padded flat layout consumed by the following 3x3 conv.
#
#   x_ref : (Min, Cin)        bf16 flat padded input image (lead/trail zeros)
#   w_ref : (KT, Cin, Coutp)  bf16 per-tap weights, BN scale folded in
#   b_ref : (1, Coutp)        f32  folded BN bias
#   o_ref : ((ho+2)*wp + 8, Coutp)  flat zero-padded output image
#
# The kernel computes the FULL padded output grid ((ho+2) x wp positions) so
# every tap is one contiguous static slice of the flat input; border /
# over-computed positions are masked to exact zeros (they are the next conv's
# zero padding).
# ---------------------------------------------------------------------------
def _conv_bn_relu_padded_out_kernel(x_ref, w_ref, b_ref, o_ref, *,
                                    kh, kw, wp, ho, wo, lead):
    cout = o_ref.shape[-1]
    hp = ho + 2
    m = hp * wp

    acc = None
    for t, (dy, dx) in enumerate((dy, dx) for dy in range(kh) for dx in range(kw)):
        off = lead + (dy - 1) * wp + (dx - 1)        # static, >= 0 by construction
        d = jnp.dot(x_ref[off:off + m, :], w_ref[t],
                    preferred_element_type=jnp.float32)
        acc = d if acc is None else acc + d          # init from tap 0 (no zeros+add)

    y = jnp.maximum(acc + b_ref[...], 0.0)           # bias + ReLU (scale already in W)
    y = y.reshape(hp, wp, cout)                      # free: wp % 8 == 0

    # Zero the padding border (and the over-computed columns) so the result is
    # exactly the zero-padded flat input layout of the next 3x3 conv.
    rows = lax.broadcasted_iota(jnp.int32, (hp, wp, 1), 0)
    cols = lax.broadcasted_iota(jnp.int32, (hp, wp, 1), 1)
    keep = (rows >= 1) & (rows <= ho) & (cols >= 1) & (cols <= wo)
    y = jnp.where(keep, y, 0.0)

    o_ref[0:m, :] = y.reshape(m, cout).astype(o_ref.dtype)
    o_ref[m:, :] = jnp.zeros((o_ref.shape[0] - m, cout), o_ref.dtype)


# ---------------------------------------------------------------------------
# Kernel 2: 3x3 stride-1 conv + folded BN + fused shortcut + ReLU, valid output.
# ---------------------------------------------------------------------------
def _conv_bn_shortcut_relu_kernel(*refs, wp, ho, wo, shortcut):
    if shortcut == "identity":
        x_ref, w_ref, b_ref, rx_ref, o_ref = refs
    elif shortcut == "project":
        x_ref, w_ref, b_ref, rx_ref, rw_ref, rb_ref, o_ref = refs
    else:
        x_ref, w_ref, b_ref, o_ref = refs
    cout = o_ref.shape[-1]
    m = ho * wp

    acc = None
    for t, (dy, dx) in enumerate((dy, dx) for dy in range(3) for dx in range(3)):
        off = dy * wp + dx                           # static contiguous tap slice
        d = jnp.dot(x_ref[off:off + m, :], w_ref[t],
                    preferred_element_type=jnp.float32)
        acc = d if acc is None else acc + d

    y = acc + b_ref[...]
    # Drop the over-computed pad columns with ONE output-sized slice.
    y = y.reshape(ho, wp, cout)[:, :wo, :]

    if shortcut == "identity":
        y = y + rx_ref[...].astype(jnp.float32)      # plain add, no eye matmul
    elif shortcut == "project":
        ry = jnp.dot(rx_ref[...], rw_ref[...], preferred_element_type=jnp.float32)
        ry = ry + rb_ref[...]
        y = y + ry.reshape(ho, wo, cout)

    o_ref[...] = jnp.maximum(y, 0.0).astype(o_ref.dtype)


# ---------------------------------------------------------------------------
# pallas_call wrappers
# ---------------------------------------------------------------------------
def _conv1_call(x_flat, w_taps, bias, *, kh, kw, wp, ho, wo, lead):
    n, m_in, cin = x_flat.shape
    kt, _, coutp = w_taps.shape
    m_out = (ho + 2) * wp + 8    # +8 tail rows: conv2's over-computed taps stay in bounds

    kernel = functools.partial(_conv_bn_relu_padded_out_kernel,
                               kh=kh, kw=kw, wp=wp, ho=ho, wo=wo, lead=lead)
    return pl.pallas_call(
        kernel,
        out_shape=jax.ShapeDtypeStruct((n, m_out, coutp), jnp.bfloat16),
        grid=(n,),
        in_specs=[
            pl.BlockSpec((None, m_in, cin), lambda i: (i, 0, 0)),
            # Grid-invariant operands (constant index_map -> DMA'd once).
            # TODO(synk): pipeline_mode=pl.Buffered(1) would reclaim their 2nd
            # VMEM buffer (matters on v7x); omitted for JAX-version portability.
            pl.BlockSpec((kt, cin, coutp), lambda i: (0, 0, 0)),
            pl.BlockSpec((1, coutp), lambda i: (0, 0)),
        ],
        out_specs=pl.BlockSpec((None, m_out, coutp), lambda i: (i, 0, 0)),
        compiler_params=pltpu.CompilerParams(
            dimension_semantics=("parallel",),
            vmem_limit_bytes=32 * 1024 * 1024,   # safe on 64 MiB v7x, ample for any stage
        ),
    )(x_flat, w_taps, bias)


def _conv2_call(x_flat, w_taps, bias, shortcut, res_args, *, wp, ho, wo):
    n, m_in, cinp = x_flat.shape
    kt, _, coutp = w_taps.shape

    kernel = functools.partial(_conv_bn_shortcut_relu_kernel,
                               wp=wp, ho=ho, wo=wo, shortcut=shortcut)
    in_specs = [
        pl.BlockSpec((None, m_in, cinp), lambda i: (i, 0, 0)),
        pl.BlockSpec((kt, cinp, coutp), lambda i: (0, 0, 0)),
        pl.BlockSpec((1, coutp), lambda i: (0, 0)),
    ]
    args = [x_flat, w_taps, bias]
    if shortcut == "identity":
        (rxp,) = res_args
        in_specs.append(pl.BlockSpec((None, ho, wo, coutp), lambda i: (i, 0, 0, 0)))
        args.append(rxp)
    elif shortcut == "project":
        rxf, rw, rb = res_args
        cr = rxf.shape[-1]
        in_specs += [
            pl.BlockSpec((None, ho * wo, cr), lambda i: (i, 0, 0)),
            pl.BlockSpec((cr, coutp), lambda i: (0, 0)),
            pl.BlockSpec((1, coutp), lambda i: (0, 0)),
        ]
        args += [rxf, rw, rb]

    return pl.pallas_call(
        kernel,
        out_shape=jax.ShapeDtypeStruct((n, ho, wo, coutp), jnp.bfloat16),
        grid=(n,),
        in_specs=in_specs,
        out_specs=pl.BlockSpec((None, ho, wo, coutp), lambda i: (i, 0, 0, 0)),
        compiler_params=pltpu.CompilerParams(
            dimension_semantics=("parallel",),
            vmem_limit_bytes=32 * 1024 * 1024,
        ),
    )(*args)


# ---------------------------------------------------------------------------
# Wrapper glue: BN folding, weight repacking
# ---------------------------------------------------------------------------
def _fold_bn(bn):
    # TODO(synk): eval-mode BatchNorm only (running stats); training-mode batch
    # statistics are not implemented.
    s = bn["gamma"] * lax.rsqrt(bn["running_var"] + BN_EPS)
    b = bn["beta"] - bn["running_mean"] * s
    return s, b


def _pad_bias(b, coutp):
    return jnp.pad(b, (0, coutp - b.shape[0])).reshape(1, coutp).astype(jnp.float32)


def _pack_w_3x3(w, scale, cinp, coutp):
    """(Cout, Cin, 3, 3) -> (9, cinp, coutp) bf16 with BN scale folded in."""
    cout, cin, kh, kw = w.shape
    wt = (jnp.transpose(w, (2, 3, 1, 0)) * scale).reshape(kh * kw, cin, cout)
    wt = jnp.pad(wt, ((0, 0), (0, cinp - cin), (0, coutp - cout)))
    return wt.astype(jnp.bfloat16)


def _pack_w_3x3_stride2(w, scale, coutp):
    """Stride-2 3x3 conv == stride-1 2x2 conv over phase-packed (4*Cin) input."""
    cout, cin, kh, kw = w.shape
    wt = jnp.transpose(w, (2, 3, 1, 0)) * scale            # (3, 3, Cin, Cout)
    zero = jnp.zeros((cin, cout), wt.dtype)
    taps = []
    for dy in range(2):
        for dx in range(2):
            blocks = []
            for p in range(2):
                for q in range(2):
                    ky, kx = 2 * dy + p, 2 * dx + q
                    blocks.append(wt[ky, kx] if (ky < kh and kx < kw) else zero)
            taps.append(jnp.concatenate(blocks, axis=0))    # (4*Cin, Cout)
    wt2 = jnp.stack(taps, axis=0)                           # (4, 4*Cin, Cout)
    return jnp.pad(wt2, ((0, 0), (0, 0), (0, coutp - cout))).astype(jnp.bfloat16)


# ---------------------------------------------------------------------------
# BasicBlock parameters + forward
# ---------------------------------------------------------------------------
def init_basic_block(key, in_planes, planes, stride):
    ks = jax.random.split(key, 6)

    def conv_w(k, cout, cin, ksz):
        fan = cin * ksz * ksz
        return jax.random.normal(k, (cout, cin, ksz, ksz), jnp.float32) / np.sqrt(fan)

    def bn(k, c):
        k1, k2, k3, k4 = jax.random.split(k, 4)
        return {
            "gamma": 1.0 + 0.1 * jax.random.normal(k1, (c,), jnp.float32),
            "beta": 0.1 * jax.random.normal(k2, (c,), jnp.float32),
            "running_mean": 0.1 * jax.random.normal(k3, (c,), jnp.float32),
            "running_var": 0.5 + jax.random.uniform(k4, (c,), jnp.float32),
        }

    params = {
        "stride": stride, "in_planes": in_planes, "planes": planes,
        "conv1_w": conv_w(ks[0], planes, in_planes, 3),
        "bn1": bn(ks[1], planes),
        "conv2_w": conv_w(ks[2], planes, planes, 3),
        "bn2": bn(ks[3], planes),
    }
    if stride != 1 or in_planes != planes:
        params["sc_w"] = conv_w(ks[4], planes, in_planes, 1)
        params["bn_sc"] = bn(ks[5], planes)
    return params


def basic_block_forward(params, x_nchw):
    stride = int(params["stride"])
    planes = int(params["planes"])
    coutp = _round_up(planes, 128)                 # lane-dense channel padding

    x = jnp.transpose(x_nchw, (0, 2, 3, 1)).astype(jnp.bfloat16)   # NCHW -> NHWC
    n, h, w, cin = x.shape
    ho = (h + 2 - 3) // stride + 1
    wo = (w + 2 - 3) // stride + 1
    wp = _round_up(wo + 2, 8)       # flat-layout row width (mult. of 8 -> aligned rows)
    lead = 2 * wp                   # >= wp + 1 zero rows ahead of the image

    # ---- conv1 (3x3, stride) + bn1 + relu -> conv2-ready padded flat layout --
    s1, b1 = _fold_bn(params["bn1"])
    bias1 = _pad_bias(b1, coutp)
    if stride == 1:
        # 1-px zero border plus 2 lead / 2 trail zero rows; right-pad width to wp.
        xp = jnp.pad(x, ((0, 0), (3, 3), (1, wp - w - 1), (0, 0)))
        x1_flat = xp.reshape(n, -1, cin)
        w1 = _pack_w_3x3(params["conv1_w"], s1, cin, coutp)
        kh1 = kw1 = 2 + 1
    elif stride == 2:
        # Space-to-depth: stride-2 3x3 conv -> stride-1 2x2 conv, no strided loads.
        xp = jnp.pad(x, ((0, 0), (1, 1 + h % 2), (1, 1 + w % 2), (0, 0)))
        hpp, wpp = xp.shape[1], xp.shape[2]
        xs = xp.reshape(n, hpp // 2, 2, wpp // 2, 2, cin)
        xs = jnp.transpose(xs, (0, 1, 3, 2, 4, 5)).reshape(n, hpp // 2, wpp // 2, 4 * cin)
        # xs is (n, ho+1, wo+1, 4*cin); add 2 lead / 2 trail rows, right-pad to wp.
        xs = jnp.pad(xs, ((0, 0), (2, 2), (0, wp - (wo + 1)), (0, 0)))
        x1_flat = xs.reshape(n, -1, 4 * cin)
        w1 = _pack_w_3x3_stride2(params["conv1_w"], s1, coutp)
        kh1 = kw1 = 2
    else:
        # TODO(synk): strides other than 1/2 are unused by ResNet BasicBlock.
        raise NotImplementedError("stride must be 1 or 2")

    out1 = _conv1_call(x1_flat, w1, bias1, kh=kh1, kw=kw1,
                       wp=wp, ho=ho, wo=wo, lead=lead)
    # out1: (n, (ho+2)*wp + 8, coutp) bf16 -- already the zero-padded flat input
    # of conv2; no pad / re-layout / HBM round trip in between.

    # ---- conv2 (3x3, s=1) + bn2 + fused shortcut + relu ----------------------
    s2, b2 = _fold_bn(params["bn2"])
    bias2 = _pad_bias(b2, coutp)
    w2 = _pack_w_3x3(params["conv2_w"], s2, coutp, coutp)

    if "sc_w" in params:                 # projection shortcut: 1x1 conv + BN
        ssc, bsc = _fold_bn(params["bn_sc"])
        rw = params["sc_w"][:, :, 0, 0].T * ssc
        rw = jnp.pad(rw, ((0, 0), (0, coutp - planes))).astype(jnp.bfloat16)
        rb = _pad_bias(bsc, coutp)
        rxf = x[:, ::stride, ::stride, :].reshape(n, ho * wo, cin)
        shortcut, res_args = "project", (rxf, rw, rb)
    else:                                # identity shortcut: plain f32 add
        rxp = jnp.pad(x, ((0, 0), (0, 0), (0, 0), (0, coutp - cin)))
        shortcut, res_args = "identity", (rxp,)

    out2 = _conv2_call(out1, w2, bias2, shortcut, res_args, wp=wp, ho=ho, wo=wo)

    # TODO(synk): if the surrounding model is NHWC, return out2[..., :planes]
    # directly and skip this extra HBM read/write of the output.
    out = out2[..., :planes]
    return jnp.transpose(out, (0, 3, 1, 2)).astype(x_nchw.dtype)   # NHWC -> NCHW


# ---------------------------------------------------------------------------
# Pure-JAX reference (same bf16-in / f32-accumulate / folded-scale regime)
# ---------------------------------------------------------------------------
def _reference_forward(params, x_nchw):
    x = jnp.transpose(x_nchw, (0, 2, 3, 1)).astype(jnp.bfloat16)

    def conv_bn(inp, w, bn, stride):
        s, b = _fold_bn(bn)
        w_hwio = (jnp.transpose(w, (2, 3, 1, 0)) * s).astype(jnp.bfloat16)
        pad = 1 if w.shape[-1] == 3 else 0
        y = lax.conv_general_dilated(
            inp, w_hwio, window_strides=(stride, stride),
            padding=((pad, pad), (pad, pad)),
            dimension_numbers=("NHWC", "HWIO", "NHWC"),
            preferred_element_type=jnp.float32)
        return y + b

    out = jax.nn.relu(conv_bn(x, params["conv1_w"], params["bn1"], params["stride"]))
    out = conv_bn(out.astype(jnp.bfloat16), params["conv2_w"], params["bn2"], 1)
    if "sc_w" in params:
        sc = conv_bn(x, params["sc_w"], params["bn_sc"], params["stride"])
    else:
        sc = x.astype(jnp.float32)
    out = jax.nn.relu(out + sc)
    return jnp.transpose(out, (0, 3, 1, 2))


if __name__ == "__main__":
    key = jax.random.PRNGKey(0)
    kx, kp1, kp2 = jax.random.split(key, 3)
    x = jax.random.normal(kx, (2, 4, 16, 16), jnp.float32)   # NCHW, like PyTorch

    # Config 1: identity shortcut (in_planes == planes, stride 1)
    params1 = init_basic_block(kp1, 4, 4, 1)
    y1 = jax.block_until_ready(basic_block_forward(params1, x))
    ref1 = _reference_forward(params1, x)
    np.testing.assert_allclose(np.asarray(y1), np.asarray(ref1),
                               rtol=2e-2, atol=2e-2)
    assert y1.shape == (2, 4, 16, 16)

    # Config 2: projection shortcut (stride 2, channel expansion 4 -> 8)
    params2 = init_basic_block(kp2, 4, 8, 2)
    y2 = jax.block_until_ready(basic_block_forward(params2, x))
    ref2 = _reference_forward(params2, x)
    np.testing.assert_allclose(np.asarray(y2), np.asarray(ref2),
                               rtol=2e-2, atol=2e-2)
    assert y2.shape == (2, 8, 8, 8)

    print("KERNEL_OK")
</pallas_src>

<mosaic_0001>
module attributes {stable_mosaic.version = 11 : i64} {
  func.func @_conv_bn_relu_padded_out_kernel(%arg0: i32, %arg1: memref<1x528x4xbf16, #tpu.memory_space<vmem>>, %arg2: memref<9x4x128xbf16, #tpu.memory_space<vmem>>, %arg3: memref<1x128xf32, #tpu.memory_space<vmem>>, %arg4: memref<1x440x128xbf16, #tpu.memory_space<vmem>>) attributes {dimension_semantics = [#tpu.dimension_semantics<parallel>], iteration_bounds = array<i64: 2>, scalar_prefetch = 0 : i64, scratch_operands = 0 : i64, tpu.core_type = #tpu.core_type<tc>, window_params = [{transform_indices = @transform_0, window_bounds = array<i64: 1, 528, 4>}, {pipeline_mode = #tpu.pipeline_mode<synchronous>, transform_indices = @transform_1, window_bounds = array<i64: 9, 4, 128>}, {pipeline_mode = #tpu.pipeline_mode<synchronous>, transform_indices = @transform_2, window_bounds = array<i64: 1, 128>}, {transform_indices = @transform_3, window_bounds = array<i64: 1, 440, 128>}]} {
    %c0 = arith.constant 0 : index
    %c23 = arith.constant 23 : index
    %c0_0 = arith.constant 0 : index
    %0 = vector.load %arg1[%c0, %c23, %c0_0] : memref<1x528x4xbf16, #tpu.memory_space<vmem>>, vector<1x432x4xbf16>
    %1 = vector.shape_cast %0 : vector<1x432x4xbf16> to vector<432x4xbf16>
    %c0_1 = arith.constant 0 : index
    %c0_2 = arith.constant 0 : index
    %c0_3 = arith.constant 0 : index
    %2 = vector.load %arg2[%c0_1, %c0_2, %c0_3] : memref<9x4x128xbf16, #tpu.memory_space<vmem>>, vector<1x4x128xbf16>
    %3 = vector.shape_cast %2 : vector<1x4x128xbf16> to vector<4x128xbf16>
    %cst = arith.constant dense<0.000000e+00> : vector<432x128xf32>
    %4 = tpu.matmul %1, %3, %cst {dimension_numbers = #tpu.dot_dimension_numbers<[1], [0], [0], [1], [0, 0, 1, 1], [], []>} : vector<432x4xbf16>, vector<4x128xbf16>, vector<432x128xf32> -> vector<432x128xf32>
    %c0_4 = arith.constant 0 : index
    %c24 = arith.constant 24 : index
    %c0_5 = arith.constant 0 : index
    %5 = vector.load %arg1[%c0_4, %c24, %c0_5] : memref<1x528x4xbf16, #tpu.memory_space<vmem>>, vector<1x432x4xbf16>
    %6 = vector.shape_cast %5 : vector<1x432x4xbf16> to vector<432x4xbf16>
    %c1 = arith.constant 1 : index
    %c0_6 = arith.constant 0 : index
    %c0_7 = arith.constant 0 : index
    %7 = vector.load %arg2[%c1, %c0_6, %c0_7] : memref<9x4x128xbf16, #tpu.memory_space<vmem>>, vector<1x4x128xbf16>
    %8 = vector.shape_cast %7 : vector<1x4x128xbf16> to vector<4x128xbf16>
    %cst_8 = arith.constant dense<0.000000e+00> : vector<432x128xf32>
    %9 = tpu.matmul %6, %8, %cst_8 {dimension_numbers = #tpu.dot_dimension_numbers<[1], [0], [0], [1], [0, 0, 1, 1], [], []>} : vector<432x4xbf16>, vector<4x128xbf16>, vector<432x128xf32> -> vector<432x128xf32>
    %10 = arith.addf %4, %9 : vector<432x128xf32>
    %c0_9 = arith.constant 0 : index
    %c25 = arith.constant 25 : index
    %c0_10 = arith.constant 0 : index
    %11 = vector.load %arg1[%c0_9, %c25, %c0_10] : memref<1x528x4xbf16, #tpu.memory_space<vmem>>, vector<1x432x4xbf16>
    %12 = vector.shape_cast %11 : vector<1x432x4xbf16> to vector<432x4xbf16>
    %c2 = arith.constant 2 : index
    %c0_11 = arith.constant 0 : index
    %c0_12 = arith.constant 0 : index
    %13 = vector.load %arg2[%c2, %c0_11, %c0_12] : memref<9x4x128xbf16, #tpu.memory_space<vmem>>, vector<1x4x128xbf16>
    %14 = vector.shape_cast %13 : vector<1x4x128xbf16> to vector<4x128xbf16>
    %cst_13 = arith.constant dense<0.000000e+00> : vector<432x128xf32>
    %15 = tpu.matmul %12, %14, %cst_13 {dimension_numbers = #tpu.dot_dimension_numbers<[1], [0], [0], [1], [0, 0, 1, 1], [], []>} : vector<432x4xbf16>, vector<4x128xbf16>, vector<432x128xf32> -> vector<432x128xf32>
    %16 = arith.addf %10, %15 : vector<432x128xf32>
    %c0_14 = arith.constant 0 : index
    %c47 = arith.constant 47 : index
    %c0_15 = arith.constant 0 : index
    %17 = vector.load %arg1[%c0_14, %c47, %c0_15] : memref<1x528x4xbf16, #tpu.memory_space<vmem>>, vector<1x432x4xbf16>
    %18 = vector.shape_cast %17 : vector<1x432x4xbf16> to vector<432x4xbf16>
    %c3 = arith.constant 3 : index
    %c0_16 = arith.constant 0 : index
    %c0_17 = arith.constant 0 : index
    %19 = vector.load %arg2[%c3, %c0_16, %c0_17] : memref<9x4x128xbf16, #tpu.memory_space<vmem>>, vector<1x4x128xbf16>
    %20 = vector.shape_cast %19 : vector<1x4x128xbf16> to vector<4x128xbf16>
    %cst_18 = arith.constant dense<0.000000e+00> : vector<432x128xf32>
    %21 = tpu.matmul %18, %20, %cst_18 {dimension_numbers = #tpu.dot_dimension_numbers<[1], [0], [0], [1], [0, 0, 1, 1], [], []>} : vector<432x4xbf16>, vector<4x128xbf16>, vector<432x128xf32> -> vector<432x128xf32>
    %22 = arith.addf %16, %21 : vector<432x128xf32>
    %c0_19 = arith.constant 0 : index
    %c48 = arith.constant 48 : index
    %c0_20 = arith.constant 0 : index
    %23 = vector.load %arg1[%c0_19, %c48, %c0_20] : memref<1x528x4xbf16, #tpu.memory_space<vmem>>, vector<1x432x4xbf16>
    %24 = vector.shape_cast %23 : vector<1x432x4xbf16> to vector<432x4xbf16>
    %c4 = arith.constant 4 : index
    %c0_21 = arith.constant 0 : index
    %c0_22 = arith.constant 0 : index
    %25 = vector.load %arg2[%c4, %c0_21, %c0_22] : memref<9x4x128xbf16, #tpu.memory_space<vmem>>, vector<1x4x128xbf16>
    %26 = vector.shape_cast %25 : vector<1x4x128xbf16> to vector<4x128xbf16>
    %cst_23 = arith.constant dense<0.000000e+00> : vector<432x128xf32>
    %27 = tpu.matmul %24, %26, %cst_23 {dimension_numbers = #tpu.dot_dimension_numbers<[1], [0], [0], [1], [0, 0, 1, 1], [], []>} : vector<432x4xbf16>, vector<4x128xbf16>, vector<432x128xf32> -> vector<432x128xf32>
    %28 = arith.addf %22, %27 : vector<432x128xf32>
    %c0_24 = arith.constant 0 : index
    %c49 = arith.constant 49 : index
    %c0_25 = arith.constant 0 : index
    %29 = vector.load %arg1[%c0_24, %c49, %c0_25] : memref<1x528x4xbf16, #tpu.memory_space<vmem>>, vector<1x432x4xbf16>
    %30 = vector.shape_cast %29 : vector<1x432x4xbf16> to vector<432x4xbf16>
    %c5 = arith.constant 5 : index
    %c0_26 = arith.constant 0 : index
    %c0_27 = arith.constant 0 : index
    %31 = vector.load %arg2[%c5, %c0_26, %c0_27] : memref<9x4x128xbf16, #tpu.memory_space<vmem>>, vector<1x4x128xbf16>
    %32 = vector.shape_cast %31 : vector<1x4x128xbf16> to vector<4x128xbf16>
    %cst_28 = arith.constant dense<0.000000e+00> : vector<432x128xf32>
    %33 = tpu.matmul %30, %32, %cst_28 {dimension_numbers = #tpu.dot_dimension_numbers<[1], [0], [0], [1], [0, 0, 1, 1], [], []>} : vector<432x4xbf16>, vector<4x128xbf16>, vector<432x128xf32> -> vector<432x128xf32>
    %34 = arith.addf %28, %33 : vector<432x128xf32>
    %c0_29 = arith.constant 0 : index
    %c71 = arith.constant 71 : index
    %c0_30 = arith.constant 0 : index
    %35 = vector.load %arg1[%c0_29, %c71, %c0_30] : memref<1x528x4xbf16, #tpu.memory_space<vmem>>, vector<1x432x4xbf16>
    %36 = vector.shape_cast %35 : vector<1x432x4xbf16> to vector<432x4xbf16>
    %c6 = arith.constant 6 : index
    %c0_31 = arith.constant 0 : index
    %c0_32 = arith.constant 0 : index
    %37 = vector.load %arg2[%c6, %c0_31, %c0_32] : memref<9x4x128xbf16, #tpu.memory_space<vmem>>, vector<1x4x128xbf16>
    %38 = vector.shape_cast %37 : vector<1x4x128xbf16> to vector<4x128xbf16>
    %cst_33 = arith.constant dense<0.000000e+00> : vector<432x128xf32>
    %39 = tpu.matmul %36, %38, %cst_33 {dimension_numbers = #tpu.dot_dimension_numbers<[1], [0], [0], [1], [0, 0, 1, 1], [], []>} : vector<432x4xbf16>, vector<4x128xbf16>, vector<432x128xf32> -> vector<432x128xf32>
    %40 = arith.addf %34, %39 : vector<432x128xf32>
    %c0_34 = arith.constant 0 : index
    %c72 = arith.constant 72 : index
    %c0_35 = arith.constant 0 : index
    %41 = vector.load %arg1[%c0_34, %c72, %c0_35] : memref<1x528x4xbf16, #tpu.memory_space<vmem>>, vector<1x432x4xbf16>
    %42 = vector.shape_cast %41 : vector<1x432x4xbf16> to vector<432x4xbf16>
    %c7 = arith.constant 7 : index
    %c0_36 = arith.constant 0 : index
    %c0_37 = arith.constant 0 : index
    %43 = vector.load %arg2[%c7, %c0_36, %c0_37] : memref<9x4x128xbf16, #tpu.memory_space<vmem>>, vector<1x4x128xbf16>
    %44 = vector.shape_cast %43 : vector<1x4x128xbf16> to vector<4x128xbf16>
    %cst_38 = arith.constant dense<0.000000e+00> : vector<432x128xf32>
    %45 = tpu.matmul %42, %44, %cst_38 {dimension_numbers = #tpu.dot_dimension_numbers<[1], [0], [0], [1], [0, 0, 1, 1], [], []>} : vector<432x4xbf16>, vector<4x128xbf16>, vector<432x128xf32> -> vector<432x128xf32>
    %46 = arith.addf %40, %45 : vector<432x128xf32>
    %c0_39 = arith.constant 0 : index
    %c73 = arith.constant 73 : index
    %c0_40 = arith.constant 0 : index
    %47 = vector.load %arg1[%c0_39, %c73, %c0_40] : memref<1x528x4xbf16, #tpu.memory_space<vmem>>, vector<1x432x4xbf16>
    %48 = vector.shape_cast %47 : vector<1x432x4xbf16> to vector<432x4xbf16>
    %c8 = arith.constant 8 : index
    %c0_41 = arith.constant 0 : index
    %c0_42 = arith.constant 0 : index
    %49 = vector.load %arg2[%c8, %c0_41, %c0_42] : memref<9x4x128xbf16, #tpu.memory_space<vmem>>, vector<1x4x128xbf16>
    %50 = vector.shape_cast %49 : vector<1x4x128xbf16> to vector<4x128xbf16>
    %cst_43 = arith.constant dense<0.000000e+00> : vector<432x128xf32>
    %51 = tpu.matmul %48, %50, %cst_43 {dimension_numbers = #tpu.dot_dimension_numbers<[1], [0], [0], [1], [0, 0, 1, 1], [], []>} : vector<432x4xbf16>, vector<4x128xbf16>, vector<432x128xf32> -> vector<432x128xf32>
    %52 = arith.addf %46, %51 : vector<432x128xf32>
    %c0_44 = arith.constant 0 : index
    %c0_45 = arith.constant 0 : index
    %53 = vector.load %arg3[%c0_44, %c0_45] : memref<1x128xf32, #tpu.memory_space<vmem>>, vector<1x128xf32>
    %54 = vector.broadcast %53 : vector<1x128xf32> to vector<432x128xf32>
    %55 = arith.addf %52, %54 : vector<432x128xf32>
    %cst_46 = arith.constant 0.000000e+00 : f32
    %56 = vector.broadcast %cst_46 : f32 to vector<432x128xf32>
    %57 = arith.maximumf %55, %56 : vector<432x128xf32>
    %58 = vector.shape_cast %57 : vector<432x128xf32> to vector<18x24x128xf32>
    %59 = tpu.iota {dimensions = array<i32: 0>} : vector<18x24x1xi32>
    %60 = tpu.iota {dimensions = array<i32: 1>} : vector<18x24x1xi32>
    %c1_i32 = arith.constant 1 : i32
    %61 = vector.broadcast %c1_i32 : i32 to vector<18x24x1xi32>
    %62 = arith.cmpi sge, %59, %61 : vector<18x24x1xi32>
    %c16_i32 = arith.constant 16 : i32
    %63 = vector.broadcast %c16_i32 : i32 to vector<18x24x1xi32>
    %64 = arith.cmpi sle, %59, %63 : vector<18x24x1xi32>
    %65 = arith.andi %62, %64 : vector<18x24x1xi1>
    %c1_i32_47 = arith.constant 1 : i32
    %66 = vector.broadcast %c1_i32_47 : i32 to vector<18x24x1xi32>
    %67 = arith.cmpi sge, %60, %66 : vector<18x24x1xi32>
    %68 = arith.andi %65, %67 : vector<18x24x1xi1>
    %c16_i32_48 = arith.constant 16 : i32
    %69 = vector.broadcast %c16_i32_48 : i32 to vector<18x24x1xi32>
    %70 = arith.cmpi sle, %60, %69 : vector<18x24x1xi32>
    %71 = arith.andi %68, %70 : vector<18x24x1xi1>
    %cst_49 = arith.constant 0.000000e+00 : f32
    %72 = vector.shape_cast %71 : vector<18x24x1xi1> to vector<18x24x1xi1>
    %73 = vector.broadcast %72 : vector<18x24x1xi1> to vector<18x24x128xi1>
    %74 = vector.broadcast %cst_49 : f32 to vector<18x24x128xf32>
    %75 = arith.select %73, %58, %74 : vector<18x24x128xi1>, vector<18x24x128xf32>
    %76 = vector.shape_cast %75 : vector<18x24x128xf32> to vector<432x128xf32>
    %77 = arith.truncf %76 : vector<432x128xf32> to vector<432x128xbf16>
    %c0_50 = arith.constant 0 : index
    %c0_51 = arith.constant 0 : index
    %c0_52 = arith.constant 0 : index
    %78 = vector.load %arg4[%c0_50, %c0_51, %c0_52] : memref<1x440x128xbf16, #tpu.memory_space<vmem>>, vector<1x432x128xbf16>
    %79 = vector.shape_cast %78 : vector<1x432x128xbf16> to vector<432x128xbf16>
    %80 = vector.shape_cast %77 : vector<432x128xbf16> to vector<1x432x128xbf16>
    tpu.vector_store %arg4[%c0_50, %c0_51, %c0_52], %80 {strides = array<i32>} : memref<1x440x128xbf16, #tpu.memory_space<vmem>>, vector<1x432x128xbf16>,
    %cst_53 = arith.constant 0.000000e+00 : bf16
    %81 = vector.broadcast %cst_53 : bf16 to vector<8x128xbf16>
    %c0_54 = arith.constant 0 : index
    %c432 = arith.constant 432 : index
    %c0_55 = arith.constant 0 : index
    %82 = vector.load %arg4[%c0_54, %c432, %c0_55] : memref<1x440x128xbf16, #tpu.memory_space<vmem>>, vector<1x8x128xbf16>
    %83 = vector.shape_cast %82 : vector<1x8x128xbf16> to vector<8x128xbf16>
    %84 = vector.shape_cast %81 : vector<8x128xbf16> to vector<1x8x128xbf16>
    tpu.vector_store %arg4[%c0_54, %c432, %c0_55], %84 {strides = array<i32>} : memref<1x440x128xbf16, #tpu.memory_space<vmem>>, vector<1x8x128xbf16>,
    return
  }
  func.func @transform_0(%arg0: i32) -> (i32, i32, i32) {
    %c0_i32 = arith.constant 0 : i32
    %c0_i32_0 = arith.constant 0 : i32
    %c0_i32_1 = arith.constant 0 : i32
    return %arg0, %c0_i32, %c0_i32_0 : i32, i32, i32
  }
  func.func @transform_1(%arg0: i32) -> (i32, i32, i32) {
    %c0_i32 = arith.constant 0 : i32
    %c0_i32_0 = arith.constant 0 : i32
    %c0_i32_1 = arith.constant 0 : i32
    %c0_i32_2 = arith.constant 0 : i32
    return %c0_i32, %c0_i32_0, %c0_i32_1 : i32, i32, i32
  }
  func.func @transform_2(%arg0: i32) -> (i32, i32) {
    %c0_i32 = arith.constant 0 : i32
    %c0_i32_0 = arith.constant 0 : i32
    %c0_i32_1 = arith.constant 0 : i32
    return %c0_i32, %c0_i32_0 : i32, i32
  }
  func.func @transform_3(%arg0: i32) -> (i32, i32, i32) {
    %c0_i32 = arith.constant 0 : i32
    %c0_i32_0 = arith.constant 0 : i32
    %c0_i32_1 = arith.constant 0 : i32
    return %arg0, %c0_i32, %c0_i32_0 : i32, i32, i32
  }
}

</mosaic_0001>

<bundles_post_ra>
// kernel: tpu_custom_call.1
= control target key start
LH: loop header
LB: loop body
LE: loop exit
PB: predicated region body
PF: predicated region fallthrough
CT: control target
= control target key end

     0   :  { %8 = vsyncpa [#allocation3], 0  ;;  %s8931_s0 = inlined_call_operand.vmem [shape: bf16[2,528,4], index: 0, kind: input, shape index: {}]   ;;  %s8932_s1 = inlined_call_operand.vmem [shape: bf16[9,4,128], index: 1, kind: input, shape index: {}]   ;;  %s8933_s2 = inlined_call_operand.vmem [shape: f32[1,128], index: 2, kind: input, shape index: {}]   ;;  %s8934_s3 = inlined_call_operand.hbm [shape: bf16[2,440,128], index: 3, kind: output, shape index: {}]  }
   0x1   :  { %10 = vsyncpa [#allocation3 + $0x1], 0  ;;  %s7557_s12 = smov 0   ;;  %s7559_s13 = smov 0  }
   0x2   :  { %s7561_s14 = smov 0   ;;  %s7563_s15 = smov 0  }
   0x3 LB: > { %s7578_s16 = sadd.s32 4294967295, %s7531_s15   ;;  %s5660_s17 = sadd.s32 4294967294, %s7531_s15   ;;  %s7531_s15 = sphi %s7563_s15, %s9001_s15   ;;  %s7527_s14 = sphi %s7561_s14, %s9000_s14   ;;  %s7523_s13 = sphi %s7559_s13, %s8999_s13   ;;  %s7519_s12 = sphi %s7557_s12, %s8998_s12  }
   0x4   : > { %s7582_s18 = sadd.s32 1, %s7531_s15   ;;  %s91_s19 = sadd.s32 1, %s7527_s14 }
   0x5   : > { %s88_s20 = ssub.s32 %s7531_s15, %s7582_s18  ;;  %p101_p0 = scmp.ne.s32.totalorder %s7527_s14, %s7523_s13 }
   0x6   : > { %p89_p1 = scmp.eq.s32.totalorder %s88_s20, 0  ;;  %p102_p2 = scmp.eq.s32.totalorder %s7578_s16, 1 }
   0x7   : > { %p107_p3 = scmp.ne.s32.totalorder %s7523_s13, %s7519_s12  ;;  %p108_p4 = scmp.eq.s32.totalorder %s5660_s17, 1 }
   0x8   : > { %s7593_s21 = scalar_select %p89_p1, %s7527_s14, %s91_s19  }
   0x9   : > { %p7595_p5 = por %p102_p2, %p101_p0  ;;  %p7599_p6 = por %p108_p4, %p107_p3 }
   0xa   : > { %p5663_p7 = scmp.ge.s32.totalorder %s7531_s15, 1  ;;  %p140_p8 = scmp.lt.s32.totalorder %s7531_s15, 3 }
   0xc   : > { %p141_p9 = pnand %p5663_p7, %p140_p8 }
   0xe   : > { %144 = sbr.rel (%p141_p9) target bundleno = 1128 (0x468), region = 32 }
  0x13   : > { %v5665_v0 = vld [vmem:[%s8932_s1 + $0x2] sm:$0x3]  ;;  %vm445_vm0 = vcmask 1041408   ;;  %p164_p10 = scmp.lt.s32.totalorder %s7578_s16, 1  ;;  %v5720_v2 = vld [vmem:[%s8932_s1 + $0x4] sm:$0x3] }
  0x14   : > { %v447_v1 = vsel %vm445_vm0, %v5665_v0, 0  ;;  %v225_v3 = vld [vmem:[%s8932_s1] sm:$0x3]  ;;  %v1601_v4 = vsel %vm445_vm0, %v5720_v2, 0  ;;  %v5884_v6 = vld [vmem:[%s8932_s1 + $0x8] sm:$0x3] }
  0x15   : > { %7314 = vmatpush.bf16.msra.mxu1 %v447_v1  ;;  %7315 = vmatpush.bf16.msra.mxu2 %v447_v1  ;;  %s165_s30 = scalar_select %p164_p10, %s7578_s16, 1  ;;  %v957_v5 = vsel %vm445_vm0, %v225_v3, 0  ;;  %v2640_v7 = vsel %vm445_vm0, %v5884_v6, 0  ;;  %v5856_v8 = vld [vmem:[%s8932_s1 + $0x6] sm:$0x3]  ;;  %vm363_vm1 = vcmask 31744  }
  0x16   : > { %456 = vmatpush.bf16.msra.mxu0 %v447_v1  ;;  %7316 = vmatpush.bf16.msra.mxu3 %v447_v1  ;;  %v2329_v9 = vsel %vm445_vm0, %v5856_v8, 0  ;;  %v6048_v46 = vld [vmem:[%s8932_s1 + $0xc] sm:$0x3]  ;;  %v6076_v47 = vld [vmem:[%s8932_s1 + $0xe] sm:$0x3]  ;;  %s161_s29 = sand.u32 1, %s7523_s13  }
  0x17   : > { %s7421_s8 = smul.u32 264, %s165_s30  ;;  %v4065_v48 = vsel %vm445_vm0, %v6048_v46, 0  ;;  %v4376_v49 = vsel %vm445_vm0, %v6076_v47, 0  ;;  %v5912_v54 = vld [vmem:[%s8932_s1 + $0xa] sm:$0x3]  ;;  %s5583_s20 = scalar_lea.sflag [#allocation3], %s161_s29 }
  0x18   : > { %v6104_v55 = vld [vmem:[%s8932_s1 + $0x10] sm:$0x3]  ;;  %v3337_v57 = vsel %vm445_vm0, %v5912_v54, 0  ;;  %vm623_vm2 = vsmask.f32 4352  ;;  %s7420_s30 = smul.u32 220, %s161_s29 }
  0x19   : > { %1610 = vmatpush.bf16.msrb.mxu2 %v1601_v4  ;;  %966 = vmatpush.bf16.msrb.mxu1 %v957_v5  ;;  %s7630_s11 = scalar_lea.vmem %s8931_s0, %s7421_s8  ;;  %v5073_v58 = vsel %vm445_vm0, %v6104_v55, 0  ;;  %vm1298_vm3 = vsmask.f32 7424  ;;  %s7422_s9 = smul.u32 220, %s7578_s16 }
  0x1a   : > { %2649 = vmatpush.bf16.msrb.mxu0 %v2640_v7  ;;  %2338 = vmatpush.bf16.msrb.mxu3 %v2329_v9  ;;  %v7331_v10 = vld [vmem:[%s7630_s11 + $0x44] sm:$0xff]   ;;  %v7345_v11 = vld [vmem:[%s7630_s11 + $0x7c] sm:$0xff]   ;;  %v7635_v12 = vld [vmem:[%s7630_s11 + $0xc] sm:$0xf]  ;;  %s8365_s4 = scalar_lea.vmem [#allocation2], %s7420_s30  ;;  %s7489_s28 = scalar_lea.hbm %s8934_s3, 440 }
  0x1b   : > { %v7638_v13 = vld [vmem:[%s7630_s11 + $0x10] sm:$0xff]   ;;  %5673 = vmatmul.msk.bf16.vlgmr.msra.gmra.mxu1 %vm363_vm1, %v7331_v10  ;;  %5680 = vmatmul.msk.bf16.vlgmr.msra.gmra.mxu2 %vm363_vm1, %v7345_v11  ;;  %v282_v16 = vunpack.c.l.b16 %v7635_v12  ;;  %v7347_v19 = vld [vmem:[%s7630_s11 + $0x84] sm:$0xff]   ;;  %v7361_v20 = vld [vmem:[%s7630_s11 + $0xbc] sm:$0xff]   ;;  %s5594_s17 = scalar_lea.hbm %s8934_s3, %s7422_s9  ;;  %s5595_s19 = sshll.u32 %s8365_s4, 4  ;;  %s5596_s19 = int_to_ptr.vmem [resolvable:$true] %s5595_s19 }
  0x1c   : > { %v7359_v14 = vld [vmem:[%s7630_s11 + $0xb4] sm:$0xff]   ;;  %v6326_v15 = vunpack.c.l.b16 %v7638_v13  ;;  %v7333_v18 = vld [vmem:[%s7630_s11 + $0x4c] sm:$0xff]   ;;  %v7363_v24 = vld [vmem:[%s7630_s11 + $0xc4] sm:$0xff]   ;;  %v633_v11 = vshrl.u32 %v7638_v13, 16  ;;  %v636_v12 = vshll.u32 %v7638_v13, 16  ;;  %s5597_s16 = sshll.u32 %s5594_s17, 4  ;;  %s5598_s16 = int_to_ptr.hbm [resolvable:$true] %s5597_s16 }
  0x1d   : > { %5687 = vmatmul.msk.bf16.vlgmr.msra.gmra.mxu3 %vm363_vm1, %v7359_v14  ;;  %v7319_v21 = vld [vmem:[%s7630_s11 + $0x14] sm:$0xff]   ;;  %v7349_v23 = vld [vmem:[%s7630_s11 + $0x8c] sm:$0xff]   ;;  %v7321_v25 = vld [vmem:[%s7630_s11 + $0x1c] sm:$0xff]   ;;  %4074 = vmatpush.bf16.msra.mxu2 %v4065_v48  ;;  %s7483_s24 = sshra.s32 %s5598_s16, 4  ;;  %s7484_s24 = int_to_ptr.hbm [resolvable:$true] %s7483_s24 }
  0x1e   : > { %v336_v17 = vpack.c.b16 %v6326_v15, %v282_v16  ;;  %v7335_v22 = vld [vmem:[%s7630_s11 + $0x54] sm:$0xff]   ;;  %v7337_v26 = vld [vmem:[%s7630_s11 + $0x5c] sm:$0xff]   ;;  %v7365_v28 = vld [vmem:[%s7630_s11 + $0xcc] sm:$0xff]   ;;  %4385 = vmatpush.bf16.msra.mxu3 %v4376_v49  ;;  %3346 = vmatpush.bf16.msra.mxu1 %v3337_v57  ;;  %s7485_s25 = scalar_lea.hbm %s7484_s24, 220  ;;  %p7490_p0 = scmp.lt.s32.totalorder %s7484_s24, %s8934_s3 }
  0x1f   : > { %v7351_v27 = vld [vmem:[%s7630_s11 + $0x94] sm:$0xff]   ;;  %v7323_v29 = vld [vmem:[%s7630_s11 + $0x24] sm:$0xff]   ;;  %v7353_v31 = vld [vmem:[%s7630_s11 + $0x9c] sm:$0xff]   ;;  %p7486_p11 = scmp.ne.s32.totalorder %s7484_s24, %s7485_s25  ;;  %p7491_p1 = scmp.lt.s32.totalorder %s7489_s28, %s7485_s25 }
  0x20   : > { %5666 = vmatmul.msk.bf16.vlgmr.msra.gmra.mxu0 %vm363_vm1, %v336_v17  ;;  %v7339_v30 = vld [vmem:[%s7630_s11 + $0x64] sm:$0xff]   ;;  %v7366_v32 = vld [vmem:[%s7630_s11 + $0xd4] sm:$0xff]   ;;  %v7325_v33 = vld [vmem:[%s7630_s11 + $0x2c] sm:$0xff]  }
  0x21   : > { %v6800_v34 = vld [vmem:[%s7630_s11 + $0xd8] sm:$0xff]   ;;  %v224_v35 = vld [vmem:[%s7630_s11 + $0xe0] sm:$0xf]  ;;  %v7132_v38 = vld [vmem:[%s7630_s11 + $0x14] sm:$0x8]  ;;  %5082 = vmatpush.bf16.msra.mxu0 %v5073_v58  ;;  %p7487_p12 = pnand %p7486_p11, %p7595_p5  ;;  %p7492_p2 = por %p7491_p1, %p7490_p0 }
  0x22   : > { %v6427_v36 = vunpack.c.h.b16 %v6800_v34  ;;  %v7683_v37 = vunpack.c.l.b16 %v224_v35  ;;  %v7368_v39 = vld [vmem:[%s7630_s11 + $0x14] sm:$0xf0]   ;;  %v7341_v40 = vld [vmem:[%s7630_s11 + $0x6c] sm:$0xff]   ;;  %v7355_v41 = vld [vmem:[%s7630_s11 + $0xa4] sm:$0xff]  }
  0x23   : > { %v7370_v43 = vld [vmem:[%s7630_s11 + $0x1c] sm:$0xff]   ;;  %v7133_v44 = vor.u32 %v7368_v39, %v7132_v38  ;;  %v7327_v45 = vld [vmem:[%s7630_s11 + $0x34] sm:$0xff]   ;;  %v170_v56 = vld [vmem:[%s7630_s11 + $0x8] sm:$0x8]  ;;  %p7488_p13 = pneg %p7487_p12 }
  0x24   : > { %v362_v42 = vpack.c.b16 %v7683_v37, %v6427_v36  ;;  %v2005_v52 = vshrl.u32 %v7370_v43, 16  ;;  %v2008_v53 = vshll.u32 %v7370_v43, 16  ;;  %v594_v63 = vunpack.c.l.b16 %v170_v56  ;;  %v7343_v3 = vld [vmem:[%s7630_s11 + $0x74] sm:$0xff]   ;;  %v7357_v4 = vld [vmem:[%s7630_s11 + $0xac] sm:$0xff]   ;;  %v7372_v7 = vld [vmem:[%s7630_s11 + $0x24] sm:$0xff]  }
  0x25   : > { %v1997_v50 = vshrl.u32 %v7133_v44, 16  ;;  %v2000_v51 = vshll.u32 %v7133_v44, 16  ;;  %v6243_v5 = vld [vmem:[%s7630_s11 + $0xc] sm:$0xff]  ;;  %v7329_v10 = vld [vmem:[%s7630_s11 + $0x3c] sm:$0xff]   ;;  %v6244_v14 = vld [vmem:[%s7630_s11 + $0x14] sm:$0xff]  ;;  %v2017_v17 = vshll.u32 %v7372_v7, 16  ;;  %p7493_p3 = pnand %p7492_p2, %p7488_p13 }
  0x26   : > { %v2007_v61 = vrot.slane %v2005_v52, 3  ;;  %v2010_v62 = vrot.slane %v2008_v53, 4  ;;  %v595_v2 = vpack.c.b16 %v282_v16, %v594_v63  ;;  %v1302_v15 = vshll.u32 %v6243_v5, 16  ;;  %v7374_v34 = vld [vmem:[%s7630_s11 + $0x2c] sm:$0xff]   ;;  %v6801_v35 = vld [vmem:[%s7630_s11 + $0x18] sm:$0xff]   ;;  %v6802_v57 = vld [vmem:[%s7630_s11 + $0x20] sm:$0xff]  }
  0x27   : > { %v1999_v59 = vrot.slane %v1997_v50, 3  ;;  %v2002_v60 = vrot.slane %v2000_v51, 4  ;;  %v2014_v16 = vshrl.u32 %v7372_v7, 16  ;;  %v642_v36 = vshrl.u32 %v6801_v35, 16  ;;  %v6245_v39 = vld [vmem:[%s7630_s11 + $0x1c] sm:$0xff]  ;;  %v7376_v56 = vld [vmem:[%s7630_s11 + $0x34] sm:$0xff]  }
  0x28   : > { %v2011_v1 = vor.u32 %v2010_v62, %v2007_v61  ;;  %v625_v8 = vshrl.u32 %v595_v2, 16  ;;  %v628_v9 = vshll.u32 %v595_v2, 16  ;;  %v645_v38 = vshll.u32 %v6801_v35, 16  ;;  %v6246_v61 = vld [vmem:[%s7630_s11 + $0x24] sm:$0xff] }
  0x29   : > { %v2003_v0 = vor.u32 %v2002_v60, %v1999_v59  ;;  %v1311_v44 = vshrl.u32 %v6244_v14, 16  ;;  %v651_v59 = vshrl.u32 %v6802_v57, 16  ;;  %v654_v60 = vshll.u32 %v6802_v57, 16 }
  0x2a   : > { %v647_v43 = vrot.slane %v645_v38, 4  ;;  %v2032_v62 = vshrl.u32 %v7376_v56, 16  ;;  %v2035_v63 = vshll.u32 %v7376_v56, 16 }
  0x2b   : > { %5674 = vmatmul.msk.bf16.gmra.mxu1 %vm363_vm1, %v7333_v18  ;;  %5681 = vmatmul.msk.bf16.gmra.mxu2 %vm363_vm1, %v7347_v19  ;;  %v2012_v6 = vsel %vm623_vm2, %v2003_v0, %v2011_v1  ;;  %v627_v18 = vrot.slane %v625_v8, 3  ;;  %v630_v19 = vrot.slane %v628_v9, 4 }
  0x2c   : > { %v2034_v7 = vrot.slane %v2032_v62, 3  ;;  %v2037_v8 = vrot.slane %v2035_v63, 4 }
  0x2d   : > { %5688 = vmatmul.msk.bf16.gmra.mxu3 %vm363_vm1, %v7361_v20  ;;  %v635_v20 = vrot.slane %v633_v11, 3 }
  0x30   : > { %5667 = vmatmul.msk.bf16.gmra.mxu0 %vm363_vm1, %v7319_v21  ;;  %v638_v21 = vrot.slane %v636_v12, 4 }
  0x32   : > { %v639_v13 = vor.u32 %v638_v21, %v635_v20  ;;  %v7378_v21 = vld [vmem:[%s7630_s11 + $0x3c] sm:$0xff]  }
  0x3b   : > { %5675 = vmatmul.msk.bf16.gmra.mxu1 %vm363_vm1, %v7335_v22  ;;  %5682 = vmatmul.msk.bf16.gmra.mxu2 %vm363_vm1, %v7349_v23  ;;  %v1300_v22 = vshrl.u32 %v6243_v5, 16  ;;  %v1304_v23 = vrot.slane %v1302_v15, 1  ;;  %v1319_v5 = vshrl.u32 %v6245_v39, 16 }
  0x3d   : > { %5689 = vmatmul.msk.bf16.gmra.mxu3 %vm363_vm1, %v7363_v24  ;;  %v1307_v24 = vshll.u32 %v6244_v14, 16  ;;  %v2038_v14 = vor.u32 %v2037_v8, %v2034_v7 }
  0x40   : > { %5668 = vmatmul.msk.bf16.gmra.mxu0 %vm363_vm1, %v7321_v25  ;;  %v2016_v25 = vrot.slane %v2014_v16, 3 }
  0x4b   : > { %5676 = vmatmul.msk.bf16.gmra.mxu1 %vm363_vm1, %v7337_v26  ;;  %5683 = vmatmul.msk.bf16.gmra.mxu2 %vm363_vm1, %v7351_v27  ;;  %v2019_v26 = vrot.slane %v2017_v17, 4  ;;  %v631_v27 = vor.u32 %v630_v19, %v627_v18 }
  0x4d   : > { %5690 = vmatmul.msk.bf16.gmra.mxu3 %vm363_vm1, %v7365_v28  ;;  %v1305_v28 = vor.u32 %v1304_v23, %v1300_v22  ;;  %v6803_v22 = vld [vmem:[%s7630_s11 + $0x28] sm:$0xff]  }
  0x50   : > { %5669 = vmatmul.msk.bf16.gmra.mxu0 %vm363_vm1, %v7323_v29  ;;  %v1309_v29 = vrot.slane %v1307_v24, 1  ;;  %v660_v24 = vshrl.u32 %v6803_v22, 16 }
  0x52   : > { %v1313_v49 = vor.u32 %v1311_v44, %v1309_v29 }
  0x5b   : > { %5677 = vmatmul.msk.bf16.gmra.mxu1 %vm363_vm1, %v7339_v30  ;;  %5684 = vmatmul.msk.bf16.gmra.mxu2 %vm363_vm1, %v7353_v31  ;;  %v2020_v30 = vor.u32 %v2019_v26, %v2016_v25  ;;  %v640_v31 = vsel %vm623_vm2, %v631_v27, %v639_v13  ;;  %v663_v25 = vshll.u32 %v6803_v22, 16  ;;  %v6247_v26 = vld [vmem:[%s7630_s11 + $0x2c] sm:$0xff]  ;;  %v2041_v27 = vshrl.u32 %v7378_v21, 16 }
  0x5c   : > { %v1335_v63 = vshrl.u32 %v6247_v26, 16 }
  0x5d   : > { %5691 = vmatmul.msk.bf16.gmra.mxu3 %vm363_vm1, %v7366_v32  ;;  %v1310_v32 = vsel %vm1298_vm3, %v1305_v28, %v1309_v29 }
  0x60   : > { %5670 = vmatmul.msk.bf16.gmra.mxu0 %vm363_vm1, %v7325_v33  ;;  %v2021_v33 = vsel %vm623_vm2, %v2011_v1, %v2020_v30 }
  0x6b   : > { %5678 = vmatmul.msk.bf16.gmra.mxu1 %vm363_vm1, %v7341_v40  ;;  %5685 = vmatmul.msk.bf16.gmra.mxu2 %vm363_vm1, %v7355_v41  ;;  %v2023_v40 = vshrl.u32 %v7374_v34, 16  ;;  %v2026_v41 = vshll.u32 %v7374_v34, 16  ;;  %v1331_v34 = vshll.u32 %v6247_v26, 16  ;;  %v6249_v26 = vld [vmem:[%s7630_s11 + $0x3c] sm:$0xff] }
  0x6d   : > { %5692 = vmatmul.msk.bf16.gmra.mxu3 %vm363_vm1, %v362_v42  ;;  %v644_v42 = vrot.slane %v642_v36, 3  ;;  %v2025_v46 = vrot.slane %v2023_v40, 3  ;;  %v2028_v47 = vrot.slane %v2026_v41, 4  ;;  %v1333_v41 = vrot.slane %v1331_v34, 1 }
  0x6f   : > { %v648_v48 = vor.u32 %v647_v43, %v644_v42  ;;  %v2029_v51 = vor.u32 %v2028_v47, %v2025_v46  ;;  %v1337_v8 = vor.u32 %v1335_v63, %v1333_v41 }
  0x70   : > { %5671 = vmatmul.msk.bf16.gmra.mxu0 %vm363_vm1, %v7327_v45  ;;  %v1315_v45 = vshll.u32 %v6245_v39, 16 }
  0x71   : > { %v649_v53 = vsel %vm623_vm2, %v639_v13, %v648_v48  ;;  %v2030_v55 = vsel %vm623_vm2, %v2020_v30, %v2029_v51  ;;  %v2039_v20 = vsel %vm623_vm2, %v2029_v51, %v2038_v14  ;;  %v2044_v13 = vshll.u32 %v7378_v21, 16  ;;  %v7382_v21 = vld [vmem:[%s7630_s11 + $0x4c] sm:$0xff]  }
  0x72   : > { %v1317_v50 = vrot.slane %v1315_v45, 1 }
  0x73   : > { %v2046_v36 = vrot.slane %v2044_v13, 4  ;;  %v2062_v13 = vshll.u32 %v7382_v21, 16 }
  0x74   : > { %v1318_v54 = vsel %vm1298_vm3, %v1313_v49, %v1317_v50  ;;  %v1321_v11 = vor.u32 %v1319_v5, %v1317_v50  ;;  %v7380_v49 = vld [vmem:[%s7630_s11 + $0x44] sm:$0xff]   ;;  %v6804_v50 = vld [vmem:[%s7630_s11 + $0x30] sm:$0xff]  }
  0x75   : > { %v2050_v56 = vshrl.u32 %v7380_v49, 16 }
  0x7b   : > { %5679 = vmatmul.msk.bf16.gmra.mxu1 %vm363_vm1, %v7343_v3  ;;  %5686 = vmatmul.msk.bf16.gmra.mxu2 %vm363_vm1, %v7357_v4  ;;  %v653_v3 = vrot.slane %v651_v59, 3  ;;  %v656_v4 = vrot.slane %v654_v60, 4 }
  0x7d   : > { %5857 = vmatmul.msk.bf16.vlgmr.msrb.gmra.mxu3 %vm363_vm1, %v2012_v6  ;;  %v1323_v6 = vshll.u32 %v6246_v61, 16 }
  0x7f   : > { %v1325_v12 = vrot.slane %v1323_v6, 1 }
  0x80   : > { %5672 = vmatmul.msk.bf16.gmra.mxu0 %vm363_vm1, %v7329_v10  ;;  %v657_v10 = vor.u32 %v656_v4, %v653_v3  ;;  %v2052_v4 = vrot.slane %v2050_v56, 3 }
  0x81   : > { %v1326_v19 = vsel %vm1298_vm3, %v1321_v11, %v1325_v12 }
  0x82   : > { %v658_v18 = vsel %vm623_vm2, %v648_v48, %v657_v10 }
  0x8b   : > { %5693 = vmatmul.msk.bf16.vlgmr.msrb.gmra.mxu1 %vm363_vm1, %v640_v31  ;;  %5829 = vmatmul.msk.bf16.vlgmr.msrb.gmra.mxu2 %vm363_vm1, %v1310_v32  ;;  %v662_v31 = vrot.slane %v660_v24, 3  ;;  %v665_v32 = vrot.slane %v663_v25, 4 }
  0x8d   : > { %5858 = vmatmul.msk.bf16.gmra.mxu3 %vm363_vm1, %v2021_v33  ;;  %v1327_v33 = vshrl.u32 %v6246_v61, 16  ;;  %v666_v39 = vor.u32 %v665_v32, %v662_v31 }
  0x8f   : > { %v1329_v40 = vor.u32 %v1327_v33, %v1325_v12  ;;  %v667_v46 = vsel %vm623_vm2, %v657_v10, %v666_v39 }
  0x90   : > { %5885 = vmatmul.msk.bf16.vlgmr.msrb.gmra.mxu0 %vm363_vm1, %v6801_v35  ;;  %v2043_v35 = vrot.slane %v2041_v27, 3  ;;  %v2059_v27 = vshrl.u32 %v7382_v21, 16  ;;  %v1351_v21 = vshrl.u32 %v6249_v26, 16 }
  0x91   : > { %v1334_v47 = vsel %vm1298_vm3, %v1329_v40, %v1333_v41  ;;  %v2064_v41 = vrot.slane %v2062_v13, 4 }
  0x92   : > { %v2047_v42 = vor.u32 %v2046_v36, %v2043_v35  ;;  %v2061_v40 = vrot.slane %v2059_v27, 3 }
  0x94   : > { %v2048_v48 = vsel %vm623_vm2, %v2038_v14, %v2047_v42 }
  0x98   : > { %v7738_v52 = vpop.f32.mrf.mxu1 }
  0x9b   : > { %5694 = vmatmul.msk.bf16.gmra.mxu1 %vm363_vm1, %v649_v53  ;;  %5830 = vmatmul.msk.bf16.gmra.mxu2 %vm363_vm1, %v1318_v54  ;;  %v669_v53 = vshrl.u32 %v6804_v50, 16  ;;  %v672_v54 = vshll.u32 %v6804_v50, 16 }
  0x9d   : > { %v458_v58 = vpop.f32.mrf.mxu0  ;;  %5859 = vmatmul.msk.bf16.gmra.mxu3 %vm363_vm1, %v2030_v55  ;;  %v6248_v55 = vld [vmem:[%s7630_s11 + $0x34] sm:$0xff]  ;;  %v671_v61 = vrot.slane %v669_v53, 3  ;;  %v674_v62 = vrot.slane %v672_v54, 4 }
  0x9e   : > { %v7749_v0 = vpop.f32.mrf.mxu2  ;;  %v1339_v3 = vshll.u32 %v6248_v55, 16  ;;  %v1343_v36 = vshrl.u32 %v6248_v55, 16 }
  0x9f   : > { %v675_v7 = vor.u32 %v674_v62, %v671_v61  ;;  %v7384_v61 = vld [vmem:[%s7630_s11 + $0x54] sm:$0xff]   ;;  %v6806_v62 = vld [vmem:[%s7630_s11 + $0x40] sm:$0xff]  }
  0xa0   : > { %5886 = vmatmul.msk.bf16.gmra.mxu0 %vm363_vm1, %v6802_v57  ;;  %v7752_v1 = vpop.f32.mrf.mxu3  ;;  %v7754_v2 = vpop.f32.mrf.mxu1  ;;  %v2053_v57 = vshll.u32 %v7380_v49, 16  ;;  %v2065_v49 = vor.u32 %v2064_v41, %v2061_v40 }
  0xa1   : > { %8938 = vst [vmem:[#allocation5_spill] sm:$0xff] %v7752_v1 }
  0xa2   : > { %v2055_v5 = vrot.slane %v2053_v57, 4 }
  0xa4   : > { %v2056_v10 = vor.u32 %v2055_v5, %v2052_v4  ;;  %v690_v4 = vshll.u32 %v6806_v62, 16  ;;  %v6250_v5 = vld [vmem:[%s7630_s11 + $0x44] sm:$0xff] }
  0xa5   : > { %v460_v9 = vpop.f32.mrf.mxu0 }
  0xa6   : > { %v7756_v15 = vpop.f32.mrf.mxu2  ;;  %v1341_v9 = vrot.slane %v1339_v3, 1  ;;  %v2066_v57 = vsel %vm623_vm2, %v2056_v10, %v2065_v49  ;;  %v687_v3 = vshrl.u32 %v6806_v62, 16 }
  0xa8   : > { %v7758_v16 = vpop.f32.mrf.mxu3  ;;  %v7760_v17 = vpop.f32.mrf.mxu1 }
  0xa9   : > { %8939 = vst [vmem:[#allocation6_spill] sm:$0xff] %v7758_v16 }
  0xab   : > { %5695 = vmatmul.msk.bf16.gmra.mxu1 %vm363_vm1, %v658_v18  ;;  %5831 = vmatmul.msk.bf16.gmra.mxu2 %vm363_vm1, %v1326_v19  ;;  %v676_v18 = vsel %vm623_vm2, %v666_v39, %v675_v7  ;;  %v1342_v19 = vsel %vm1298_vm3, %v1337_v8, %v1341_v9  ;;  %v1347_v39 = vshll.u32 %v6249_v26, 16  ;;  %v2068_v8 = vshrl.u32 %v7384_v61, 16 }
  0xad   : > { %v463_v23 = vpop.f32.mrf.mxu0  ;;  %5860 = vmatmul.msk.bf16.gmra.mxu3 %vm363_vm1, %v2039_v20  ;;  %v2057_v20 = vsel %vm623_vm2, %v2047_v42, %v2056_v10 }
  0xae   : > { %v7771_v28 = vpop.f32.mrf.mxu2 }
  0xb0   : > { %5887 = vmatmul.msk.bf16.gmra.mxu0 %vm363_vm1, %v6803_v22  ;;  %v7774_v29 = vpop.f32.mrf.mxu3  ;;  %v7776_v30 = vpop.f32.mrf.mxu1  ;;  %v6805_v22 = vld [vmem:[%s7630_s11 + $0x38] sm:$0xff]  }
  0xb1   : > { %8940 = vst [vmem:[#allocation7_spill] sm:$0xff] %v7774_v29  ;;  %v678_v24 = vshrl.u32 %v6805_v22, 16  ;;  %v681_v25 = vshll.u32 %v6805_v22, 16 }
  0xb3   : > { %v680_v34 = vrot.slane %v678_v24, 3  ;;  %v683_v35 = vrot.slane %v681_v25, 4  ;;  %v2070_v24 = vrot.slane %v2068_v8, 3 }
  0xb5   : > { %v7778_v38 = vpop.f32.mrf.mxu0 }
  0xb6   : > { %v7780_v43 = vpop.f32.mrf.mxu2 }
  0xb8   : > { %v7782_v44 = vpop.f32.mrf.mxu3  ;;  %v7784_v45 = vpop.f32.mrf.mxu1 }
  0xb9   : > { %8941 = vst [vmem:[#allocation8_spill] sm:$0xff] %v7782_v44 }
  0xbb   : > { %5696 = vmatmul.msk.bf16.gmra.mxu1 %vm363_vm1, %v667_v46  ;;  %5832 = vmatmul.msk.bf16.gmra.mxu2 %vm363_vm1, %v1334_v47  ;;  %v684_v46 = vor.u32 %v683_v35, %v680_v34  ;;  %v1345_v47 = vor.u32 %v1343_v36, %v1341_v9  ;;  %v2071_v9 = vshll.u32 %v7384_v61, 16 }
  0xbd   : > { %v7793_v51 = vpop.f32.mrf.mxu0  ;;  %5861 = vmatmul.msk.bf16.gmra.mxu3 %vm363_vm1, %v2048_v48  ;;  %v1349_v48 = vrot.slane %v1347_v39, 1  ;;  %v685_v56 = vsel %vm623_vm2, %v675_v7, %v684_v46  ;;  %v2073_v25 = vrot.slane %v2071_v9, 4 }
  0xbe   : > { %v7797_v58 = vpop.f32.mrf.mxu2 }
  0xbf   : > { %v1350_v55 = vsel %vm1298_vm3, %v1345_v47, %v1349_v48  ;;  %v1353_v34 = vor.u32 %v1351_v21, %v1349_v48  ;;  %v2074_v36 = vor.u32 %v2073_v25, %v2070_v24  ;;  %v6807_v48 = vld [vmem:[%s7630_s11 + $0x48] sm:$0xff]   ;;  %v1359_v21 = vshrl.u32 %v6250_v5, 16 }
  0xc0   : > { %5888 = vmatmul.msk.bf16.gmra.mxu0 %vm363_vm1, %v6804_v50  ;;  %v7800_v59 = vpop.f32.mrf.mxu3  ;;  %v7802_v60 = vpop.f32.mrf.mxu1  ;;  %v696_v61 = vshrl.u32 %v6807_v48, 16 }
  0xc1   : > { %8942 = vst [vmem:[#allocation9_spill] sm:$0xff] %v7800_v59 }
  0xc5   : > { %v7804_v6 = vpop.f32.mrf.mxu0 }
  0xc6   : > { %v7806_v11 = vpop.f32.mrf.mxu2 }
  0xc8   : > { %v7808_v12 = vpop.f32.mrf.mxu3  ;;  %v7810_v14 = vpop.f32.mrf.mxu1 }
  0xc9   : > { %8943 = vst [vmem:[#allocation10_spill] sm:$0xff] %v7808_v12 }
  0xcb   : > { %5697 = vmatmul.msk.bf16.gmra.mxu1 %vm363_vm1, %v676_v18  ;;  %5833 = vmatmul.msk.bf16.gmra.mxu2 %vm363_vm1, %v1342_v19  ;;  %v689_v19 = vrot.slane %v687_v3, 3  ;;  %v6251_v3 = vld [vmem:[%s7630_s11 + $0x4c] sm:$0xff] }
  0xcd   : > { %v7819_v23 = vpop.f32.mrf.mxu0  ;;  %5862 = vmatmul.msk.bf16.gmra.mxu3 %vm363_vm1, %v2057_v20  ;;  %v692_v20 = vrot.slane %v690_v4, 4 }
  0xce   : > { %v7823_v31 = vpop.f32.mrf.mxu2 }
  0xcf   : > { %v693_v13 = vor.u32 %v692_v20, %v689_v19  ;;  %v698_v19 = vrot.slane %v696_v61, 3 }
  0xd0   : > { %5889 = vmatmul.msk.bf16.gmra.mxu0 %vm363_vm1, %v6805_v22  ;;  %v7826_v32 = vpop.f32.mrf.mxu3  ;;  %v7828_v33 = vpop.f32.mrf.mxu1  ;;  %v1355_v22 = vshll.u32 %v6250_v5, 16 }
  0xd1   : > { %8944 = vst [vmem:[#allocation11_spill] sm:$0xff] %v7826_v32  ;;  %v694_v47 = vsel %vm623_vm2, %v684_v46, %v693_v13 }
  0xd2   : > { %v1357_v35 = vrot.slane %v1355_v22, 1  ;;  %v1363_v22 = vshll.u32 %v6251_v3, 16 }
  0xd4   : > { %v1358_v26 = vsel %vm1298_vm3, %v1353_v34, %v1357_v35 }
  0xd5   : > { %v7830_v42 = vpop.f32.mrf.mxu0 }
  0xd6   : > { %v7832_v50 = vpop.f32.mrf.mxu2 }
  0xd8   : > { %v7834_v53 = vpop.f32.mrf.mxu3  ;;  %v7836_v54 = vpop.f32.mrf.mxu1 }
  0xd9   : > { %8945 = vst [vmem:[#allocation12_spill] sm:$0xff] %v7834_v53 }
  0xdb   : > { %5698 = vmatmul.msk.bf16.gmra.mxu1 %vm363_vm1, %v685_v56  ;;  %5834 = vmatmul.msk.bf16.gmra.mxu2 %vm363_vm1, %v1350_v55  ;;  %v2075_v56 = vsel %vm623_vm2, %v2065_v49, %v2074_v36  ;;  %v7386_v55 = vld [vmem:[%s7630_s11 + $0x5c] sm:$0xff]  }
  0xdc   : > { %v2077_v4 = vshrl.u32 %v7386_v55, 16  ;;  %v2080_v8 = vshll.u32 %v7386_v55, 16 }
  0xdd   : > { %v7845_v63 = vpop.f32.mrf.mxu0  ;;  %5863 = vmatmul.msk.bf16.gmra.mxu3 %vm363_vm1, %v2066_v57 }
  0xde   : > { %v7849_v7 = vpop.f32.mrf.mxu2  ;;  %v2079_v24 = vrot.slane %v2077_v4, 3  ;;  %v2082_v25 = vrot.slane %v2080_v8, 4  ;;  %v7388_v4 = vld [vmem:[%s7630_s11 + $0x64] sm:$0xff]  }
  0xe0   : > { %5890 = vmatmul.msk.bf16.gmra.mxu0 %vm363_vm1, %v6806_v62  ;;  %v7852_v10 = vpop.f32.mrf.mxu3  ;;  %v7854_v18 = vpop.f32.mrf.mxu1  ;;  %v699_v62 = vshll.u32 %v6807_v48, 16 }
  0xe1   : > { %8946 = vst [vmem:[#allocation13_spill] sm:$0xff] %v7852_v10 }
  0xe2   : > { %v701_v20 = vrot.slane %v699_v62, 4 }
  0xe5   : > { %v7856_v27 = vpop.f32.mrf.mxu0 }
  0xe6   : > { %v7858_v39 = vpop.f32.mrf.mxu2 }
  0xe7   : > { %8947 = vst [vmem:[#allocation14_spill] sm:$0xff] %v7858_v39 }
  0xe8   : > { %v585_v40 = vpop.f32.mrf.mxu3  ;;  %v7860_v41 = vpop.f32.mrf.mxu1 }
  0xe9   : > { %v702_v40 = vor.u32 %v701_v20, %v698_v19 }
  0xeb   : > { %5699 = vmatmul.msk.bf16.gmra.mxu1 %vm363_vm1, %v694_v47  ;;  %5835 = vmatmul.msk.bf16.gmra.mxu2 %vm363_vm1, %v1358_v26  ;;  %v1361_v47 = vor.u32 %v1359_v21, %v1357_v35  ;;  %v1365_v26 = vrot.slane %v1363_v22, 1  ;;  %v703_v61 = vsel %vm623_vm2, %v693_v13, %v702_v40  ;;  %v6808_v35 = vld [vmem:[%s7630_s11 + $0x50] sm:$0xff]   ;;  %v2086_v22 = vshrl.u32 %v7388_v4, 16 }
  0xec   : > { %v705_v19 = vshrl.u32 %v6808_v35, 16  ;;  %v708_v20 = vshll.u32 %v6808_v35, 16  ;;  %v6252_v21 = vld [vmem:[%s7630_s11 + $0x54] sm:$0xff] }
  0xed   : > { %v7869_v57 = vpop.f32.mrf.mxu0  ;;  %5864 = vmatmul.msk.bf16.gmra.mxu3 %vm363_vm1, %v2075_v56  ;;  %v2083_v56 = vor.u32 %v2082_v25, %v2079_v24  ;;  %v1366_v5 = vsel %vm1298_vm3, %v1361_v47, %v1365_v26  ;;  %v2089_v24 = vshll.u32 %v7388_v4, 16  ;;  %v2088_v10 = vrot.slane %v2086_v22, 3  ;;  %v7390_v22 = vld [vmem:[%s7630_s11 + $0x6c] sm:$0xff]  }
  0xee   : > { %v7873_v46 = vpop.f32.mrf.mxu2  ;;  %v707_v47 = vrot.slane %v705_v19, 3 }
  0xef   : > { %8948 = vst [vmem:[#allocation15_spill] sm:$0xff] %v7873_v46  ;;  %v2084_v62 = vsel %vm623_vm2, %v2074_v36, %v2083_v56 }
  0xf0   : > { %5891 = vmatmul.msk.bf16.gmra.mxu0 %vm363_vm1, %v6807_v48  ;;  %v588_v49 = vpop.f32.mrf.mxu3  ;;  %v7876_v9 = vpop.f32.mrf.mxu1 }
  0xf5   : > { %v7878_v34 = vpop.f32.mrf.mxu0 }
  0xf6   : > { %v7880_v55 = vpop.f32.mrf.mxu2 }
  0xf7   : > { %8949 = vst [vmem:[#allocation16_spill] sm:$0xff] %v7880_v55 }
  0xf8   : > { %v590_v48 = vpop.f32.mrf.mxu3  ;;  %v7882_v49 = vpop.f32.mrf.mxu1 }
  0xf9   : > { %v710_v48 = vrot.slane %v708_v20, 4 }
  0xfb   : > { %5700 = vmatmul.msk.bf16.gmra.mxu1 %vm363_vm1, %v703_v61  ;;  %5836 = vmatmul.msk.bf16.gmra.mxu2 %vm363_vm1, %v1366_v5  ;;  %v1367_v61 = vshrl.u32 %v6251_v3, 16  ;;  %v1371_v5 = vshll.u32 %v6252_v21, 16  ;;  %v711_v32 = vor.u32 %v710_v48, %v707_v47  ;;  %v6253_v48 = vld [vmem:[%s7630_s11 + $0x5c] sm:$0xff] }
  0xfd   : > { %v7891_v8 = vpop.f32.mrf.mxu0  ;;  %5865 = vmatmul.msk.bf16.gmra.mxu3 %vm363_vm1, %v2084_v62  ;;  %v2091_v62 = vrot.slane %v2089_v24, 4  ;;  %v1369_v12 = vor.u32 %v1367_v61, %v1365_v26  ;;  %v1373_v4 = vrot.slane %v1371_v5, 1  ;;  %v712_v19 = vsel %vm623_vm2, %v702_v40, %v711_v32  ;;  %v6809_v24 = vld [vmem:[%s7630_s11 + $0x58] sm:$0xff]  }
  0xfe   : > { %v7895_v13 = vpop.f32.mrf.mxu2  ;;  %v717_v47 = vshll.u32 %v6809_v24, 16  ;;  %v2095_v61 = vshrl.u32 %v7390_v22, 16  ;;  %v2098_v5 = vshll.u32 %v7390_v22, 16 }
  0xff   : > { %8950 = vst [vmem:[#allocation17_spill] sm:$0xff] %v7895_v13  ;;  %v2092_v59 = vor.u32 %v2091_v62, %v2088_v10  ;;  %v1374_v20 = vsel %vm1298_vm3, %v1369_v12, %v1373_v4  ;;  %v714_v10 = vshrl.u32 %v6809_v24, 16 }
 0x100   : > { %5892 = vmatmul.msk.bf16.gmra.mxu0 %vm363_vm1, %v6808_v35  ;;  %v2340_v36 = vpop.f32.mrf.mxu3  ;;  %v7898_v25 = vpop.f32.mrf.mxu1 }
 0x101   : > { %v2093_v3 = vsel %vm623_vm2, %v2083_v56, %v2092_v59  ;;  %v716_v56 = vrot.slane %v714_v10, 3 }
 0x105   : > { %v7900_v53 = vpop.f32.mrf.mxu0 }
 0x106   : > { %v7902_v44 = vpop.f32.mrf.mxu2 }
 0x107   : > { %8951 = vst [vmem:[#allocation18_spill] sm:$0xff] %v7902_v44 }
 0x108   : > { %v2342_v35 = vpop.f32.mrf.mxu3  ;;  %v968_v36 = vpop.f32.mrf.mxu1 }
 0x109   : > { %v719_v35 = vrot.slane %v717_v47, 4  ;;  %v1375_v36 = vshrl.u32 %v6252_v21, 16  ;;  %v7392_v21 = vld [vmem:[%s7630_s11 + $0x74] sm:$0xff]  }
 0x10b   : > { %5701 = vmatmul.msk.bf16.gmra.mxu1 %vm363_vm1, %v712_v19  ;;  %5837 = vmatmul.msk.bf16.gmra.mxu2 %vm363_vm1, %v1374_v20  ;;  %v1379_v19 = vshll.u32 %v6253_v48, 16  ;;  %v2097_v20 = vrot.slane %v2095_v61, 3  ;;  %v1377_v16 = vor.u32 %v1375_v36, %v1373_v4  ;;  %v1383_v36 = vshrl.u32 %v6253_v48, 16 }
 0x10d   : > { %v2651_v26 = vpop.f32.mrf.mxu0  ;;  %5866 = vmatmul.msk.bf16.gmra.mxu3 %vm363_vm1, %v2093_v3  ;;  %v720_v3 = vor.u32 %v719_v35, %v716_v56  ;;  %v1381_v1 = vrot.slane %v1379_v19, 1 }
 0x10e   : > { %v1612_v62 = vpop.f32.mrf.mxu2  ;;  %v2100_v26 = vrot.slane %v2098_v5, 4 }
 0x10f   : > { %v1382_v10 = vsel %vm1298_vm3, %v1377_v16, %v1381_v1 }
 0x110   : > { %5893 = vmatmul.msk.bf16.gmra.mxu0 %vm363_vm1, %v6809_v24  ;;  %v2345_v12 = vpop.f32.mrf.mxu3  ;;  %v970_v40 = vpop.f32.mrf.mxu1  ;;  %v2101_v44 = vor.u32 %v2100_v26, %v2097_v20  ;;  %v721_v24 = vsel %vm623_vm2, %v711_v32, %v720_v3 }
 0x111   : > { %v6254_v12 = vld [vmem:[%s7630_s11 + $0x64] sm:$0xff]  ;;  %v2104_v40 = vshrl.u32 %v7392_v21, 16 }
 0x112   : > { %v2102_v47 = vsel %vm623_vm2, %v2092_v59, %v2101_v44  ;;  %v1387_v19 = vshll.u32 %v6254_v12, 16 }
 0x113   : > { %v2106_v20 = vrot.slane %v2104_v40, 3 }
 0x115   : > { %v2653_v29 = vpop.f32.mrf.mxu0 }
 0x116   : > { %v1614_v22 = vpop.f32.mrf.mxu2  ;;  %v6810_v29 = vld [vmem:[%s7630_s11 + $0x60] sm:$0xff]  }
 0x117   : > { %v723_v4 = vshrl.u32 %v6810_v29, 16  ;;  %v726_v5 = vshll.u32 %v6810_v29, 16 }
 0x118   : > { %v2347_v62 = vpop.f32.mrf.mxu3  ;;  %v973_v13 = vpop.f32.mrf.mxu1 }
 0x119   : > { %v2107_v13 = vshll.u32 %v7392_v21, 16  ;;  %v725_v59 = vrot.slane %v723_v4, 3  ;;  %v728_v35 = vrot.slane %v726_v5, 4 }
 0x11b   : > { %5702 = vmatmul.msk.bf16.gmra.mxu1 %vm363_vm1, %v721_v24  ;;  %5838 = vmatmul.msk.bf16.gmra.mxu2 %vm363_vm1, %v1382_v10  ;;  %v2109_v26 = vrot.slane %v2107_v13, 4  ;;  %v729_v24 = vor.u32 %v728_v35, %v725_v59  ;;  %v1385_v10 = vor.u32 %v1383_v36, %v1381_v1  ;;  %v7394_v13 = vld [vmem:[%s7630_s11 + $0x7c] sm:$0xff]   ;;  %v6811_v1 = vld [vmem:[%s7630_s11 + $0x68] sm:$0xff]  }
 0x11c   : > { %v732_v59 = vshrl.u32 %v6811_v1, 16  ;;  %v735_v35 = vshll.u32 %v6811_v1, 16  ;;  %v6255_v36 = vld [vmem:[%s7630_s11 + $0x6c] sm:$0xff] }
 0x11d   : > { %v2656_v61 = vpop.f32.mrf.mxu0  ;;  %5867 = vmatmul.msk.bf16.gmra.mxu3 %vm363_vm1, %v2102_v47  ;;  %v1389_v47 = vrot.slane %v1387_v19, 1  ;;  %v2110_v21 = vor.u32 %v2109_v26, %v2106_v20  ;;  %v730_v4 = vsel %vm623_vm2, %v720_v3, %v729_v24  ;;  %v2113_v19 = vshrl.u32 %v7394_v13, 16 }
 0x11e   : > { %v1617_v56 = vpop.f32.mrf.mxu2 }
 0x11f   : > { %v1390_v48 = vsel %vm1298_vm3, %v1385_v10, %v1389_v47  ;;  %v2111_v40 = vsel %vm623_vm2, %v2101_v44, %v2110_v21  ;;  %v734_v10 = vrot.slane %v732_v59, 3 }
 0x120   : > { %5894 = vmatmul.msk.bf16.gmra.mxu0 %vm363_vm1, %v6810_v29  ;;  %v2350_v16 = vpop.f32.mrf.mxu3  ;;  %v975_v32 = vpop.f32.mrf.mxu1 }
 0x121   : > { %v976_v61 = vadd.f32 %v975_v32, %v7778_v38 }
 0x125   : > { %v2658_v22 = vpop.f32.mrf.mxu0 }
 0x126   : > { %v1619_v56 = vpop.f32.mrf.mxu2 }
 0x127   : > { %v1750_v55 = vadd.f32 %v1619_v56, %v976_v61  ;;  %v737_v61 = vrot.slane %v735_v35, 4  ;;  %v1395_v56 = vshll.u32 %v6255_v36, 16 }
 0x128   : > { %v2352_v29 = vpop.f32.mrf.mxu3  ;;  %v978_v46 = vpop.f32.mrf.mxu1 }
 0x129   : > { %v2478_v5 = vadd.f32 %v2347_v62, %v1750_v55  ;;  %v979_v3 = vadd.f32 %v978_v46, %v7793_v51  ;;  %v2116_v55 = vshll.u32 %v7394_v13, 16  ;;  %v738_v51 = vor.u32 %v737_v61, %v734_v10  ;;  %v6256_v61 = vld [vmem:[%s7630_s11 + $0x74] sm:$0xff] }
 0x12a   : > { %v1397_v13 = vrot.slane %v1395_v56, 1 }
 0x12b   : > { %5703 = vmatmul.msk.bf16.gmra.mxu1 %vm363_vm1, %v730_v4  ;;  %5839 = vmatmul.msk.bf16.gmra.mxu2 %vm363_vm1, %v1390_v48  ;;  %v7932_v38 = vadd.f32 %v2658_v22, %v2478_v5  ;;  %v1391_v22 = vshrl.u32 %v6254_v12, 16  ;;  %v2115_v48 = vrot.slane %v2113_v19, 3  ;;  %v2118_v5 = vrot.slane %v2116_v55, 4  ;;  %v7396_v55 = vld [vmem:[%s7630_s11 + $0x84] sm:$0xff]  }
 0x12d   : > { %8952 = vst [vmem:[#allocation19_spill] sm:$0xff] %v7932_v38  ;;  %v2661_v32 = vpop.f32.mrf.mxu0  ;;  %5868 = vmatmul.msk.bf16.gmra.mxu3 %vm363_vm1, %v2111_v40  ;;  %v1393_v46 = vor.u32 %v1391_v22, %v1389_v47  ;;  %v6812_v47 = vld [vmem:[%s7630_s11 + $0x70] sm:$0xff]   ;;  %v2122_v22 = vshrl.u32 %v7396_v55, 16 }
 0x12e   : > { %v1622_v62 = vpop.f32.mrf.mxu2  ;;  %v744_v10 = vshll.u32 %v6812_v47, 16 }
 0x12f   : > { %v1751_v44 = vadd.f32 %v1622_v62, %v979_v3  ;;  %v2119_v3 = vor.u32 %v2118_v5, %v2115_v48  ;;  %v1398_v35 = vsel %vm1298_vm3, %v1393_v46, %v1397_v13  ;;  %v1403_v46 = vshll.u32 %v6256_v61, 16 }
 0x130   : > { %5895 = vmatmul.msk.bf16.gmra.mxu0 %vm363_vm1, %v6811_v1  ;;  %v2355_v20 = vpop.f32.mrf.mxu3  ;;  %v980_v26 = vpop.f32.mrf.mxu1  ;;  %v746_v5 = vrot.slane %v744_v10, 4 }
 0x131   : > { %v2479_v4 = vadd.f32 %v2350_v16, %v1751_v44  ;;  %v981_v1 = vadd.f32 %v980_v26, %v7804_v6  ;;  %v739_v16 = vsel %vm623_vm2, %v729_v24, %v738_v51  ;;  %v741_v26 = vshrl.u32 %v6812_v47, 16 }
 0x133   : > { %v7938_v40 = vadd.f32 %v2661_v32, %v2479_v4  ;;  %v2120_v32 = vsel %vm623_vm2, %v2110_v21, %v2119_v3  ;;  %v743_v48 = vrot.slane %v741_v26, 3 }
 0x135   : > { %v2663_v38 = vpop.f32.mrf.mxu0 }
 0x136   : > { %v1624_v62 = vpop.f32.mrf.mxu2 }
 0x137   : > { %v1752_v39 = vadd.f32 %v1624_v62, %v981_v1  ;;  %v2124_v62 = vrot.slane %v2122_v22, 3 }
 0x138   : > { %v2357_v59 = vpop.f32.mrf.mxu3  ;;  %v983_v12 = vpop.f32.mrf.mxu1 }
 0x139   : > { %v2480_v19 = vadd.f32 %v2352_v29, %v1752_v39  ;;  %v984_v24 = vadd.f32 %v983_v12, %v7819_v23  ;;  %v2125_v39 = vshll.u32 %v7396_v55, 16  ;;  %v747_v23 = vor.u32 %v746_v5, %v743_v48  ;;  %v6257_v5 = vld [vmem:[%s7630_s11 + $0x7c] sm:$0xff] }
 0x13b   : > { %5704 = vmatmul.msk.bf16.gmra.mxu1 %vm363_vm1, %v739_v16  ;;  %5840 = vmatmul.msk.bf16.gmra.mxu2 %vm363_vm1, %v1398_v35  ;;  %v7948_v6 = vadd.f32 %v2663_v38, %v2480_v19  ;;  %v1399_v38 = vshrl.u32 %v6255_v36, 16  ;;  %v2127_v16 = vrot.slane %v2125_v39, 4  ;;  %v7398_v39 = vld [vmem:[%s7630_s11 + $0x8c] sm:$0xff]  }
 0x13d   : > { %v2666_v44 = vpop.f32.mrf.mxu0  ;;  %5869 = vmatmul.msk.bf16.gmra.mxu3 %vm363_vm1, %v2120_v32  ;;  %v1401_v12 = vor.u32 %v1399_v38, %v1397_v13  ;;  %v1405_v32 = vrot.slane %v1403_v46, 1  ;;  %v6813_v13 = vld [vmem:[%s7630_s11 + $0x78] sm:$0xff]   ;;  %v2131_v38 = vshrl.u32 %v7398_v39, 16 }
 0x13e   : > { %v1627_v29 = vpop.f32.mrf.mxu2  ;;  %v753_v48 = vshll.u32 %v6813_v13, 16 }
 0x13f   : > { %v1753_v21 = vadd.f32 %v1627_v29, %v984_v24  ;;  %v1406_v10 = vsel %vm1298_vm3, %v1401_v12, %v1405_v32 }
 0x140   : > { %5896 = vmatmul.msk.bf16.gmra.mxu0 %vm363_vm1, %v6812_v47  ;;  %v2360_v56 = vpop.f32.mrf.mxu3  ;;  %v985_v4 = vpop.f32.mrf.mxu1  ;;  %v2128_v47 = vor.u32 %v2127_v16, %v2124_v62  ;;  %v755_v12 = vrot.slane %v753_v48, 4 }
 0x141   : > { %v2481_v1 = vadd.f32 %v2355_v20, %v1753_v21  ;;  %v986_v55 = vadd.f32 %v985_v4, %v7830_v42  ;;  %v748_v20 = vsel %vm623_vm2, %v738_v51, %v747_v23  ;;  %v750_v4 = vshrl.u32 %v6813_v13, 16 }
 0x143   : > { %v7954_v35 = vadd.f32 %v2666_v44, %v2481_v1  ;;  %v2129_v44 = vsel %vm623_vm2, %v2119_v3, %v2128_v47  ;;  %v752_v16 = vrot.slane %v750_v4, 3 }
 0x145   : > { %v2668_v19 = vpop.f32.mrf.mxu0 }
 0x146   : > { %v1629_v24 = vpop.f32.mrf.mxu2 }
 0x147   : > { %v1754_v29 = vadd.f32 %v1629_v24, %v986_v55  ;;  %v1411_v55 = vshll.u32 %v6257_v5, 16 }
 0x148   : > { %v2362_v26 = vpop.f32.mrf.mxu3  ;;  %v988_v36 = vpop.f32.mrf.mxu1 }
 0x149   : > { %v2482_v22 = vadd.f32 %v2357_v59, %v1754_v29  ;;  %v989_v51 = vadd.f32 %v988_v36, %v7845_v63  ;;  %v2134_v59 = vshll.u32 %v7398_v39, 16  ;;  %v2133_v29 = vrot.slane %v2131_v38, 3 }
 0x14a   : > { %v756_v63 = vor.u32 %v755_v12, %v752_v16  ;;  %v6258_v12 = vld [vmem:[%s7630_s11 + $0x84] sm:$0xff] }
 0x14b   : > { %5705 = vmatmul.msk.bf16.gmra.mxu1 %vm363_vm1, %v748_v20  ;;  %5841 = vmatmul.msk.bf16.gmra.mxu2 %vm363_vm1, %v1406_v10  ;;  %v7964_v42 = vadd.f32 %v2668_v19, %v2482_v22  ;;  %v1407_v19 = vshrl.u32 %v6256_v61, 16  ;;  %v2136_v20 = vrot.slane %v2134_v59, 4  ;;  %v7400_v59 = vld [vmem:[%s7630_s11 + $0x94] sm:$0xff]  }
 0x14d   : > { %v2671_v21 = vpop.f32.mrf.mxu0  ;;  %5870 = vmatmul.msk.bf16.gmra.mxu3 %vm363_vm1, %v2129_v44  ;;  %v1409_v36 = vor.u32 %v1407_v19, %v1405_v32  ;;  %v1413_v44 = vrot.slane %v1411_v55, 1  ;;  %v6814_v32 = vld [vmem:[%s7630_s11 + $0x80] sm:$0xff]   ;;  %v2140_v19 = vshrl.u32 %v7400_v59, 16 }
 0x14e   : > { %v1632_v46 = vpop.f32.mrf.mxu2  ;;  %v762_v16 = vshll.u32 %v6814_v32, 16 }
 0x14f   : > { %v1755_v3 = vadd.f32 %v1632_v46, %v989_v51  ;;  %v1414_v48 = vsel %vm1298_vm3, %v1409_v36, %v1413_v44 }
 0x150   : > { %5897 = vmatmul.msk.bf16.gmra.mxu0 %vm363_vm1, %v6813_v13  ;;  %v2365_v1 = vpop.f32.mrf.mxu3  ;;  %v990_v62 = vpop.f32.mrf.mxu1  ;;  %v2137_v13 = vor.u32 %v2136_v20, %v2133_v29  ;;  %v764_v36 = vrot.slane %v762_v16, 4 }
 0x151   : > { %v2483_v24 = vadd.f32 %v2360_v56, %v1755_v3  ;;  %v991_v39 = vadd.f32 %v990_v62, %v7856_v27  ;;  %v757_v56 = vsel %vm623_vm2, %v747_v23, %v756_v63  ;;  %v759_v62 = vshrl.u32 %v6814_v32, 16 }
 0x153   : > { %v7970_v10 = vadd.f32 %v2671_v21, %v2483_v24  ;;  %v2138_v21 = vsel %vm623_vm2, %v2128_v47, %v2137_v13  ;;  %v761_v20 = vrot.slane %v759_v62, 3 }
 0x155   : > { %v2673_v22 = vpop.f32.mrf.mxu0 }
 0x156   : > { %v1634_v51 = vpop.f32.mrf.mxu2 }
 0x157   : > { %v1756_v46 = vadd.f32 %v1634_v51, %v991_v39  ;;  %v1419_v39 = vshll.u32 %v6258_v12, 16 }
 0x158   : > { %v2367_v4 = vpop.f32.mrf.mxu3  ;;  %v993_v61 = vpop.f32.mrf.mxu1 }
 0x159   : > { %v2484_v38 = vadd.f32 %v2362_v26, %v1756_v46  ;;  %v994_v23 = vadd.f32 %v993_v61, %v7869_v57  ;;  %v2143_v26 = vshll.u32 %v7400_v59, 16  ;;  %v2142_v46 = vrot.slane %v2140_v19, 3 }
 0x15a   : > { %v765_v57 = vor.u32 %v764_v36, %v761_v20  ;;  %v6259_v36 = vld [vmem:[%s7630_s11 + $0x8c] sm:$0xff] }
 0x15b   : > { %5706 = vmatmul.msk.bf16.gmra.mxu1 %vm363_vm1, %v757_v56  ;;  %5842 = vmatmul.msk.bf16.gmra.mxu2 %vm363_vm1, %v1414_v48  ;;  %v7980_v27 = vadd.f32 %v2673_v22, %v2484_v38  ;;  %v1415_v22 = vshrl.u32 %v6257_v5, 16  ;;  %v2145_v56 = vrot.slane %v2143_v26, 4  ;;  %v7402_v26 = vld [vmem:[%s7630_s11 + $0x9c] sm:$0xff]  }
 0x15d   : > { %v2676_v3 = vpop.f32.mrf.mxu0  ;;  %5871 = vmatmul.msk.bf16.gmra.mxu3 %vm363_vm1, %v2138_v21  ;;  %v1417_v61 = vor.u32 %v1415_v22, %v1413_v44  ;;  %v1421_v21 = vrot.slane %v1419_v39, 1  ;;  %v6815_v44 = vld [vmem:[%s7630_s11 + $0x88] sm:$0xff]   ;;  %v2149_v22 = vshrl.u32 %v7402_v26, 16 }
 0x15e   : > { %v1637_v55 = vpop.f32.mrf.mxu2  ;;  %v771_v20 = vshll.u32 %v6815_v44, 16 }
 0x15f   : > { %v1757_v47 = vadd.f32 %v1637_v55, %v994_v23  ;;  %v1422_v16 = vsel %vm1298_vm3, %v1417_v61, %v1421_v21 }
 0x160   : > { %5898 = vmatmul.msk.bf16.gmra.mxu0 %vm363_vm1, %v6814_v32  ;;  %v2370_v24 = vpop.f32.mrf.mxu3  ;;  %v995_v29 = vpop.f32.mrf.mxu1  ;;  %v2146_v32 = vor.u32 %v2145_v56, %v2142_v46  ;;  %v773_v61 = vrot.slane %v771_v20, 4 }
 0x161   : > { %v2485_v51 = vadd.f32 %v2365_v1, %v1757_v47  ;;  %v996_v59 = vadd.f32 %v995_v29, %v7878_v34  ;;  %v766_v1 = vsel %vm623_vm2, %v756_v63, %v765_v57  ;;  %v768_v29 = vshrl.u32 %v6815_v44, 16 }
 0x163   : > { %v7986_v48 = vadd.f32 %v2676_v3, %v2485_v51  ;;  %v2147_v3 = vsel %vm623_vm2, %v2137_v13, %v2146_v32  ;;  %v770_v56 = vrot.slane %v768_v29, 3 }
 0x165   : > { %v2678_v38 = vpop.f32.mrf.mxu0 }
 0x166   : > { %v1639_v23 = vpop.f32.mrf.mxu2 }
 0x167   : > { %v1758_v55 = vadd.f32 %v1639_v23, %v996_v59  ;;  %v1427_v59 = vshll.u32 %v6259_v36, 16 }
 0x168   : > { %v2372_v62 = vpop.f32.mrf.mxu3  ;;  %v998_v5 = vpop.f32.mrf.mxu1 }
 0x169   : > { %v2486_v19 = vadd.f32 %v2367_v4, %v1758_v55  ;;  %v999_v63 = vadd.f32 %v998_v5, %v7891_v8  ;;  %v2152_v4 = vshll.u32 %v7402_v26, 16  ;;  %v2151_v55 = vrot.slane %v2149_v22, 3 }
 0x16a   : > { %v774_v8 = vor.u32 %v773_v61, %v770_v56  ;;  %v6260_v61 = vld [vmem:[%s7630_s11 + $0x94] sm:$0xff] }
 0x16b   : > { %5707 = vmatmul.msk.bf16.gmra.mxu1 %vm363_vm1, %v766_v1  ;;  %5843 = vmatmul.msk.bf16.gmra.mxu2 %vm363_vm1, %v1422_v16  ;;  %v7996_v34 = vadd.f32 %v2678_v38, %v2486_v19  ;;  %v1423_v38 = vshrl.u32 %v6258_v12, 16  ;;  %v2154_v1 = vrot.slane %v2152_v4, 4  ;;  %v7404_v4 = vld [vmem:[%s7630_s11 + $0xa4] sm:$0xff]  }
 0x16d   : > { %v2681_v47 = vpop.f32.mrf.mxu0  ;;  %5872 = vmatmul.msk.bf16.gmra.mxu3 %vm363_vm1, %v2147_v3  ;;  %v1425_v5 = vor.u32 %v1423_v38, %v1421_v21  ;;  %v1429_v3 = vrot.slane %v1427_v59, 1  ;;  %v6816_v21 = vld [vmem:[%s7630_s11 + $0x90] sm:$0xff]   ;;  %v2158_v38 = vshrl.u32 %v7404_v4, 16 }
 0x16e   : > { %v1642_v39 = vpop.f32.mrf.mxu2  ;;  %v780_v56 = vshll.u32 %v6816_v21, 16 }
 0x16f   : > { %v1759_v13 = vadd.f32 %v1642_v39, %v999_v63  ;;  %v1430_v20 = vsel %vm1298_vm3, %v1425_v5, %v1429_v3 }
 0x170   : > { %5899 = vmatmul.msk.bf16.gmra.mxu0 %vm363_vm1, %v6815_v44  ;;  %v2375_v51 = vpop.f32.mrf.mxu3  ;;  %v1000_v46 = vpop.f32.mrf.mxu1  ;;  %v2155_v44 = vor.u32 %v2154_v1, %v2151_v55  ;;  %v782_v5 = vrot.slane %v780_v56, 4 }
 0x171   : > { %v2487_v23 = vadd.f32 %v2370_v24, %v1759_v13  ;;  %v1001_v26 = vadd.f32 %v1000_v46, %v7900_v53  ;;  %v775_v24 = vsel %vm623_vm2, %v765_v57, %v774_v8  ;;  %v777_v46 = vshrl.u32 %v6816_v21, 16 }
 0x173   : > { %v8002_v16 = vadd.f32 %v2681_v47, %v2487_v23  ;;  %v2156_v47 = vsel %vm623_vm2, %v2146_v32, %v2155_v44  ;;  %v779_v1 = vrot.slane %v777_v46, 3 }
 0x175   : > { %v2683_v19 = vpop.f32.mrf.mxu0 }
 0x176   : > { %v1644_v63 = vpop.f32.mrf.mxu2 }
 0x177   : > { %v1760_v39 = vadd.f32 %v1644_v63, %v1001_v26  ;;  %v1435_v26 = vshll.u32 %v6260_v61, 16 }
 0x178   : > { %v2377_v29 = vpop.f32.mrf.mxu3  ;;  %v1003_v12 = vpop.f32.mrf.mxu1 }
 0x179   : > { %v2488_v22 = vadd.f32 %v2372_v62, %v1760_v39  ;;  %v1004_v57 = vadd.f32 %v1003_v12, %v7738_v52  ;;  %v2161_v62 = vshll.u32 %v7404_v4, 16  ;;  %v2160_v39 = vrot.slane %v2158_v38, 3 }
 0x17a   : > { %v783_v52 = vor.u32 %v782_v5, %v779_v1  ;;  %v6261_v5 = vld [vmem:[%s7630_s11 + $0x9c] sm:$0xff] }
 0x17b   : > { %5708 = vmatmul.msk.bf16.gmra.mxu1 %vm363_vm1, %v775_v24  ;;  %5844 = vmatmul.msk.bf16.gmra.mxu2 %vm363_vm1, %v1430_v20  ;;  %v8012_v53 = vadd.f32 %v2683_v19, %v2488_v22  ;;  %v1431_v19 = vshrl.u32 %v6259_v36, 16  ;;  %v2163_v24 = vrot.slane %v2161_v62, 4  ;;  %v7406_v62 = vld [vmem:[%s7630_s11 + $0xac] sm:$0xff]  }
 0x17d   : > { %v2686_v13 = vpop.f32.mrf.mxu0  ;;  %5873 = vmatmul.msk.bf16.gmra.mxu3 %vm363_vm1, %v2156_v47  ;;  %v1433_v12 = vor.u32 %v1431_v19, %v1429_v3  ;;  %v1437_v47 = vrot.slane %v1435_v26, 1  ;;  %v6817_v3 = vld [vmem:[%s7630_s11 + $0x98] sm:$0xff]   ;;  %v2167_v19 = vshrl.u32 %v7406_v62, 16 }
 0x17e   : > { %v1647_v59 = vpop.f32.mrf.mxu2  ;;  %v789_v1 = vshll.u32 %v6817_v3, 16 }
 0x17f   : > { %v1761_v32 = vadd.f32 %v1647_v59, %v1004_v57  ;;  %v1438_v56 = vsel %vm1298_vm3, %v1433_v12, %v1437_v47 }
 0x180   : > { %5900 = vmatmul.msk.bf16.gmra.mxu0 %vm363_vm1, %v6816_v21  ;;  %v2380_v23 = vpop.f32.mrf.mxu3  ;;  %v1005_v55 = vpop.f32.mrf.mxu1  ;;  %v2164_v21 = vor.u32 %v2163_v24, %v2160_v39  ;;  %v791_v12 = vrot.slane %v789_v1, 4 }
 0x181   : > { %v2489_v63 = vadd.f32 %v2375_v51, %v1761_v32  ;;  %v1006_v4 = vadd.f32 %v1005_v55, %v7754_v2  ;;  %v784_v51 = vsel %vm623_vm2, %v774_v8, %v783_v52  ;;  %v786_v55 = vshrl.u32 %v6817_v3, 16 }
 0x183   : > { %v8018_v20 = vadd.f32 %v2686_v13, %v2489_v63  ;;  %v2165_v13 = vsel %vm623_vm2, %v2155_v44, %v2164_v21  ;;  %v788_v24 = vrot.slane %v786_v55, 3 }
 0x185   : > { %v2688_v22 = vpop.f32.mrf.mxu0 }
 0x186   : > { %v1649_v57 = vpop.f32.mrf.mxu2 }
 0x187   : > { %v1762_v59 = vadd.f32 %v1649_v57, %v1006_v4  ;;  %v1443_v4 = vshll.u32 %v6261_v5, 16 }
 0x188   : > { %v2382_v46 = vpop.f32.mrf.mxu3  ;;  %v1008_v36 = vpop.f32.mrf.mxu1 }
 0x189   : > { %v2490_v38 = vadd.f32 %v2377_v29, %v1762_v59  ;;  %v1009_v8 = vadd.f32 %v1008_v36, %v7760_v17  ;;  %v2170_v29 = vshll.u32 %v7406_v62, 16  ;;  %v2169_v59 = vrot.slane %v2167_v19, 3 }
 0x18a   : > { %v792_v17 = vor.u32 %v791_v12, %v788_v24  ;;  %v6262_v12 = vld [vmem:[%s7630_s11 + $0xa4] sm:$0xff] }
 0x18b   : > { %5709 = vmatmul.msk.bf16.gmra.mxu1 %vm363_vm1, %v784_v51  ;;  %5845 = vmatmul.msk.bf16.gmra.mxu2 %vm363_vm1, %v1438_v56  ;;  %v8028_v2 = vadd.f32 %v2688_v22, %v2490_v38  ;;  %v1439_v22 = vshrl.u32 %v6260_v61, 16  ;;  %v2172_v51 = vrot.slane %v2170_v29, 4  ;;  %v7408_v29 = vld [vmem:[%s7630_s11 + $0xb4] sm:$0xff]  }
 0x18d   : > { %v2691_v32 = vpop.f32.mrf.mxu0  ;;  %5874 = vmatmul.msk.bf16.gmra.mxu3 %vm363_vm1, %v2165_v13  ;;  %v1441_v36 = vor.u32 %v1439_v22, %v1437_v47  ;;  %v1445_v13 = vrot.slane %v1443_v4, 1  ;;  %v6818_v47 = vld [vmem:[%s7630_s11 + $0xa0] sm:$0xff]   ;;  %v2176_v22 = vshrl.u32 %v7408_v29, 16 }
 0x18e   : > { %v1652_v26 = vpop.f32.mrf.mxu2  ;;  %v798_v24 = vshll.u32 %v6818_v47, 16 }
 0x18f   : > { %v1763_v44 = vadd.f32 %v1652_v26, %v1009_v8  ;;  %v1446_v1 = vsel %vm1298_vm3, %v1441_v36, %v1445_v13 }
 0x190   : > { %5901 = vmatmul.msk.bf16.gmra.mxu0 %vm363_vm1, %v6817_v3  ;;  %v2385_v63 = vpop.f32.mrf.mxu3  ;;  %v1010_v39 = vpop.f32.mrf.mxu1  ;;  %v2173_v3 = vor.u32 %v2172_v51, %v2169_v59  ;;  %v800_v36 = vrot.slane %v798_v24, 4 }
 0x191   : > { %v2491_v57 = vadd.f32 %v2380_v23, %v1763_v44  ;;  %v1011_v62 = vadd.f32 %v1010_v39, %v7776_v30  ;;  %v793_v23 = vsel %vm623_vm2, %v783_v52, %v792_v17  ;;  %v795_v39 = vshrl.u32 %v6818_v47, 16 }
 0x193   : > { %v8034_v56 = vadd.f32 %v2691_v32, %v2491_v57  ;;  %v2174_v32 = vsel %vm623_vm2, %v2164_v21, %v2173_v3  ;;  %v797_v51 = vrot.slane %v795_v39, 3 }
 0x195   : > { %v2693_v38 = vpop.f32.mrf.mxu0 }
 0x196   : > { %v1654_v8 = vpop.f32.mrf.mxu2 }
 0x197   : > { %v1764_v26 = vadd.f32 %v1654_v8, %v1011_v62  ;;  %v1451_v62 = vshll.u32 %v6262_v12, 16 }
 0x198   : > { %v2387_v55 = vpop.f32.mrf.mxu3  ;;  %v1013_v61 = vpop.f32.mrf.mxu1 }
 0x199   : > { %v2492_v19 = vadd.f32 %v2382_v46, %v1764_v26  ;;  %v1014_v52 = vadd.f32 %v1013_v61, %v7784_v45  ;;  %v2179_v46 = vshll.u32 %v7408_v29, 16  ;;  %v2178_v26 = vrot.slane %v2176_v22, 3 }
 0x19a   : > { %v801_v45 = vor.u32 %v800_v36, %v797_v51  ;;  %v6263_v36 = vld [vmem:[%s7630_s11 + $0xac] sm:$0xff] }
 0x19b   : > { %5710 = vmatmul.msk.bf16.gmra.mxu1 %vm363_vm1, %v793_v23  ;;  %5846 = vmatmul.msk.bf16.gmra.mxu2 %vm363_vm1, %v1446_v1  ;;  %v8044_v30 = vadd.f32 %v2693_v38, %v2492_v19  ;;  %v1447_v38 = vshrl.u32 %v6261_v5, 16  ;;  %v2181_v23 = vrot.slane %v2179_v46, 4  ;;  %v7410_v46 = vld [vmem:[%s7630_s11 + $0xbc] sm:$0xff]  }
 0x19d   : > { %v2696_v44 = vpop.f32.mrf.mxu0  ;;  %5875 = vmatmul.msk.bf16.gmra.mxu3 %vm363_vm1, %v2174_v32  ;;  %v1449_v61 = vor.u32 %v1447_v38, %v1445_v13  ;;  %v1453_v32 = vrot.slane %v1451_v62, 1  ;;  %v6819_v13 = vld [vmem:[%s7630_s11 + $0xa8] sm:$0xff]   ;;  %v2185_v38 = vshrl.u32 %v7410_v46, 16 }
 0x19e   : > { %v1657_v4 = vpop.f32.mrf.mxu2  ;;  %v807_v51 = vshll.u32 %v6819_v13, 16 }
 0x19f   : > { %v1765_v21 = vadd.f32 %v1657_v4, %v1014_v52  ;;  %v1454_v24 = vsel %vm1298_vm3, %v1449_v61, %v1453_v32 }
 0x1a0   : > { %5902 = vmatmul.msk.bf16.gmra.mxu0 %vm363_vm1, %v6818_v47  ;;  %v2390_v57 = vpop.f32.mrf.mxu3  ;;  %v1015_v59 = vpop.f32.mrf.mxu1  ;;  %v2182_v47 = vor.u32 %v2181_v23, %v2178_v26  ;;  %v809_v61 = vrot.slane %v807_v51, 4 }
 0x1a1   : > { %v2493_v8 = vadd.f32 %v2385_v63, %v1765_v21  ;;  %v1016_v29 = vadd.f32 %v1015_v59, %v7802_v60  ;;  %v802_v63 = vsel %vm623_vm2, %v792_v17, %v801_v45  ;;  %v804_v59 = vshrl.u32 %v6819_v13, 16 }
 0x1a3   : > { %v8050_v1 = vadd.f32 %v2696_v44, %v2493_v8  ;;  %v2183_v44 = vsel %vm623_vm2, %v2173_v3, %v2182_v47  ;;  %v806_v23 = vrot.slane %v804_v59, 3 }
 0x1a5   : > { %v2698_v19 = vpop.f32.mrf.mxu0 }
 0x1a6   : > { %v1659_v52 = vpop.f32.mrf.mxu2 }
 0x1a7   : > { %v1766_v4 = vadd.f32 %v1659_v52, %v1016_v29  ;;  %v1459_v29 = vshll.u32 %v6263_v36, 16 }
 0x1a8   : > { %v2392_v39 = vpop.f32.mrf.mxu3  ;;  %v1018_v5 = vpop.f32.mrf.mxu1 }
 0x1a9   : > { %v2494_v22 = vadd.f32 %v2387_v55, %v1766_v4  ;;  %v1019_v17 = vadd.f32 %v1018_v5, %v7810_v14  ;;  %v2188_v55 = vshll.u32 %v7410_v46, 16  ;;  %v2187_v4 = vrot.slane %v2185_v38, 3 }
 0x1aa   : > { %v810_v14 = vor.u32 %v809_v61, %v806_v23  ;;  %v6264_v61 = vld [vmem:[%s7630_s11 + $0xb4] sm:$0xff] }
 0x1ab   : > { %5711 = vmatmul.msk.bf16.gmra.mxu1 %vm363_vm1, %v802_v63  ;;  %5847 = vmatmul.msk.bf16.gmra.mxu2 %vm363_vm1, %v1454_v24  ;;  %v8060_v60 = vadd.f32 %v2698_v19, %v2494_v22  ;;  %v1455_v19 = vshrl.u32 %v6262_v12, 16  ;;  %v2190_v63 = vrot.slane %v2188_v55, 4  ;;  %v7412_v55 = vld [vmem:[%s7630_s11 + $0xc4] sm:$0xff]  }
 0x1ad   : > { %v2701_v21 = vpop.f32.mrf.mxu0  ;;  %5876 = vmatmul.msk.bf16.gmra.mxu3 %vm363_vm1, %v2183_v44  ;;  %v1457_v5 = vor.u32 %v1455_v19, %v1453_v32  ;;  %v1461_v44 = vrot.slane %v1459_v29, 1  ;;  %v6820_v32 = vld [vmem:[%s7630_s11 + $0xb0] sm:$0xff]   ;;  %v2194_v19 = vshrl.u32 %v7412_v55, 16 }
 0x1ae   : > { %v1662_v62 = vpop.f32.mrf.mxu2  ;;  %v816_v23 = vshll.u32 %v6820_v32, 16 }
 0x1af   : > { %v1767_v3 = vadd.f32 %v1662_v62, %v1019_v17  ;;  %v1462_v51 = vsel %vm1298_vm3, %v1457_v5, %v1461_v44 }
 0x1b0   : > { %5903 = vmatmul.msk.bf16.gmra.mxu0 %vm363_vm1, %v6819_v13  ;;  %v2395_v8 = vpop.f32.mrf.mxu3  ;;  %v1020_v26 = vpop.f32.mrf.mxu1  ;;  %v2191_v13 = vor.u32 %v2190_v63, %v2187_v4  ;;  %v818_v5 = vrot.slane %v816_v23, 4 }
 0x1b1   : > { %v2495_v52 = vadd.f32 %v2390_v57, %v1767_v3  ;;  %v1021_v46 = vadd.f32 %v1020_v26, %v7828_v33  ;;  %v811_v57 = vsel %vm623_vm2, %v801_v45, %v810_v14  ;;  %v813_v26 = vshrl.u32 %v6820_v32, 16 }
 0x1b3   : > { %v8066_v24 = vadd.f32 %v2701_v21, %v2495_v52  ;;  %v2192_v21 = vsel %vm623_vm2, %v2182_v47, %v2191_v13  ;;  %v815_v63 = vrot.slane %v813_v26, 3 }
 0x1b5   : > { %v2703_v22 = vpop.f32.mrf.mxu0 }
 0x1b6   : > { %v1664_v17 = vpop.f32.mrf.mxu2 }
 0x1b7   : > { %v1768_v62 = vadd.f32 %v1664_v17, %v1021_v46  ;;  %v1467_v46 = vshll.u32 %v6264_v61, 16 }
 0x1b8   : > { %v2397_v59 = vpop.f32.mrf.mxu3  ;;  %v1023_v12 = vpop.f32.mrf.mxu1 }
 0x1b9   : > { %v2496_v38 = vadd.f32 %v2392_v39, %v1768_v62  ;;  %v1024_v45 = vadd.f32 %v1023_v12, %v7836_v54  ;;  %v2197_v39 = vshll.u32 %v7412_v55, 16  ;;  %v2196_v62 = vrot.slane %v2194_v19, 3 }
 0x1ba   : > { %v819_v54 = vor.u32 %v818_v5, %v815_v63  ;;  %v6265_v5 = vld [vmem:[%s7630_s11 + $0xbc] sm:$0xff] }
 0x1bb   : > { %5712 = vmatmul.msk.bf16.gmra.mxu1 %vm363_vm1, %v811_v57  ;;  %5848 = vmatmul.msk.bf16.gmra.mxu2 %vm363_vm1, %v1462_v51  ;;  %v8076_v33 = vadd.f32 %v2703_v22, %v2496_v38  ;;  %v1463_v22 = vshrl.u32 %v6263_v36, 16  ;;  %v2199_v57 = vrot.slane %v2197_v39, 4  ;;  %v7414_v39 = vld [vmem:[%s7630_s11 + $0xcc] sm:$0xff]  }
 0x1bd   : > { %v2706_v3 = vpop.f32.mrf.mxu0  ;;  %5877 = vmatmul.msk.bf16.gmra.mxu3 %vm363_vm1, %v2192_v21  ;;  %v1465_v12 = vor.u32 %v1463_v22, %v1461_v44  ;;  %v1469_v21 = vrot.slane %v1467_v46, 1  ;;  %v6821_v44 = vld [vmem:[%s7630_s11 + $0xb8] sm:$0xff]   ;;  %v2203_v22 = vshrl.u32 %v7414_v39, 16 }
 0x1be   : > { %v1667_v29 = vpop.f32.mrf.mxu2  ;;  %v825_v63 = vshll.u32 %v6821_v44, 16 }
 0x1bf   : > { %v1769_v47 = vadd.f32 %v1667_v29, %v1024_v45  ;;  %v1470_v23 = vsel %vm1298_vm3, %v1465_v12, %v1469_v21 }
 0x1c0   : > { %5904 = vmatmul.msk.bf16.gmra.mxu0 %vm363_vm1, %v6820_v32  ;;  %v2400_v52 = vpop.f32.mrf.mxu3  ;;  %v1025_v4 = vpop.f32.mrf.mxu1  ;;  %v2200_v32 = vor.u32 %v2199_v57, %v2196_v62  ;;  %v827_v12 = vrot.slane %v825_v63, 4 }
 0x1c1   : > { %v2497_v17 = vadd.f32 %v2395_v8, %v1769_v47  ;;  %v1026_v55 = vadd.f32 %v1025_v4, %v7854_v18  ;;  %v820_v8 = vsel %vm623_vm2, %v810_v14, %v819_v54  ;;  %v822_v4 = vshrl.u32 %v6821_v44, 16 }
 0x1c3   : > { %v8082_v51 = vadd.f32 %v2706_v3, %v2497_v17  ;;  %v2201_v3 = vsel %vm623_vm2, %v2191_v13, %v2200_v32  ;;  %v824_v57 = vrot.slane %v822_v4, 3 }
 0x1c5   : > { %v2708_v38 = vpop.f32.mrf.mxu0 }
 0x1c6   : > { %v1669_v45 = vpop.f32.mrf.mxu2 }
 0x1c7   : > { %v1770_v29 = vadd.f32 %v1669_v45, %v1026_v55  ;;  %v1475_v55 = vshll.u32 %v6265_v5, 16 }
 0x1c8   : > { %v2402_v26 = vpop.f32.mrf.mxu3  ;;  %v1028_v36 = vpop.f32.mrf.mxu1 }
 0x1c9   : > { %v2498_v19 = vadd.f32 %v2397_v59, %v1770_v29  ;;  %v1029_v14 = vadd.f32 %v1028_v36, %v7860_v41  ;;  %v2206_v59 = vshll.u32 %v7414_v39, 16  ;;  %v2205_v29 = vrot.slane %v2203_v22, 3 }
 0x1ca   : > { %v828_v41 = vor.u32 %v827_v12, %v824_v57  ;;  %v6266_v12 = vld [vmem:[%s7630_s11 + $0xc4] sm:$0xff] }
 0x1cb   : > { %5713 = vmatmul.msk.bf16.gmra.mxu1 %vm363_vm1, %v820_v8  ;;  %5849 = vmatmul.msk.bf16.gmra.mxu2 %vm363_vm1, %v1470_v23  ;;  %v8092_v18 = vadd.f32 %v2708_v38, %v2498_v19  ;;  %v1471_v38 = vshrl.u32 %v6264_v61, 16  ;;  %v2208_v8 = vrot.slane %v2206_v59, 4  ;;  %v7416_v59 = vld [vmem:[%s7630_s11 + $0xd4] sm:$0xff]  }
 0x1cd   : > { %v2711_v47 = vpop.f32.mrf.mxu0  ;;  %5878 = vmatmul.msk.bf16.gmra.mxu3 %vm363_vm1, %v2201_v3  ;;  %v1473_v36 = vor.u32 %v1471_v38, %v1469_v21  ;;  %v1477_v3 = vrot.slane %v1475_v55, 1  ;;  %v6822_v21 = vld [vmem:[%s7630_s11 + $0xc0] sm:$0xff]   ;;  %v2212_v38 = vshrl.u32 %v7416_v59, 16 }
 0x1ce   : > { %v1672_v46 = vpop.f32.mrf.mxu2  ;;  %v834_v57 = vshll.u32 %v6822_v21, 16 }
 0x1cf   : > { %v1771_v13 = vadd.f32 %v1672_v46, %v1029_v14  ;;  %v1478_v63 = vsel %vm1298_vm3, %v1473_v36, %v1477_v3 }
 0x1d0   : > { %5905 = vmatmul.msk.bf16.gmra.mxu0 %vm363_vm1, %v6821_v44  ;;  %v2405_v17 = vpop.f32.mrf.mxu3  ;;  %v1030_v62 = vpop.f32.mrf.mxu1  ;;  %v2209_v44 = vor.u32 %v2208_v8, %v2205_v29  ;;  %v836_v36 = vrot.slane %v834_v57, 4 }
 0x1d1   : > { %v2499_v45 = vadd.f32 %v2400_v52, %v1771_v13  ;;  %v1031_v39 = vadd.f32 %v1030_v62, %v7876_v9  ;;  %v829_v52 = vsel %vm623_vm2, %v819_v54, %v828_v41  ;;  %v831_v62 = vshrl.u32 %v6822_v21, 16 }
 0x1d3   : > { %v8098_v23 = vadd.f32 %v2711_v47, %v2499_v45  ;;  %v2210_v47 = vsel %vm623_vm2, %v2200_v32, %v2209_v44  ;;  %v833_v8 = vrot.slane %v831_v62, 3 }
 0x1d5   : > { %v2713_v19 = vpop.f32.mrf.mxu0 }
 0x1d6   : > { %v1674_v14 = vpop.f32.mrf.mxu2 }
 0x1d7   : > { %v1772_v46 = vadd.f32 %v1674_v14, %v1031_v39  ;;  %v1483_v39 = vshll.u32 %v6266_v12, 16 }
 0x1d8   : > { %v2407_v4 = vpop.f32.mrf.mxu3  ;;  %v1033_v61 = vpop.f32.mrf.mxu1 }
 0x1d9   : > { %v2500_v22 = vadd.f32 %v2402_v26, %v1772_v46  ;;  %v1034_v54 = vadd.f32 %v1033_v61, %v7882_v49  ;;  %v2215_v26 = vshll.u32 %v7416_v59, 16  ;;  %v2214_v46 = vrot.slane %v2212_v38, 3 }
 0x1da   : > { %v837_v49 = vor.u32 %v836_v36, %v833_v8  ;;  %v6267_v36 = vld [vmem:[%s7630_s11 + $0xcc] sm:$0xff] }
 0x1db   : > { %5714 = vmatmul.msk.bf16.gmra.mxu1 %vm363_vm1, %v829_v52  ;;  %5850 = vmatmul.msk.bf16.gmra.mxu2 %vm363_vm1, %v1478_v63  ;;  %v8108_v9 = vadd.f32 %v2713_v19, %v2500_v22  ;;  %v1479_v19 = vshrl.u32 %v6265_v5, 16  ;;  %v2217_v52 = vrot.slane %v2215_v26, 4  ;;  %v7418_v26 = vld [vmem:[%s7630_s11 + $0xdc] sm:$0xff]  }
 0x1dd   : > { %v2716_v13 = vpop.f32.mrf.mxu0  ;;  %5879 = vmatmul.msk.bf16.gmra.mxu3 %vm363_vm1, %v2210_v47  ;;  %v1481_v61 = vor.u32 %v1479_v19, %v1477_v3  ;;  %v1485_v47 = vrot.slane %v1483_v39, 1  ;;  %v6823_v3 = vld [vmem:[%s7630_s11 + $0xc8] sm:$0xff]   ;;  %v2221_v19 = vshrl.u32 %v7418_v26, 16 }
 0x1de   : > { %v1677_v55 = vpop.f32.mrf.mxu2  ;;  %v843_v8 = vshll.u32 %v6823_v3, 16 }
 0x1df   : > { %v1773_v32 = vadd.f32 %v1677_v55, %v1034_v54  ;;  %v1486_v57 = vsel %vm1298_vm3, %v1481_v61, %v1485_v47 }
 0x1e0   : > { %5906 = vmatmul.msk.bf16.gmra.mxu0 %vm363_vm1, %v6822_v21  ;;  %v2410_v45 = vpop.f32.mrf.mxu3  ;;  %v1035_v29 = vpop.f32.mrf.mxu1  ;;  %v2218_v21 = vor.u32 %v2217_v52, %v2214_v46  ;;  %v845_v61 = vrot.slane %v843_v8, 4 }
 0x1e1   : > { %v2501_v14 = vadd.f32 %v2405_v17, %v1773_v32  ;;  %v1036_v59 = vadd.f32 %v1035_v29, %v7898_v25  ;;  %v838_v17 = vsel %vm623_vm2, %v828_v41, %v837_v49  ;;  %v840_v29 = vshrl.u32 %v6823_v3, 16 }
 0x1e3   : > { %v8114_v63 = vadd.f32 %v2716_v13, %v2501_v14  ;;  %v2219_v13 = vsel %vm623_vm2, %v2209_v44, %v2218_v21  ;;  %v842_v52 = vrot.slane %v840_v29, 3 }
 0x1e5   : > { %v2718_v22 = vpop.f32.mrf.mxu0 }
 0x1e6   : > { %v1679_v54 = vpop.f32.mrf.mxu2 }
 0x1e7   : > { %v1774_v55 = vadd.f32 %v1679_v54, %v1036_v59  ;;  %v1491_v59 = vshll.u32 %v6267_v36, 16 }
 0x1e8   : > { %v2412_v62 = vpop.f32.mrf.mxu3  ;;  %v1038_v5 = vpop.f32.mrf.mxu1 }
 0x1e9   : > { %v2502_v38 = vadd.f32 %v2407_v4, %v1774_v55  ;;  %v1039_v41 = vadd.f32 %v1038_v5, %v7749_v0  ;;  %v2224_v4 = vshll.u32 %v7418_v26, 16  ;;  %v2223_v55 = vrot.slane %v2221_v19, 3 }
 0x1ea   : > { %v846_v0 = vor.u32 %v845_v61, %v842_v52  ;;  %v8144_v61 = vld [vmem:[%s7630_s11 + $0xd4] sm:$0xff] }
 0x1eb   : > { %5715 = vmatmul.msk.bf16.gmra.mxu1 %vm363_vm1, %v838_v17  ;;  %5851 = vmatmul.msk.bf16.gmra.mxu2 %vm363_vm1, %v1486_v57  ;;  %v8124_v25 = vadd.f32 %v2718_v22, %v2502_v38  ;;  %v1487_v22 = vshrl.u32 %v6266_v12, 16  ;;  %v2226_v17 = vrot.slane %v2224_v4, 4  ;;  %v7419_v4 = vld [vmem:[%s7630_s11 + $0xe4] sm:$0xff]  }
 0x1ed   : > { %v2721_v32 = vpop.f32.mrf.mxu0  ;;  %5880 = vmatmul.msk.bf16.gmra.mxu3 %vm363_vm1, %v2219_v13  ;;  %v1489_v5 = vor.u32 %v1487_v22, %v1485_v47  ;;  %v1493_v13 = vrot.slane %v1491_v59, 1  ;;  %v6824_v47 = vld [vmem:[%s7630_s11 + $0xd0] sm:$0xff]  }
 0x1ee   : > { %v1682_v39 = vpop.f32.mrf.mxu2  ;;  %v852_v52 = vshll.u32 %v6824_v47, 16 }
 0x1ef   : > { %v1775_v44 = vadd.f32 %v1682_v39, %v1039_v41  ;;  %v1494_v8 = vsel %vm1298_vm3, %v1489_v5, %v1493_v13  ;;  %v1495_v5 = vshrl.u32 %v6267_v36, 16 }
 0x1f0   : > { %5907 = vmatmul.msk.bf16.gmra.mxu0 %vm363_vm1, %v6823_v3  ;;  %v2415_v14 = vpop.f32.mrf.mxu3  ;;  %v1040_v46 = vpop.f32.mrf.mxu1  ;;  %v2227_v3 = vor.u32 %v2226_v17, %v2223_v55 }
 0x1f1   : > { %v2503_v54 = vadd.f32 %v2410_v45, %v1775_v44  ;;  %v1041_v26 = vadd.f32 %v1040_v46, %v7756_v15  ;;  %v847_v45 = vsel %vm623_vm2, %v837_v49, %v846_v0  ;;  %v849_v46 = vshrl.u32 %v6824_v47, 16 }
 0x1f3   : > { %v8130_v57 = vadd.f32 %v2721_v32, %v2503_v54  ;;  %v2228_v32 = vsel %vm623_vm2, %v2218_v21, %v2227_v3  ;;  %v2233_v21 = vshll.u32 %v7419_v4, 16  ;;  %v851_v17 = vrot.slane %v849_v46, 3 }
 0x1f5   : > { %v2723_v38 = vpop.f32.mrf.mxu0 }
 0x1f6   : > { %v1684_v41 = vpop.f32.mrf.mxu2 }
 0x1f7   : > { %v1776_v39 = vadd.f32 %v1684_v41, %v1041_v26  ;;  %v1499_v26 = vshll.u32 %v8144_v61, 16 }
 0x1f8   : > { %v2417_v29 = vpop.f32.mrf.mxu3  ;;  %v1043_v12 = vpop.f32.mrf.mxu1 }
 0x1f9   : > { %v2504_v19 = vadd.f32 %v2412_v62, %v1776_v39  ;;  %v1044_v49 = vadd.f32 %v1043_v12, %v7771_v28  ;;  %v2230_v62 = vshrl.u32 %v7419_v4, 16  ;;  %v1501_v4 = vrot.slane %v1499_v26, 1 }
 0x1fb   : > { %5716 = vmatmul.msk.bf16.gmra.mxu1 %vm363_vm1, %v847_v45  ;;  %5852 = vmatmul.msk.bf16.gmra.mxu2 %vm363_vm1, %v1494_v8  ;;  %v8140_v15 = vadd.f32 %v2723_v38, %v2504_v19  ;;  %v854_v38 = vrot.slane %v852_v52, 4  ;;  %v2232_v39 = vrot.slane %v2230_v62, 3  ;;  %v2235_v45 = vrot.slane %v2233_v21, 4  ;;  %v8150_v8 = vld [vmem:[%s7630_s11 + $0xe8] sm:$0xff]  }
 0x1fc   : > { %v6535_v46 = vunpack.c.h.b16 %v8150_v8 }
 0x1fd   : > { %v2726_v44 = vpop.f32.mrf.mxu0  ;;  %5881 = vmatmul.msk.bf16.gmra.mxu3 %vm363_vm1, %v2228_v32  ;;  %v855_v12 = vor.u32 %v854_v38, %v851_v17  ;;  %v1497_v32 = vor.u32 %v1495_v5, %v1493_v13  ;;  %v6825_v17 = vld [vmem:[%s7630_s11 + $0xd8] sm:$0xff]  }
 0x1fe   : > { %v1687_v22 = vpop.f32.mrf.mxu2  ;;  %v7467_v38 = vld [vmem:[%s7630_s11 + $0xd8] sm:$0xff]  }
 0x1ff   : > { %v1777_v59 = vadd.f32 %v1687_v22, %v1044_v49  ;;  %v2236_v49 = vor.u32 %v2235_v45, %v2232_v39  ;;  %v856_v21 = vsel %vm623_vm2, %v846_v0, %v855_v12  ;;  %v858_v5 = vshrl.u32 %v7467_v38, 16  ;;  %v8167_v0 = vld [vmem:[%s7630_s11 + $0xdc] sm:$0xff] }
 0x200   : > { %5908 = vmatmul.msk.bf16.gmra.mxu0 %vm363_vm1, %v6824_v47  ;;  %v2420_v54 = vpop.f32.mrf.mxu3  ;;  %v1045_v55 = vpop.f32.mrf.mxu1  ;;  %v861_v26 = vshll.u32 %v7467_v38, 16 }
 0x201   : > { %v2505_v41 = vadd.f32 %v2415_v14, %v1777_v59  ;;  %v1046_v47 = vadd.f32 %v1045_v55, %v7780_v43  ;;  %v2237_v13 = vsel %vm623_vm2, %v2227_v3, %v2236_v49  ;;  %v1995_v59 = vpack.c.b16 %v6535_v46, %v6535_v46 }
 0x202   : > { %v863_v46 = vrot.slane %v861_v26, 4 }
 0x203   : > { %v8152_v19 = vadd.f32 %v2726_v44, %v2505_v41  ;;  %v1502_v44 = vsel %vm1298_vm3, %v1497_v32, %v1501_v4  ;;  %v2239_v41 = vshrl.u32 %v1995_v59, 16  ;;  %v2242_v3 = vshll.u32 %v1995_v59, 16 }
 0x205   : > { %v2728_v28 = vpop.f32.mrf.mxu0 }
 0x206   : > { %v1689_v36 = vpop.f32.mrf.mxu2 }
 0x207   : > { %v1778_v52 = vadd.f32 %v1689_v36, %v1046_v47  ;;  %v860_v47 = vrot.slane %v858_v5, 3  ;;  %v1503_v36 = vshrl.u32 %v8144_v61, 16  ;;  %v622_v61 = vpack.c.b16 %v7683_v37, %v7683_v37 }
 0x208   : > { %v2422_v14 = vpop.f32.mrf.mxu3  ;;  %v1048_v62 = vpop.f32.mrf.mxu1 }
 0x209   : > { %v2506_v22 = vadd.f32 %v2417_v29, %v1778_v52  ;;  %v1049_v29 = vadd.f32 %v1048_v62, %v7797_v58  ;;  %v1507_v52 = vshll.u32 %v8167_v0, 16  ;;  %v864_v62 = vor.u32 %v863_v46, %v860_v47 }
 0x20a   : > { %v1505_v59 = vor.u32 %v1503_v36, %v1501_v4  ;;  %v867_v47 = vshrl.u32 %v622_v61, 16 }
 0x20b   : > { %5717 = vmatmul.msk.bf16.gmra.mxu1 %vm363_vm1, %v856_v21  ;;  %5853 = vmatmul.msk.bf16.gmra.mxu2 %vm363_vm1, %v1502_v44  ;;  %v8161_v43 = vadd.f32 %v2728_v28, %v2506_v22  ;;  %v2241_v44 = vrot.slane %v2239_v41, 3  ;;  %v2244_v22 = vrot.slane %v2242_v3, 4  ;;  %v1509_v38 = vrot.slane %v1507_v52, 1 }
 0x20c   : > { %v865_v41 = vsel %vm623_vm2, %v855_v12, %v864_v62  ;;  %v869_v52 = vrot.slane %v867_v47, 3 }
 0x20d   : > { %8953 = vst [vmem:[#allocation20_spill] sm:$0xff] %v8161_v43  ;;  %v2731_v55 = vpop.f32.mrf.mxu0  ;;  %5882 = vmatmul.msk.bf16.gmra.mxu3 %vm363_vm1, %v2237_v13 }
 0x20e   : > { %v1692_v39 = vpop.f32.mrf.mxu2 }
 0x20f   : > { %v1779_v45 = vadd.f32 %v1692_v39, %v1049_v29  ;;  %v2245_v29 = vor.u32 %v2244_v22, %v2241_v44  ;;  %v1157_v39 = vld [vmem:[%s7630_s11 + $0xe4] sm:$0x1]  ;;  %v1511_v22 = vshrl.u32 %v8167_v0, 16  ;;  %v6270_v0 = vld [vmem:[%s7630_s11 + $0x18] sm:$0xff] }
 0x210   : > { %5909 = vmatmul.msk.bf16.gmra.mxu0 %vm363_vm1, %v6825_v17  ;;  %v2425_v32 = vpop.f32.mrf.mxu3  ;;  %v1050_v28 = vpop.f32.mrf.mxu1  ;;  %v1269_v3 = vunpack.c.l.b16 %v1157_v39  ;;  %v6828_v39 = vld [vmem:[%s7630_s11 + $0x28] sm:$0xff]  }
 0x211   : > { %v2507_v21 = vadd.f32 %v2420_v54, %v1779_v45  ;;  %v1051_v17 = vadd.f32 %v1050_v28, %v7806_v11  ;;  %v2246_v4 = vsel %vm623_vm2, %v2236_v49, %v2245_v29  ;;  %v870_v11 = vshll.u32 %v622_v61, 16 }
 0x212   : > { %v1297_v12 = vpack.c.b16 %v1269_v3, %v1269_v3 }
 0x213   : > { %v8173_v13 = vadd.f32 %v2731_v55, %v2507_v21  ;;  %v1510_v55 = vsel %vm1298_vm3, %v1505_v59, %v1509_v38  ;;  %v872_v21 = vrot.slane %v870_v11, 4  ;;  %v3538_v59 = vld [vmem:[%s7630_s11 + $0x24] sm:$0xf] }
 0x214   : > { %v3650_v61 = vunpack.c.l.b16 %v3538_v59  ;;  %v6297_v59 = vld [vmem:[%s7630_s11 + $0x24] sm:$0xff] }
 0x215   : > { %v2733_v58 = vpop.f32.mrf.mxu0 }
 0x216   : > { %v1694_v43 = vpop.f32.mrf.mxu2 }
 0x217   : > { %v1780_v5 = vadd.f32 %v1694_v43, %v1051_v17  ;;  %v6826_v43 = vld [vmem:[%s7630_s11 + $0xe0] sm:$0xff]  }
 0x218   : > { %v2427_v26 = vpop.f32.mrf.mxu3  ;;  %v1053_v54 = vpop.f32.mrf.mxu1  ;;  %v3537_v17 = vld [vmem:[%s7630_s11 + $0x20] sm:$0x8] }
 0x219   : > { %v2508_v45 = vadd.f32 %v2422_v14, %v1780_v5  ;;  %v1054_v14 = vadd.f32 %v1053_v54, %v7823_v31  ;;  %v3649_v5 = vunpack.c.l.b16 %v3537_v17  ;;  %v873_v54 = vor.u32 %v872_v21, %v869_v52 }
 0x21a   : > { %v3038_v52 = vshll.u32 %v6270_v0, 16 }
 0x21b   : > { %5718 = vmatmul.msk.bf16.gmra.mxu1 %vm363_vm1, %v865_v41  ;;  %5854 = vmatmul.msk.bf16.gmra.mxu2 %vm363_vm1, %v1510_v55  ;;  %v8184_v28 = vadd.f32 %v2733_v58, %v2508_v45  ;;  %v1515_v58 = vshll.u32 %v1297_v12, 16  ;;  %v1513_v55 = vor.u32 %v1511_v22, %v1509_v38  ;;  %v6538_v45 = vunpack.c.l.b16 %v6828_v39  ;;  %v8203_v38 = vld [vmem:[%s7630_s11 + $0x20] sm:$0xff] }
 0x21c   : > { %v3704_v12 = vpack.c.b16 %v3650_v61, %v3649_v5 }
 0x21d   : > { %v2736_v37 = vpop.f32.mrf.mxu0  ;;  %5883 = vmatmul.msk.bf16.gmra.mxu3 %vm363_vm1, %v2246_v4  ;;  %v1517_v3 = vrot.slane %v1515_v58, 1  ;;  %v3741_v58 = vshrl.u32 %v6828_v39, 16 }
 0x21e   : > { %v1697_v46 = vpop.f32.mrf.mxu2  ;;  %v3736_v21 = vshll.u32 %v3704_v12, 16 }
 0x21f   : > { %v1781_v49 = vadd.f32 %v1697_v46, %v1054_v14  ;;  %v4267_v46 = vpack.c.b16 %v6538_v45, %v3650_v61  ;;  %v3040_v61 = vrot.slane %v3038_v52, 1 }
 0x220   : > { %5910 = vmatmul.msk.bf16.gmra.mxu0 %vm363_vm1, %v6826_v43  ;;  %v2430_v36 = vpop.f32.mrf.mxu3  ;;  %v1055_v44 = vpop.f32.mrf.mxu1 }
 0x221   : > { %v2509_v29 = vadd.f32 %v2425_v32, %v1781_v49  ;;  %v1056_v4 = vadd.f32 %v1055_v44, %v7832_v50  ;;  %v874_v32 = vsel %vm623_vm2, %v864_v62, %v873_v54  ;;  %v3733_v50 = vshrl.u32 %v3704_v12, 16 }
 0x222   : > { %v3744_v62 = vshll.u32 %v6828_v39, 16  ;;  %v4774_v39 = vshll.u32 %v6297_v59, 16 }
 0x223   : > { %v8194_v41 = vadd.f32 %v2736_v37, %v2509_v29  ;;  %v1518_v37 = vsel %vm1298_vm3, %v1513_v55, %v1517_v3  ;;  %v3036_v29 = vshrl.u32 %v6270_v0, 16  ;;  %v3735_v55 = vrot.slane %v3733_v50, 3  ;;  %v8954_v50 = vld [vmem:[#allocation14_spill] sm:$0xff] }
 0x224   : > { %v3738_v3 = vrot.slane %v3736_v21, 4 }
 0x225   : > { %v2738_v31 = vpop.f32.mrf.mxu0 }
 0x226   : > { %v1699_v47 = vpop.f32.mrf.mxu2 }
 0x227   : > { %v1782_v11 = vadd.f32 %v1699_v47, %v1056_v4  ;;  %v3743_v4 = vrot.slane %v3741_v58, 3  ;;  %v3746_v47 = vrot.slane %v3744_v62, 4 }
 0x228   : > { %v2432_v43 = vpop.f32.mrf.mxu3  ;;  %v1058_v14 = vpop.f32.mrf.mxu1 }
 0x229   : > { %v2510_v49 = vadd.f32 %v2427_v26, %v1782_v11  ;;  %v1059_v26 = vadd.f32 %v1058_v14, %v7849_v7  ;;  %v6298_v11 = vld [vmem:[%s7630_s11 + $0x2c] sm:$0xff]  ;;  %v3739_v14 = vor.u32 %v3738_v3, %v3735_v55 }
 0x22a   : > { %v4779_v52 = vshll.u32 %v6298_v11, 16  ;;  %v6829_v55 = vld [vmem:[%s7630_s11 + $0x30] sm:$0xff]  }
 0x22b   : > { %5719 = vmatmul.msk.bf16.gmra.mxu1 %vm363_vm1, %v874_v32  ;;  %5855 = vmatmul.msk.bf16.gmra.mxu2 %vm363_vm1, %v1518_v37  ;;  %v8205_v44 = vadd.f32 %v2738_v31, %v2510_v49  ;;  %v3043_v31 = vshll.u32 %v8203_v38, 16  ;;  %v3041_v32 = vor.u32 %v3040_v61, %v3036_v29  ;;  %v4776_v49 = vrot.slane %v4774_v39, 1 }
 0x22c   : > { %v3753_v39 = vshll.u32 %v6829_v55, 16 }
 0x22d   : > { %v2741_v22 = vpop.f32.mrf.mxu0  ;;  %6077 = vmatmul.msk.bf16.vlgmr.msra.gmra.mxu3 %vm363_vm1, %v4267_v46  ;;  %v3045_v7 = vrot.slane %v3043_v31, 1  ;;  %v4772_v46 = vshrl.u32 %v6297_v59, 16 }
 0x22e   : > { %v1702_v17 = vpop.f32.mrf.mxu2 }
 0x22f   : > { %v1783_v5 = vadd.f32 %v1702_v17, %v1059_v26  ;;  %v4777_v61 = vor.u32 %v4776_v49, %v4772_v46  ;;  %v3047_v49 = vshrl.u32 %v8203_v38, 16 }
 0x230   : > { %5911 = vmatmul.msk.bf16.gmra.mxu0 %vm363_vm1, %v8150_v8  ;;  %v2435_v54 = vpop.f32.mrf.mxu3  ;;  %v1060_v45 = vpop.f32.mrf.mxu1  ;;  %v3747_v8 = vor.u32 %v3746_v47, %v3743_v4  ;;  %v6272_v4 = vld [vmem:[%s7630_s11 + $0x28] sm:$0xff]  ;;  %v3750_v47 = vshrl.u32 %v6829_v55, 16 }
 0x231   : > { %v2511_v12 = vadd.f32 %v2430_v36, %v1783_v5  ;;  %v1061_v21 = vadd.f32 %v1060_v45, %v8954_v50  ;;  %v3046_v36 = vsel %vm1298_vm3, %v3041_v32, %v3045_v7  ;;  %v7266_v5 = vld [vmem:[%s7630_s11 + $0x2c] sm:$0xff]  }
 0x232   : > { %v3748_v29 = vsel %vm623_vm2, %v3739_v14, %v3747_v8  ;;  %v3752_v50 = vrot.slane %v3750_v47, 3 }
 0x233   : > { %v8214_v0 = vadd.f32 %v2741_v22, %v2511_v12  ;;  %v4781_v22 = vrot.slane %v4779_v52, 1  ;;  %v8955_v12 = vld [vmem:[#allocation15_spill] sm:$0xff]  ;;  %v3051_v52 = vshll.u32 %v6272_v4, 16 }
 0x235   : > { %v2743_v37 = vpop.f32.mrf.mxu0  ;;  %v4782_v45 = vsel %vm1298_vm3, %v4777_v61, %v4781_v22 }
 0x236   : > { %v1704_v26 = vpop.f32.mrf.mxu2 }
 0x237   : > { %v1784_v58 = vadd.f32 %v1704_v26, %v1061_v21  ;;  %v3755_v21 = vrot.slane %v3753_v39, 4  ;;  %v6299_v26 = vld [vmem:[%s7630_s11 + $0x34] sm:$0xff] }
 0x238   : > { %v2437_v62 = vpop.f32.mrf.mxu3  ;;  %v1063_v17 = vpop.f32.mrf.mxu1  ;;  %v4787_v55 = vshll.u32 %v6299_v26, 16 }
 0x239   : > { %v2512_v31 = vadd.f32 %v2432_v43, %v1784_v58  ;;  %v1064_v32 = vadd.f32 %v1063_v17, %v8955_v12  ;;  %v3053_v17 = vrot.slane %v3051_v52, 1 }
 0x23b   : > { %6021 = vmatmul.msk.bf16.vlgmr.msra.gmra.mxu1 %vm363_vm1, %v3046_v36  ;;  %6049 = vmatmul.msk.bf16.vlgmr.msra.gmra.mxu2 %vm363_vm1, %v3748_v29  ;;  %v8223_v59 = vadd.f32 %v2743_v37, %v2512_v31  ;;  %v3049_v36 = vor.u32 %v3047_v49, %v3045_v7  ;;  %v4783_v31 = vshrl.u32 %v6298_v11, 16 }
 0x23d   : > { %v2746_v3 = vpop.f32.mrf.mxu0  ;;  %6078 = vmatmul.msk.bf16.gmra.mxu3 %vm363_vm1, %v7266_v5  ;;  %v3756_v5 = vor.u32 %v3755_v21, %v3752_v50  ;;  %v3054_v39 = vsel %vm1298_vm3, %v3049_v36, %v3053_v17  ;;  %v4785_v7 = vor.u32 %v4783_v31, %v4781_v22  ;;  %v6273_v50 = vld [vmem:[%s7630_s11 + $0x30] sm:$0xff]  ;;  %v8959_v22 = vld [vmem:[#allocation17_spill] sm:$0xff] }
 0x23e   : > { %v1707_v14 = vpop.f32.mrf.mxu2 }
 0x23f   : > { %v1785_v43 = vadd.f32 %v1707_v14, %v1064_v32 }
 0x240   : > { %6213 = vmatmul.msk.bf16.vlgmr.msra.gmra.mxu0 %vm363_vm1, %v4782_v45  ;;  %v2440_v46 = vpop.f32.mrf.mxu3  ;;  %v1065_v37 = vpop.f32.mrf.mxu1  ;;  %v8957_v45 = vld [vmem:[#allocation16_spill] sm:$0xff] }
 0x241   : > { %v2513_v58 = vadd.f32 %v2435_v54, %v1785_v43  ;;  %v1066_v12 = vadd.f32 %v1065_v37, %v8957_v45  ;;  %v3757_v54 = vsel %vm623_vm2, %v3747_v8, %v3756_v5  ;;  %v7268_v43 = vld [vmem:[%s7630_s11 + $0x34] sm:$0xff]   ;;  %v3055_v45 = vshrl.u32 %v6272_v4, 16 }
 0x243   : > { %v8232_v29 = vadd.f32 %v2746_v3, %v2513_v58  ;;  %v4789_v3 = vrot.slane %v4787_v55, 1  ;;  %v6830_v58 = vld [vmem:[%s7630_s11 + $0x38] sm:$0xff]  }
 0x244   : > { %v3759_v21 = vshrl.u32 %v6830_v58, 16  ;;  %v3762_v8 = vshll.u32 %v6830_v58, 16 }
 0x245   : > { %8956 = vst [vmem:[#allocation14_spill] sm:$0xff] %v8232_v29  ;;  %v2748_v61 = vpop.f32.mrf.mxu0  ;;  %v4790_v52 = vsel %vm1298_vm3, %v4785_v7, %v4789_v3  ;;  %v3057_v7 = vor.u32 %v3055_v45, %v3053_v17 }
 0x246   : > { %v1709_v32 = vpop.f32.mrf.mxu2 }
 0x247   : > { %v1786_v38 = vadd.f32 %v1709_v32, %v1066_v12  ;;  %v3761_v32 = vrot.slane %v3759_v21, 3 }
 0x248   : > { %v2442_v14 = vpop.f32.mrf.mxu3  ;;  %v1068_v47 = vpop.f32.mrf.mxu1 }
 0x249   : > { %v2514_v49 = vadd.f32 %v2437_v62, %v1786_v38  ;;  %v1069_v36 = vadd.f32 %v1068_v47, %v8959_v22  ;;  %v3764_v38 = vrot.slane %v3762_v8, 4  ;;  %v4791_v22 = vshrl.u32 %v6299_v26, 16 }
 0x24b   : > { %6022 = vmatmul.msk.bf16.gmra.mxu1 %vm363_vm1, %v3054_v39  ;;  %6050 = vmatmul.msk.bf16.gmra.mxu2 %vm363_vm1, %v3757_v54  ;;  %v8241_v11 = vadd.f32 %v2748_v61, %v2514_v49  ;;  %v3059_v61 = vshll.u32 %v6273_v50, 16  ;;  %v6300_v39 = vld [vmem:[%s7630_s11 + $0x3c] sm:$0xff]  ;;  %v3765_v47 = vor.u32 %v3764_v38, %v3761_v32  ;;  %v4793_v17 = vor.u32 %v4791_v22, %v4789_v3 }
 0x24c   : > { %v6274_v32 = vld [vmem:[%s7630_s11 + $0x38] sm:$0xff] }
 0x24d   : > { %8958 = vst [vmem:[#allocation15_spill] sm:$0xff] %v8241_v11  ;;  %v2751_v37 = vpop.f32.mrf.mxu0  ;;  %6079 = vmatmul.msk.bf16.gmra.mxu3 %vm363_vm1, %v7268_v43  ;;  %v3061_v58 = vrot.slane %v3059_v61, 1  ;;  %v4795_v11 = vshll.u32 %v6300_v39, 16  ;;  %v8963_v3 = vld [vmem:[#allocation5_spill] sm:$0xff] }
 0x24e   : > { %v1712_v31 = vpop.f32.mrf.mxu2 }
 0x24f   : > { %v1787_v62 = vadd.f32 %v1712_v31, %v1069_v36  ;;  %v3062_v8 = vsel %vm1298_vm3, %v3057_v7, %v3061_v58 }
 0x250   : > { %6214 = vmatmul.msk.bf16.gmra.mxu0 %vm363_vm1, %v4790_v52  ;;  %v2445_v55 = vpop.f32.mrf.mxu3  ;;  %v1070_v12 = vpop.f32.mrf.mxu1  ;;  %v8961_v52 = vld [vmem:[#allocation18_spill] sm:$0xff] }
 0x251   : > { %v2515_v54 = vadd.f32 %v2440_v46, %v1787_v62  ;;  %v1071_v36 = vadd.f32 %v1070_v12, %v8961_v52  ;;  %v3766_v46 = vsel %vm623_vm2, %v3756_v5, %v3765_v47  ;;  %v7270_v62 = vld [vmem:[%s7630_s11 + $0x3c] sm:$0xff]   ;;  %v3063_v52 = vshrl.u32 %v6273_v50, 16 }
 0x253   : > { %v8249_v43 = vadd.f32 %v2751_v37, %v2515_v54  ;;  %v4797_v37 = vrot.slane %v4795_v11, 1  ;;  %v6831_v54 = vld [vmem:[%s7630_s11 + $0x40] sm:$0xff]  }
 0x254   : > { %v3768_v38 = vshrl.u32 %v6831_v54, 16  ;;  %v3771_v5 = vshll.u32 %v6831_v54, 16 }
 0x255   : > { %8960 = vst [vmem:[#allocation16_spill] sm:$0xff] %v8249_v43  ;;  %v2753_v49 = vpop.f32.mrf.mxu0  ;;  %v4798_v61 = vsel %vm1298_vm3, %v4793_v17, %v4797_v37  ;;  %v3065_v17 = vor.u32 %v3063_v52, %v3061_v58 }
 0x256   : > { %v1714_v31 = vpop.f32.mrf.mxu2 }
 0x257   : > { %v1788_v4 = vadd.f32 %v1714_v31, %v1071_v36  ;;  %v3770_v31 = vrot.slane %v3768_v38, 3 }
 0x258   : > { %v2447_v29 = vpop.f32.mrf.mxu3  ;;  %v1073_v21 = vpop.f32.mrf.mxu1 }
 0x259   : > { %v2516_v45 = vadd.f32 %v2442_v14, %v1788_v4  ;;  %v1074_v11 = vadd.f32 %v1073_v21, %v8963_v3  ;;  %v3773_v4 = vrot.slane %v3771_v5, 4  ;;  %v4799_v3 = vshrl.u32 %v6300_v39, 16 }
 0x25b   : > { %6023 = vmatmul.msk.bf16.gmra.mxu1 %vm363_vm1, %v3062_v8  ;;  %6051 = vmatmul.msk.bf16.gmra.mxu2 %vm363_vm1, %v3766_v46  ;;  %v8258_v26 = vadd.f32 %v2753_v49, %v2516_v45  ;;  %v3067_v49 = vshll.u32 %v6274_v32, 16  ;;  %v6301_v8 = vld [vmem:[%s7630_s11 + $0x44] sm:$0xff]  ;;  %v3774_v21 = vor.u32 %v3773_v4, %v3770_v31  ;;  %v4801_v58 = vor.u32 %v4799_v3, %v4797_v37 }
 0x25c   : > { %v6275_v31 = vld [vmem:[%s7630_s11 + $0x40] sm:$0xff]  ;;  %v8967_v37 = vld [vmem:[#allocation7_spill] sm:$0xff] }
 0x25d   : > { %8962 = vst [vmem:[#allocation17_spill] sm:$0xff] %v8258_v26  ;;  %v2756_v12 = vpop.f32.mrf.mxu0  ;;  %6080 = vmatmul.msk.bf16.gmra.mxu3 %vm363_vm1, %v7270_v62  ;;  %v3069_v54 = vrot.slane %v3067_v49, 1  ;;  %v4803_v26 = vshll.u32 %v6301_v8, 16 }
 0x25e   : > { %v1717_v7 = vpop.f32.mrf.mxu2 }
 0x25f   : > { %v1789_v14 = vadd.f32 %v1717_v7, %v1074_v11  ;;  %v3070_v5 = vsel %vm1298_vm3, %v3065_v17, %v3069_v54 }
 0x260   : > { %6215 = vmatmul.msk.bf16.gmra.mxu0 %vm363_vm1, %v4798_v61  ;;  %v2450_v22 = vpop.f32.mrf.mxu3  ;;  %v1075_v36 = vpop.f32.mrf.mxu1  ;;  %v8965_v61 = vld [vmem:[#allocation6_spill] sm:$0xff] }
 0x261   : > { %v2517_v46 = vadd.f32 %v2445_v55, %v1789_v14  ;;  %v1076_v11 = vadd.f32 %v1075_v36, %v8965_v61  ;;  %v3775_v55 = vsel %vm623_vm2, %v3765_v47, %v3774_v21  ;;  %v7272_v14 = vld [vmem:[%s7630_s11 + $0x44] sm:$0xff]   ;;  %v3071_v61 = vshrl.u32 %v6274_v32, 16 }
 0x263   : > { %v8266_v62 = vadd.f32 %v2756_v12, %v2517_v46  ;;  %v4805_v12 = vrot.slane %v4803_v26, 1  ;;  %v6832_v46 = vld [vmem:[%s7630_s11 + $0x48] sm:$0xff]  }
 0x264   : > { %v3777_v4 = vshrl.u32 %v6832_v46, 16  ;;  %v3780_v47 = vshll.u32 %v6832_v46, 16 }
 0x265   : > { %8964 = vst [vmem:[#allocation18_spill] sm:$0xff] %v8266_v62  ;;  %v2758_v45 = vpop.f32.mrf.mxu0  ;;  %v4806_v49 = vsel %vm1298_vm3, %v4801_v58, %v4805_v12  ;;  %v3073_v58 = vor.u32 %v3071_v61, %v3069_v54 }
 0x266   : > { %v1719_v7 = vpop.f32.mrf.mxu2 }
 0x267   : > { %v1790_v50 = vadd.f32 %v1719_v7, %v1076_v11  ;;  %v3779_v7 = vrot.slane %v3777_v4, 3 }
 0x268   : > { %v2452_v43 = vpop.f32.mrf.mxu3  ;;  %v1078_v38 = vpop.f32.mrf.mxu1 }
 0x269   : > { %v2518_v52 = vadd.f32 %v2447_v29, %v1790_v50  ;;  %v1079_v26 = vadd.f32 %v1078_v38, %v8967_v37  ;;  %v3782_v50 = vrot.slane %v3780_v47, 4  ;;  %v4807_v37 = vshrl.u32 %v6301_v8, 16 }
 0x26b   : > { %6024 = vmatmul.msk.bf16.gmra.mxu1 %vm363_vm1, %v3070_v5  ;;  %6052 = vmatmul.msk.bf16.gmra.mxu2 %vm363_vm1, %v3775_v55  ;;  %v8275_v39 = vadd.f32 %v2758_v45, %v2518_v52  ;;  %v3075_v45 = vshll.u32 %v6275_v31, 16  ;;  %v6302_v5 = vld [vmem:[%s7630_s11 + $0x4c] sm:$0xff]  ;;  %v3783_v38 = vor.u32 %v3782_v50, %v3779_v7  ;;  %v4809_v54 = vor.u32 %v4807_v37, %v4805_v12  ;;  %v8971_v12 = vld [vmem:[#allocation9_spill] sm:$0xff] }
 0x26c   : > { %v6276_v7 = vld [vmem:[%s7630_s11 + $0x48] sm:$0xff] }
 0x26d   : > { %8966 = vst [vmem:[#allocation5_spill] sm:$0xff] %v8275_v39  ;;  %v2761_v36 = vpop.f32.mrf.mxu0  ;;  %6081 = vmatmul.msk.bf16.gmra.mxu3 %vm363_vm1, %v7272_v14  ;;  %v3077_v46 = vrot.slane %v3075_v45, 1  ;;  %v4811_v39 = vshll.u32 %v6302_v5, 16 }
 0x26e   : > { %v1722_v17 = vpop.f32.mrf.mxu2 }
 0x26f   : > { %v1791_v29 = vadd.f32 %v1722_v17, %v1079_v26  ;;  %v3078_v47 = vsel %vm1298_vm3, %v3073_v58, %v3077_v46 }
 0x270   : > { %6216 = vmatmul.msk.bf16.gmra.mxu0 %vm363_vm1, %v4806_v49  ;;  %v2455_v3 = vpop.f32.mrf.mxu3  ;;  %v1080_v11 = vpop.f32.mrf.mxu1  ;;  %v8969_v49 = vld [vmem:[#allocation8_spill] sm:$0xff] }
 0x271   : > { %v2519_v55 = vadd.f32 %v2450_v22, %v1791_v29  ;;  %v1081_v26 = vadd.f32 %v1080_v11, %v8969_v49  ;;  %v3784_v22 = vsel %vm623_vm2, %v3774_v21, %v3783_v38  ;;  %v7274_v29 = vld [vmem:[%s7630_s11 + $0x4c] sm:$0xff]   ;;  %v3079_v49 = vshrl.u32 %v6275_v31, 16 }
 0x273   : > { %v8283_v14 = vadd.f32 %v2761_v36, %v2519_v55  ;;  %v4813_v36 = vrot.slane %v4811_v39, 1  ;;  %v6833_v55 = vld [vmem:[%s7630_s11 + $0x50] sm:$0xff]  }
 0x274   : > { %v3786_v50 = vshrl.u32 %v6833_v55, 16  ;;  %v3789_v21 = vshll.u32 %v6833_v55, 16 }
 0x275   : > { %8968 = vst [vmem:[#allocation6_spill] sm:$0xff] %v8283_v14  ;;  %v2763_v52 = vpop.f32.mrf.mxu0  ;;  %v4814_v45 = vsel %vm1298_vm3, %v4809_v54, %v4813_v36  ;;  %v3081_v54 = vor.u32 %v3079_v49, %v3077_v46 }
 0x276   : > { %v1724_v17 = vpop.f32.mrf.mxu2 }
 0x277   : > { %v1792_v32 = vadd.f32 %v1724_v17, %v1081_v26  ;;  %v3788_v17 = vrot.slane %v3786_v50, 3 }
 0x278   : > { %v2457_v62 = vpop.f32.mrf.mxu3  ;;  %v1083_v4 = vpop.f32.mrf.mxu1 }
 0x279   : > { %v2520_v61 = vadd.f32 %v2452_v43, %v1792_v32  ;;  %v1084_v39 = vadd.f32 %v1083_v4, %v8971_v12  ;;  %v3791_v32 = vrot.slane %v3789_v21, 4  ;;  %v4815_v12 = vshrl.u32 %v6302_v5, 16 }
 0x27b   : > { %6025 = vmatmul.msk.bf16.gmra.mxu1 %vm363_vm1, %v3078_v47  ;;  %6053 = vmatmul.msk.bf16.gmra.mxu2 %vm363_vm1, %v3784_v22  ;;  %v8292_v8 = vadd.f32 %v2763_v52, %v2520_v61  ;;  %v3083_v52 = vshll.u32 %v6276_v7, 16  ;;  %v6303_v47 = vld [vmem:[%s7630_s11 + $0x54] sm:$0xff]  ;;  %v3792_v4 = vor.u32 %v3791_v32, %v3788_v17  ;;  %v4817_v46 = vor.u32 %v4815_v12, %v4813_v36  ;;  %v8975_v36 = vld [vmem:[#allocation11_spill] sm:$0xff] }
 0x27c   : > { %v6277_v17 = vld [vmem:[%s7630_s11 + $0x50] sm:$0xff] }
 0x27d   : > { %8970 = vst [vmem:[#allocation7_spill] sm:$0xff] %v8292_v8  ;;  %v2766_v11 = vpop.f32.mrf.mxu0  ;;  %6082 = vmatmul.msk.bf16.gmra.mxu3 %vm363_vm1, %v7274_v29  ;;  %v3085_v55 = vrot.slane %v3083_v52, 1  ;;  %v4819_v8 = vshll.u32 %v6303_v47, 16 }
 0x27e   : > { %v1727_v58 = vpop.f32.mrf.mxu2 }
 0x27f   : > { %v1793_v43 = vadd.f32 %v1727_v58, %v1084_v39  ;;  %v3086_v21 = vsel %vm1298_vm3, %v3081_v54, %v3085_v55 }
 0x280   : > { %6217 = vmatmul.msk.bf16.gmra.mxu0 %vm363_vm1, %v4814_v45  ;;  %v2460_v37 = vpop.f32.mrf.mxu3  ;;  %v1085_v26 = vpop.f32.mrf.mxu1  ;;  %v8973_v45 = vld [vmem:[#allocation10_spill] sm:$0xff] }
 0x281   : > { %v2521_v22 = vadd.f32 %v2455_v3, %v1793_v43  ;;  %v1086_v39 = vadd.f32 %v1085_v26, %v8973_v45  ;;  %v3793_v3 = vsel %vm623_vm2, %v3783_v38, %v3792_v4  ;;  %v7276_v43 = vld [vmem:[%s7630_s11 + $0x54] sm:$0xff]   ;;  %v3087_v45 = vshrl.u32 %v6276_v7, 16 }
 0x283   : > { %v8300_v29 = vadd.f32 %v2766_v11, %v2521_v22  ;;  %v4821_v11 = vrot.slane %v4819_v8, 1  ;;  %v6834_v22 = vld [vmem:[%s7630_s11 + $0x58] sm:$0xff]  }
 0x284   : > { %v3795_v32 = vshrl.u32 %v6834_v22, 16  ;;  %v3798_v38 = vshll.u32 %v6834_v22, 16 }
 0x285   : > { %8972 = vst [vmem:[#allocation8_spill] sm:$0xff] %v8300_v29  ;;  %v2768_v61 = vpop.f32.mrf.mxu0  ;;  %v4822_v52 = vsel %vm1298_vm3, %v4817_v46, %v4821_v11  ;;  %v3089_v46 = vor.u32 %v3087_v45, %v3085_v55 }
 0x286   : > { %v1729_v58 = vpop.f32.mrf.mxu2 }
 0x287   : > { %v1794_v31 = vadd.f32 %v1729_v58, %v1086_v39  ;;  %v3797_v58 = vrot.slane %v3795_v32, 3 }
 0x288   : > { %v2462_v14 = vpop.f32.mrf.mxu3  ;;  %v1088_v50 = vpop.f32.mrf.mxu1 }
 0x289   : > { %v2522_v49 = vadd.f32 %v2457_v62, %v1794_v31  ;;  %v1089_v8 = vadd.f32 %v1088_v50, %v8975_v36  ;;  %v3800_v31 = vrot.slane %v3798_v38, 4  ;;  %v4823_v36 = vshrl.u32 %v6303_v47, 16 }
 0x28b   : > { %6026 = vmatmul.msk.bf16.gmra.mxu1 %vm363_vm1, %v3086_v21  ;;  %6054 = vmatmul.msk.bf16.gmra.mxu2 %vm363_vm1, %v3793_v3  ;;  %v8309_v5 = vadd.f32 %v2768_v61, %v2522_v49  ;;  %v3091_v61 = vshll.u32 %v6277_v17, 16  ;;  %v6304_v21 = vld [vmem:[%s7630_s11 + $0x5c] sm:$0xff]  ;;  %v3801_v50 = vor.u32 %v3800_v31, %v3797_v58  ;;  %v4825_v55 = vor.u32 %v4823_v36, %v4821_v11 }
 0x28c   : > { %v8979_v11 = vld [vmem:[#allocation13_spill] sm:$0xff]  ;;  %v3095_v36 = vshrl.u32 %v6277_v17, 16 }
 0x28d   : > { %8974 = vst [vmem:[#allocation9_spill] sm:$0xff] %v8309_v5  ;;  %v2771_v26 = vpop.f32.mrf.mxu0  ;;  %6083 = vmatmul.msk.bf16.gmra.mxu3 %vm363_vm1, %v7276_v43  ;;  %v3093_v22 = vrot.slane %v3091_v61, 1  ;;  %v4827_v5 = vshll.u32 %v6304_v21, 16  ;;  %v6278_v61 = vld [vmem:[%s7630_s11 + $0x58] sm:$0xff] }
 0x28e   : > { %v1732_v54 = vpop.f32.mrf.mxu2 }
 0x28f   : > { %v1795_v62 = vadd.f32 %v1732_v54, %v1089_v8  ;;  %v3094_v38 = vsel %vm1298_vm3, %v3089_v46, %v3093_v22 }
 0x290   : > { %6218 = vmatmul.msk.bf16.gmra.mxu0 %vm363_vm1, %v4822_v52  ;;  %v2465_v12 = vpop.f32.mrf.mxu3  ;;  %v1090_v39 = vpop.f32.mrf.mxu1  ;;  %v8977_v52 = vld [vmem:[#allocation12_spill] sm:$0xff] }
 0x291   : > { %v2523_v3 = vadd.f32 %v2460_v37, %v1795_v62  ;;  %v1091_v8 = vadd.f32 %v1090_v39, %v8977_v52  ;;  %v3802_v37 = vsel %vm623_vm2, %v3792_v4, %v3801_v50  ;;  %v7278_v62 = vld [vmem:[%s7630_s11 + $0x5c] sm:$0xff]  }
 0x293   : > { %v8317_v43 = vadd.f32 %v2771_v26, %v2523_v3  ;;  %v4829_v26 = vrot.slane %v4827_v5, 1  ;;  %v6835_v3 = vld [vmem:[%s7630_s11 + $0x60] sm:$0xff]  }
 0x294   : > { %v3804_v58 = vshrl.u32 %v6835_v3, 16  ;;  %v3807_v4 = vshll.u32 %v6835_v3, 16  ;;  %v4831_v3 = vshrl.u32 %v6304_v21, 16 }
 0x295   : > { %8976 = vst [vmem:[#allocation10_spill] sm:$0xff] %v8317_v43  ;;  %v2773_v49 = vpop.f32.mrf.mxu0 }
 0x296   : > { %v1734_v54 = vpop.f32.mrf.mxu2 }
 0x297   : > { %v1796_v7 = vadd.f32 %v1734_v54, %v1091_v8  ;;  %v3806_v8 = vrot.slane %v3804_v58, 3  ;;  %v3809_v54 = vrot.slane %v3807_v4, 4  ;;  %v4833_v4 = vor.u32 %v4831_v3, %v4829_v26 }
 0x298   : > { %v2467_v29 = vpop.f32.mrf.mxu3  ;;  %v1093_v32 = vpop.f32.mrf.mxu1 }
 0x299   : > { %v2524_v45 = vadd.f32 %v2462_v14, %v1796_v7  ;;  %v4830_v29 = vsel %vm1298_vm3, %v4825_v55, %v4829_v26  ;;  %v1094_v5 = vadd.f32 %v1093_v32, %v8979_v11  ;;  %v6305_v7 = vld [vmem:[%s7630_s11 + $0x64] sm:$0xff]  ;;  %v3810_v32 = vor.u32 %v3809_v54, %v3806_v8 }
 0x29a   : > { %v3103_v26 = vshrl.u32 %v6278_v61, 16 }
 0x29b   : > { %6027 = vmatmul.msk.bf16.gmra.mxu1 %vm363_vm1, %v3094_v38  ;;  %6055 = vmatmul.msk.bf16.gmra.mxu2 %vm363_vm1, %v3802_v37  ;;  %v8326_v47 = vadd.f32 %v2773_v49, %v2524_v45  ;;  %v3099_v49 = vshll.u32 %v6278_v61, 16  ;;  %v3097_v37 = vor.u32 %v3095_v36, %v3093_v22  ;;  %v3811_v58 = vsel %vm623_vm2, %v3801_v50, %v3810_v32 }
 0x29d   : > { %8978 = vst [vmem:[#allocation11_spill] sm:$0xff] %v8326_v47  ;;  %v2776_v39 = vpop.f32.mrf.mxu0  ;;  %6084 = vmatmul.msk.bf16.gmra.mxu3 %vm363_vm1, %v7278_v62  ;;  %v3101_v45 = vrot.slane %v3099_v49, 1 }
 0x29e   : > { %v1737_v31 = vpop.f32.mrf.mxu2 }
 0x29f   : > { %v1797_v14 = vadd.f32 %v1737_v31, %v1094_v5  ;;  %v3102_v31 = vsel %vm1298_vm3, %v3097_v37, %v3101_v45  ;;  %v3105_v3 = vor.u32 %v3103_v26, %v3101_v45 }
 0x2a0   : > { %6219 = vmatmul.msk.bf16.gmra.mxu0 %vm363_vm1, %v4830_v29  ;;  %v2470_v46 = vpop.f32.mrf.mxu3  ;;  %v1095_v52 = vpop.f32.mrf.mxu1  ;;  %v4835_v29 = vshll.u32 %v6305_v7, 16 }
 0x2a1   : > { %v2525_v38 = vadd.f32 %v2465_v12, %v1797_v14  ;;  %v7280_v12 = vld [vmem:[%s7630_s11 + $0x64] sm:$0xff]  }
 0x2a2   : > { %v4837_v46 = vrot.slane %v4835_v29, 1  ;;  %v6836_v14 = vld [vmem:[%s7630_s11 + $0x68] sm:$0xff]  }
 0x2a3   : > { %v8334_v55 = vadd.f32 %v2776_v39, %v2525_v38  ;;  %v6279_v39 = vld [vmem:[%s7630_s11 + $0x60] sm:$0xff]  ;;  %v3813_v36 = vshrl.u32 %v6836_v14, 16  ;;  %v3816_v52 = vshll.u32 %v6836_v14, 16 }
 0x2a4   : > { %v4838_v21 = vsel %vm1298_vm3, %v4833_v4, %v4837_v46  ;;  %v3107_v54 = vshll.u32 %v6279_v39, 16 }
 0x2a5   : > { %8980 = vst [vmem:[#allocation12_spill] sm:$0xff] %v8334_v55  ;;  %v2778_v62 = vpop.f32.mrf.mxu0  ;;  %v3815_v38 = vrot.slane %v3813_v36, 3  ;;  %v3818_v37 = vrot.slane %v3816_v52, 4  ;;  %v7282_v36 = vld [vmem:[%s7630_s11 + $0x6c] sm:$0xff]  }
 0x2a6   : > { %v1739_v11 = vpop.f32.mrf.mxu2  ;;  %v6306_v62 = vld [vmem:[%s7630_s11 + $0x6c] sm:$0xff] }
 0x2a7   : > { %v3109_v11 = vrot.slane %v3107_v54, 1  ;;  %v6837_v52 = vld [vmem:[%s7630_s11 + $0x70] sm:$0xff]  }
 0x2a8   : > { %v2472_v5 = vpop.f32.mrf.mxu3  ;;  %v1098_v17 = vpop.f32.mrf.mxu1  ;;  %v3825_v26 = vshll.u32 %v6837_v52, 16 }
 0x2a9   : > { %v3819_v5 = vor.u32 %v3818_v37, %v3815_v38  ;;  %v4839_v17 = vshrl.u32 %v6305_v7, 16  ;;  %v3110_v61 = vsel %vm1298_vm3, %v3105_v3, %v3109_v11 }
 0x2aa   : > { %v3827_v3 = vrot.slane %v3825_v26, 4 }
 0x2ab   : > { %6028 = vmatmul.msk.bf16.gmra.mxu1 %vm363_vm1, %v3102_v31  ;;  %6056 = vmatmul.msk.bf16.gmra.mxu2 %vm363_vm1, %v3811_v58  ;;  %v4843_v31 = vshll.u32 %v6306_v62, 16  ;;  %v3820_v14 = vsel %vm623_vm2, %v3810_v32, %v3819_v5 }
 0x2ad   : > { %v2781_v22 = vpop.f32.mrf.mxu0  ;;  %6085 = vmatmul.msk.bf16.gmra.mxu3 %vm363_vm1, %v7280_v12 }
 0x2ae   : > { %v1742_v49 = vpop.f32.mrf.mxu2  ;;  %v4841_v22 = vor.u32 %v4839_v17, %v4837_v46  ;;  %v7533_v17 = vmov 0.0|0.0  }
 0x2af   : > { %v6280_v49 = vld [vmem:[%s7630_s11 + $0x68] sm:$0xff] }
 0x2b0   : > { %6220 = vmatmul.msk.bf16.gmra.mxu0 %vm363_vm1, %v4838_v21  ;;  %v4387_v50 = vpop.f32.mrf.mxu3  ;;  %v1100_v8 = vpop.f32.mrf.mxu1  ;;  %v4845_v21 = vrot.slane %v4843_v31, 1  ;;  %v3115_v38 = vshll.u32 %v6280_v49, 16  ;;  %v8361_v31 = vunpack.c.l.bf16 %v7533_v17 }
 0x2b1   : > { %v3822_v50 = vshrl.u32 %v6837_v52, 16  ;;  %v3111_v8 = vshrl.u32 %v6279_v39, 16  ;;  %v4847_v39 = vshrl.u32 %v6306_v62, 16 }
 0x2b2   : > { %v4846_v45 = vsel %vm1298_vm3, %v4841_v22, %v4845_v21  ;;  %8981 = vst [vmem:[#allocation13_spill] sm:$0xff] %v8361_v31 }
 0x2b3   : > { %v3824_v37 = vrot.slane %v3822_v50, 3  ;;  %v4849_v50 = vor.u32 %v4847_v39, %v4845_v21  ;;  %v3119_v21 = vshrl.u32 %v6280_v49, 16  ;;  %v8380_v39 = vld [vmem:[%s7630_s11 + $0x7c] sm:$0xff] }
 0x2b5   : > { %v2783_v29 = vpop.f32.mrf.mxu0 }
 0x2b6   : > { %v1744_v58 = vpop.f32.mrf.mxu2  ;;  %v6307_v29 = vld [vmem:[%s7630_s11 + $0x74] sm:$0xff] }
 0x2b7   : > { %v3113_v58 = vor.u32 %v3111_v8, %v3109_v11  ;;  %v4851_v22 = vshll.u32 %v6307_v29, 16 }
 0x2b8   : > { %v4389_v4 = vpop.f32.mrf.mxu3  ;;  %v3348_v12 = vpop.f32.mrf.mxu1 }
 0x2b9   : > { %v6643_v4 = vpack.c.bf16 %v8361_v31, %v8361_v31  ;;  %v4853_v26 = vrot.slane %v4851_v22, 1 }
 0x2bb   : > { %6029 = vmatmul.msk.bf16.gmra.mxu1 %vm363_vm1, %v3110_v61  ;;  %6057 = vmatmul.msk.bf16.gmra.mxu2 %vm363_vm1, %v3820_v14  ;;  %v3117_v61 = vrot.slane %v3115_v38, 1  ;;  %v3828_v14 = vor.u32 %v3827_v3, %v3824_v37  ;;  %6644 = vst [vmem:[%s8365_s4] sm:$0xff] %v6643_v4   ;;  %v4854_v8 = vsel %vm1298_vm3, %v4849_v50, %v4853_v26  ;;  %v4859_v50 = vshll.u32 %v8380_v39, 16 }
 0x2bc   : > { %7004 = vst [vmem:[%s8365_s4 + $0xd0] sm:$0xff] %v6643_v4  }
 0x2bd   : > { %v5084_v7 = vpop.f32.mrf.mxu0  ;;  %6086 = vmatmul.msk.bf16.gmra.mxu3 %vm363_vm1, %v7282_v36  ;;  %v3121_v22 = vor.u32 %v3119_v21, %v3117_v61  ;;  %v4861_v55 = vrot.slane %v4859_v50, 1 }
 0x2be   : > { %v4076_v32 = vpop.f32.mrf.mxu2  ;;  %v3118_v7 = vsel %vm1298_vm3, %v3113_v58, %v3117_v61 }
 0x2bf   : > { %v7284_v32 = vld [vmem:[%s7630_s11 + $0x74] sm:$0xff]  }
 0x2c0   : > { %6221 = vmatmul.msk.bf16.gmra.mxu0 %vm363_vm1, %v4846_v45  ;;  %v4392_v46 = vpop.f32.mrf.mxu3  ;;  %v3350_v54 = vpop.f32.mrf.mxu1  ;;  %v3829_v45 = vsel %vm623_vm2, %v3819_v5, %v3828_v14 }
 0x2c1   : > { %v6838_v46 = vld [vmem:[%s7630_s11 + $0x78] sm:$0xff]   ;;  %v6281_v54 = vld [vmem:[%s7630_s11 + $0x70] sm:$0xff] }
 0x2c2   : > { %v3831_v38 = vshrl.u32 %v6838_v46, 16  ;;  %v3834_v37 = vshll.u32 %v6838_v46, 16  ;;  %v3123_v58 = vshll.u32 %v6281_v54, 16 }
 0x2c4   : > { %v3833_v4 = vrot.slane %v3831_v38, 3 }
 0x2c5   : > { %v5086_v12 = vpop.f32.mrf.mxu0 }
 0x2c6   : > { %v4078_v36 = vpop.f32.mrf.mxu2  ;;  %v3836_v12 = vrot.slane %v3834_v37, 4 }
 0x2c8   : > { %v4394_v52 = vpop.f32.mrf.mxu3  ;;  %v3353_v11 = vpop.f32.mrf.mxu1 }
 0x2c9   : > { %v3125_v11 = vrot.slane %v3123_v58, 1  ;;  %v7286_v58 = vld [vmem:[%s7630_s11 + $0x7c] sm:$0xff]  }
 0x2cb   : > { %6030 = vmatmul.msk.bf16.gmra.mxu1 %vm363_vm1, %v3118_v7  ;;  %6058 = vmatmul.msk.bf16.gmra.mxu2 %vm363_vm1, %v3829_v45  ;;  %v3837_v7 = vor.u32 %v3836_v12, %v3833_v4  ;;  %v4855_v45 = vshrl.u32 %v6307_v29, 16  ;;  %v3126_v37 = vsel %vm1298_vm3, %v3121_v22, %v3125_v11  ;;  %v8390_v29 = vld [vmem:[%s8933_s2] ss:$0 sm:$0xff]  ;;  %v8398_v22 = vld [vmem:[%s7630_s11 + $0x78] sm:$0xff] }
 0x2cd   : > { %v5089_v62 = vpop.f32.mrf.mxu0  ;;  %6087 = vmatmul.msk.bf16.gmra.mxu3 %vm363_vm1, %v7284_v32  ;;  %v8982_v32 = vld [vmem:[#allocation19_spill] sm:$0xff]  ;;  %v3838_v61 = vsel %vm623_vm2, %v3828_v14, %v3837_v7  ;;  %v4857_v21 = vor.u32 %v4855_v45, %v4853_v26 }
 0x2ce   : > { %v4081_v3 = vpop.f32.mrf.mxu2 }
 0x2cf   : > { %v4862_v26 = vsel %vm1298_vm3, %v4857_v21, %v4861_v55 }
 0x2d0   : > { %6222 = vmatmul.msk.bf16.gmra.mxu0 %vm363_vm1, %v4854_v8  ;;  %v4397_v5 = vpop.f32.mrf.mxu3  ;;  %v3355_v17 = vpop.f32.mrf.mxu1  ;;  %v5385_v8 = vlaneseq }
 0x2d1   : > { %v3486_v46 = vadd.f32 %v3355_v17, %v8982_v32  ;;  %v6839_v17 = vld [vmem:[%s7630_s11 + $0x80] sm:$0xff]  }
 0x2d2   : > { %v8393_v12 = vshrl.u32 %v5385_v8, 7  ;;  %v3843_v45 = vshll.u32 %v6839_v17, 16 }
 0x2d4   : > { %vm5389_vm4 = vcmp.ge.s32.totalorder %v8393_v12, 1 }
 0x2d5   : > { %v5091_v36 = vpop.f32.mrf.mxu0 }
 0x2d6   : > { %v4083_v62 = vpop.f32.mrf.mxu2 }
 0x2d7   : > { %v4214_v49 = vadd.f32 %v4083_v62, %v3486_v46 }
 0x2d8   : > { %v4399_v3 = vpop.f32.mrf.mxu3  ;;  %v3358_v38 = vpop.f32.mrf.mxu1 }
 0x2d9   : > { %v4525_v4 = vadd.f32 %v4394_v52, %v4214_v49  ;;  %v3840_v52 = vshrl.u32 %v6839_v17, 16  ;;  %v3127_v49 = vshrl.u32 %v6281_v54, 16  ;;  %v8408_v17 = vld [vmem:[%s7630_s11 + $0x84] sm:$0xff] }
 0x2db   : > { %v5222_v32 = vadd.f32 %v5091_v36, %v4525_v4  ;;  %6031 = vmatmul.msk.bf16.gmra.mxu1 %vm363_vm1, %v3126_v37  ;;  %6059 = vmatmul.msk.bf16.gmra.mxu2 %vm363_vm1, %v3838_v61  ;;  %v3487_v36 = vadd.f32 %v3358_v38, %v7938_v40  ;;  %v3131_v37 = vshll.u32 %v8398_v22, 16  ;;  %v3845_v4 = vrot.slane %v3843_v45, 4 }
 0x2dc   : > { %v3129_v38 = vor.u32 %v3127_v49, %v3125_v11 }
 0x2dd   : > { %v5094_v14 = vpop.f32.mrf.mxu0  ;;  %6088 = vmatmul.msk.bf16.gmra.mxu3 %vm363_vm1, %v7286_v58  ;;  %v5280_v50 = vadd.f32 %v8390_v29, %v5222_v32  ;;  %v3842_v58 = vrot.slane %v3840_v52, 3  ;;  %v3133_v47 = vrot.slane %v3131_v37, 1  ;;  %v4867_v52 = vshll.u32 %v8408_v17, 16 }
 0x2de   : > { %v4086_v46 = vpop.f32.mrf.mxu2 }
 0x2df   : > { %v5334_v62 = vmax.f32 %v5280_v50, 0.0  ;;  %v4215_v61 = vadd.f32 %v4086_v46, %v3487_v36  ;;  %v3846_v54 = vor.u32 %v3845_v4, %v3842_v58  ;;  %v4863_v36 = vshrl.u32 %v8380_v39, 16  ;;  %v6840_v4 = vld [vmem:[%s7630_s11 + $0x88] sm:$0xff]  }
 0x2e0   : > { %6223 = vmatmul.msk.bf16.gmra.mxu0 %vm363_vm1, %v4862_v26  ;;  %v4402_v8 = vpop.f32.mrf.mxu3  ;;  %v3360_v21 = vpop.f32.mrf.mxu1  ;;  %v8422_v39 = vadd.s32 16, %v8393_v12 }
 0x2e1   : > { %v5422_v32 = vsel %vm5389_vm4, %v5334_v62, 0.0  ;;  %v4526_v26 = vadd.f32 %v4397_v5, %v4215_v61  ;;  %v3488_v45 = vadd.f32 %v3360_v21, %v7948_v6  ;;  %v3134_v62 = vsel %vm1298_vm3, %v3129_v38, %v3133_v47  ;;  %v8427_v6 = vld [vmem:[%s7630_s11 + $0x80] sm:$0xff] }
 0x2e2   : > { %v6648_v40 = vpack.c.bf16 %v5422_v32, %v8361_v31  ;;  %v3847_v37 = vsel %vm623_vm2, %v3837_v7, %v3846_v54  ;;  %v4865_v5 = vor.u32 %v4863_v36, %v4861_v55  ;;  %v4869_v61 = vrot.slane %v4867_v52, 1 }
 0x2e3   : > { %v5223_v11 = vadd.f32 %v5094_v14, %v4526_v26  ;;  %v3849_v55 = vshrl.u32 %v6840_v4, 16  ;;  %vm5400_vm5 = vcmp.le.s32.totalorder %v8422_v39, 16 }
 0x2e4   : > { %6979 = vst [vmem:[%s8365_s4 + $0x8] sm:$0xff] %v6648_v40   ;;  %v7288_v40 = vld [vmem:[%s7630_s11 + $0x84] sm:$0xff]   ;;  %v4870_v7 = vsel %vm1298_vm3, %v4865_v5, %v4869_v61 }
 0x2e5   : > { %v5096_v50 = vpop.f32.mrf.mxu0  ;;  %v5281_v14 = vadd.f32 %v8390_v29, %v5223_v11 }
 0x2e6   : > { %v4088_v46 = vpop.f32.mrf.mxu2 }
 0x2e7   : > { %v4216_v43 = vadd.f32 %v4088_v46, %v3488_v45  ;;  %v3135_v45 = vshrl.u32 %v8398_v22, 16  ;;  %v3139_v46 = vshll.u32 %v8427_v6, 16 }
 0x2e8   : > { %v4404_v32 = vpop.f32.mrf.mxu3  ;;  %v3363_v49 = vpop.f32.mrf.mxu1 }
 0x2e9   : > { %v4527_v58 = vadd.f32 %v4399_v3, %v4216_v43  ;;  %v3852_v43 = vshll.u32 %v6840_v4, 16  ;;  %v3489_v38 = vadd.f32 %v3363_v49, %v7954_v35  ;;  %v3141_v4 = vrot.slane %v3139_v46, 1 }
 0x2eb   : > { %v5224_v31 = vadd.f32 %v5096_v50, %v4527_v58  ;;  %6032 = vmatmul.msk.bf16.gmra.mxu1 %vm363_vm1, %v3134_v62  ;;  %6060 = vmatmul.msk.bf16.gmra.mxu2 %vm363_vm1, %v3847_v37  ;;  %v5335_v62 = vmax.f32 %v5281_v14, 0.0  ;;  %v3851_v37 = vrot.slane %v3849_v55, 3  ;;  %v3854_v5 = vrot.slane %v3852_v43, 4 }
 0x2ec   : > { %v3137_v58 = vor.u32 %v3135_v45, %v3133_v47  ;;  %v4871_v14 = vshrl.u32 %v8408_v17, 16  ;;  %v6841_v17 = vld [vmem:[%s7630_s11 + $0x90] sm:$0xff]  }
 0x2ed   : > { %v5099_v21 = vpop.f32.mrf.mxu0  ;;  %6089 = vmatmul.msk.bf16.gmra.mxu3 %vm363_vm1, %v7288_v40  ;;  %v5282_v3 = vadd.f32 %v8390_v29, %v5224_v31  ;;  %v8439_v31 = vld [vmem:[%s7630_s11 + $0x8c] sm:$0xff]  ;;  %v3855_v22 = vor.u32 %v3854_v5, %v3851_v37 }
 0x2ee   : > { %v4091_v26 = vpop.f32.mrf.mxu2  ;;  %v4875_v55 = vshll.u32 %v8439_v31, 16  ;;  %v4873_v45 = vor.u32 %v4871_v14, %v4869_v61  ;;  %v3861_v61 = vshll.u32 %v6841_v17, 16 }
 0x2ef   : > { %v5336_v50 = vmax.f32 %v5282_v3, 0.0  ;;  %v4217_v36 = vadd.f32 %v4091_v26, %v3489_v38 }
 0x2f0   : > { %6224 = vmatmul.msk.bf16.gmra.mxu0 %vm363_vm1, %v4870_v7  ;;  %v4407_v52 = vpop.f32.mrf.mxu3  ;;  %v3365_v11 = vpop.f32.mrf.mxu1  ;;  %v4877_v46 = vrot.slane %v4875_v55, 1  ;;  %v3143_v55 = vshrl.u32 %v8427_v6, 16  ;;  %v4879_v6 = vshrl.u32 %v8439_v31, 16 }
 0x2f1   : > { %v5424_v35 = vsel %vm5400_vm5, %v5336_v50, 0.0  ;;  %v4528_v49 = vadd.f32 %v4402_v8, %v4217_v36  ;;  %v3490_v43 = vadd.f32 %v3365_v11, %v7964_v42  ;;  %v3142_v50 = vsel %vm1298_vm3, %v3137_v58, %v3141_v4 }
 0x2f2   : > { %v6653_v40 = vpack.c.bf16 %v5424_v35, %v5335_v62  ;;  %v7290_v62 = vld [vmem:[%s7630_s11 + $0x8c] sm:$0xff]   ;;  %v4878_v35 = vsel %vm1298_vm3, %v4873_v45, %v4877_v46 }
 0x2f3   : > { %v5225_v7 = vadd.f32 %v5099_v21, %v4528_v49  ;;  %v3856_v21 = vsel %vm623_vm2, %v3846_v54, %v3855_v22  ;;  %v8457_v49 = vld [vmem:[%s7630_s11 + $0x88] sm:$0xff]  ;;  %v3858_v54 = vshrl.u32 %v6841_v17, 16 }
 0x2f4   : > { %6980 = vst [vmem:[%s8365_s4 + $0x10] sm:$0xff] %v6653_v40  }
 0x2f5   : > { %v5101_v3 = vpop.f32.mrf.mxu0  ;;  %v5283_v47 = vadd.f32 %v8390_v29, %v5225_v7 }
 0x2f6   : > { %v4093_v38 = vpop.f32.mrf.mxu2 }
 0x2f7   : > { %v4218_v26 = vadd.f32 %v4093_v38, %v3490_v43  ;;  %v5337_v42 = vmax.f32 %v5283_v47, 0.0  ;;  %v3863_v47 = vrot.slane %v3861_v61, 4 }
 0x2f8   : > { %v4409_v8 = vpop.f32.mrf.mxu3  ;;  %v3368_v36 = vpop.f32.mrf.mxu1 }
 0x2f9   : > { %v4529_v37 = vadd.f32 %v4404_v32, %v4218_v26  ;;  %v3491_v32 = vadd.f32 %v3368_v36, %v7970_v10  ;;  %v5425_v43 = vsel %vm5389_vm4, %v5337_v42, 0.0  ;;  %v3147_v26 = vshll.u32 %v8457_v49, 16 }
 0x2fa   : > { %v3145_v36 = vor.u32 %v3143_v55, %v3141_v4 }
 0x2fb   : > { %v5226_v5 = vadd.f32 %v5101_v3, %v4529_v37  ;;  %6033 = vmatmul.msk.bf16.gmra.mxu1 %vm363_vm1, %v3142_v50  ;;  %6061 = vmatmul.msk.bf16.gmra.mxu2 %vm363_vm1, %v3856_v21  ;;  %v3860_v50 = vrot.slane %v3858_v54, 3  ;;  %v8467_v21 = vld [vmem:[%s7630_s11 + $0x94] sm:$0xff]  ;;  %v3149_v37 = vrot.slane %v3147_v26, 1 }
 0x2fd   : > { %v5104_v11 = vpop.f32.mrf.mxu0  ;;  %6090 = vmatmul.msk.bf16.gmra.mxu3 %vm363_vm1, %v7290_v62  ;;  %v5284_v40 = vadd.f32 %v8390_v29, %v5226_v5  ;;  %v3864_v17 = vor.u32 %v3863_v47, %v3860_v50  ;;  %v4883_v5 = vshll.u32 %v8467_v21, 16 }
 0x2fe   : > { %v4096_v58 = vpop.f32.mrf.mxu2 }
 0x2ff   : > { %v5338_v7 = vmax.f32 %v5284_v40, 0.0  ;;  %v4219_v3 = vadd.f32 %v4096_v58, %v3491_v32  ;;  %v3865_v4 = vsel %vm623_vm2, %v3855_v22, %v3864_v17  ;;  %v4881_v58 = vor.u32 %v4879_v6, %v4877_v46 }
 0x300   : > { %6225 = vmatmul.msk.bf16.gmra.mxu0 %vm363_vm1, %v4878_v35  ;;  %v4412_v14 = vpop.f32.mrf.mxu3  ;;  %v3370_v38 = vpop.f32.mrf.mxu1 }
 0x301   : > { %v6658_v45 = vpack.c.bf16 %v5338_v7, %v5425_v43  ;;  %v4530_v10 = vadd.f32 %v4407_v52, %v4219_v3  ;;  %v3492_v35 = vadd.f32 %v3370_v38, %v7980_v27  ;;  %v3150_v52 = vsel %vm1298_vm3, %v3145_v36, %v3149_v37  ;;  %v7292_v3 = vld [vmem:[%s7630_s11 + $0x94] sm:$0xff]  }
 0x302   : > { %v4885_v7 = vrot.slane %v4883_v5, 1  ;;  %v6842_v43 = vld [vmem:[%s7630_s11 + $0x98] sm:$0xff]   ;;  %v8481_v27 = vld [vmem:[%s7630_s11 + $0x90] sm:$0xff] }
 0x303   : > { %6981 = vst [vmem:[%s8365_s4 + $0x18] sm:$0xff] %v6658_v45   ;;  %v5227_v42 = vadd.f32 %v5104_v11, %v4530_v10  ;;  %v3867_v22 = vshrl.u32 %v6842_v43, 16  ;;  %v3870_v46 = vshll.u32 %v6842_v43, 16  ;;  %v3155_v6 = vshll.u32 %v8481_v27, 16 }
 0x304   : > { %v4886_v38 = vsel %vm1298_vm3, %v4881_v58, %v4885_v7 }
 0x305   : > { %v5106_v62 = vpop.f32.mrf.mxu0  ;;  %v5285_v55 = vadd.f32 %v8390_v29, %v5227_v42  ;;  %v3157_v58 = vrot.slane %v3155_v6, 1  ;;  %v6843_v6 = vld [vmem:[%s7630_s11 + $0xa0] sm:$0xff]  }
 0x306   : > { %v4098_v54 = vpop.f32.mrf.mxu2 }
 0x307   : > { %v4220_v61 = vadd.f32 %v4098_v54, %v3492_v35  ;;  %v5339_v50 = vmax.f32 %v5285_v55, 0.0  ;;  %v3869_v35 = vrot.slane %v3867_v22, 3  ;;  %v3872_v54 = vrot.slane %v3870_v46, 4 }
 0x308   : > { %v4414_v40 = vpop.f32.mrf.mxu3  ;;  %v3373_v32 = vpop.f32.mrf.mxu1 }
 0x309   : > { %v4531_v31 = vadd.f32 %v4409_v8, %v4220_v61  ;;  %v3493_v8 = vadd.f32 %v3373_v32, %v7986_v48  ;;  %v8491_v61 = vld [vmem:[%s7630_s11 + $0x9c] sm:$0xff]  ;;  %v3873_v55 = vor.u32 %v3872_v54, %v3869_v35 }
 0x30a   : > { %v4891_v43 = vshll.u32 %v8491_v61, 16 }
 0x30b   : > { %v5228_v26 = vadd.f32 %v5106_v62, %v4531_v31  ;;  %6034 = vmatmul.msk.bf16.gmra.mxu1 %vm363_vm1, %v3150_v52  ;;  %6062 = vmatmul.msk.bf16.gmra.mxu2 %vm363_vm1, %v3865_v4  ;;  %v3151_v62 = vshrl.u32 %v8457_v49, 16  ;;  %v5427_v52 = vsel %vm5400_vm5, %v5339_v50, 0.0  ;;  %v4887_v31 = vshrl.u32 %v8467_v21, 16 }
 0x30d   : > { %v5109_v11 = vpop.f32.mrf.mxu0  ;;  %6091 = vmatmul.msk.bf16.gmra.mxu3 %vm363_vm1, %v7292_v3  ;;  %v5286_v47 = vadd.f32 %v8390_v29, %v5228_v26  ;;  %v3153_v4 = vor.u32 %v3151_v62, %v3149_v37 }
 0x30e   : > { %v4101_v45 = vpop.f32.mrf.mxu2 }
 0x30f   : > { %v5340_v10 = vmax.f32 %v5286_v47, 0.0  ;;  %v4221_v5 = vadd.f32 %v4101_v45, %v3493_v8  ;;  %v3158_v46 = vsel %vm1298_vm3, %v3153_v4, %v3157_v58  ;;  %v3874_v8 = vsel %vm623_vm2, %v3864_v17, %v3873_v55 }
 0x310   : > { %6226 = vmatmul.msk.bf16.gmra.mxu0 %vm363_vm1, %v4886_v38  ;;  %v4417_v36 = vpop.f32.mrf.mxu3  ;;  %v3375_v42 = vpop.f32.mrf.mxu1  ;;  %v4893_v45 = vrot.slane %v4891_v43, 1  ;;  %v3876_v17 = vshrl.u32 %v6843_v6, 16  ;;  %v3159_v4 = vshrl.u32 %v8481_v27, 16 }
 0x311   : > { %v5428_v48 = vsel %vm5389_vm4, %v5340_v10, 0.0  ;;  %v4532_v49 = vadd.f32 %v4412_v14, %v4221_v5  ;;  %v3494_v26 = vadd.f32 %v3375_v42, %v7996_v34  ;;  %v4889_v14 = vor.u32 %v4887_v31, %v4885_v7  ;;  %v7294_v10 = vld [vmem:[%s7630_s11 + $0x9c] sm:$0xff]  }
 0x312   : > { %v6663_v32 = vpack.c.bf16 %v5428_v48, %v5427_v52  ;;  %v8508_v34 = vld [vmem:[%s7630_s11 + $0x98] sm:$0xff]  ;;  %v3879_v7 = vshll.u32 %v6843_v6, 16  ;;  %v3878_v43 = vrot.slane %v3876_v17, 3 }
 0x313   : > { %v5229_v37 = vadd.f32 %v5109_v11, %v4532_v49  ;;  %v4894_v11 = vsel %vm1298_vm3, %v4889_v14, %v4893_v45  ;;  %v3163_v49 = vshll.u32 %v8508_v34, 16 }
 0x314   : > { %6982 = vst [vmem:[%s8365_s4 + $0x20] sm:$0xff] %v6663_v32  }
 0x315   : > { %v5111_v3 = vpop.f32.mrf.mxu0  ;;  %v5287_v5 = vadd.f32 %v8390_v29, %v5229_v37  ;;  %v3161_v37 = vor.u32 %v3159_v4, %v3157_v58 }
 0x316   : > { %v4103_v38 = vpop.f32.mrf.mxu2 }
 0x317   : > { %v4222_v22 = vadd.f32 %v4103_v38, %v3494_v26  ;;  %v3881_v26 = vrot.slane %v3879_v7, 4  ;;  %v8519_v38 = vld [vmem:[%s7630_s11 + $0xa4] sm:$0xff] }
 0x318   : > { %v4419_v50 = vpop.f32.mrf.mxu3  ;;  %v3378_v47 = vpop.f32.mrf.mxu1 }
 0x319   : > { %v4533_v62 = vadd.f32 %v4414_v40, %v4222_v22  ;;  %v3495_v35 = vadd.f32 %v3378_v47, %v8002_v16  ;;  %v3165_v47 = vrot.slane %v3163_v49, 1  ;;  %v3882_v27 = vor.u32 %v3881_v26, %v3878_v43  ;;  %v8537_v49 = vld [vmem:[%s7630_s11 + $0xa0] sm:$0xff] }
 0x31b   : > { %v5230_v21 = vadd.f32 %v5111_v3, %v4533_v62  ;;  %6035 = vmatmul.msk.bf16.gmra.mxu1 %vm363_vm1, %v3158_v46  ;;  %6063 = vmatmul.msk.bf16.gmra.mxu2 %vm363_vm1, %v3874_v8  ;;  %v5341_v3 = vmax.f32 %v5287_v5, 0.0  ;;  %v4899_v62 = vshll.u32 %v8519_v38, 16 }
 0x31d   : > { %v5114_v42 = vpop.f32.mrf.mxu0  ;;  %6092 = vmatmul.msk.bf16.gmra.mxu3 %vm363_vm1, %v7294_v10  ;;  %v5288_v40 = vadd.f32 %v8390_v29, %v5230_v21  ;;  %v4895_v10 = vshrl.u32 %v8491_v61, 16  ;;  %v6844_v61 = vld [vmem:[%s7630_s11 + $0xa8] sm:$0xff]  }
 0x31e   : > { %v4106_v54 = vpop.f32.mrf.mxu2 }
 0x31f   : > { %v5342_v52 = vmax.f32 %v5288_v40, 0.0  ;;  %v4223_v48 = vadd.f32 %v4106_v54, %v3495_v35  ;;  %v4897_v7 = vor.u32 %v4895_v10, %v4893_v45  ;;  %v4901_v40 = vrot.slane %v4899_v62, 1  ;;  %v7296_v35 = vld [vmem:[%s7630_s11 + $0xa4] sm:$0xff]   ;;  %v8547_v62 = vld [vmem:[%s7630_s11 + $0xac] sm:$0xff] }
 0x320   : > { %6227 = vmatmul.msk.bf16.gmra.mxu0 %vm363_vm1, %v4894_v11  ;;  %v4422_v32 = vpop.f32.mrf.mxu3  ;;  %v3380_v31 = vpop.f32.mrf.mxu1  ;;  %v3166_v11 = vsel %vm1298_vm3, %v3161_v37, %v3165_v47  ;;  %v3888_v45 = vshll.u32 %v6844_v61, 16 }
 0x321   : > { %v5430_v16 = vsel %vm5400_vm5, %v5342_v52, 0.0  ;;  %v4534_v22 = vadd.f32 %v4417_v36, %v4223_v48  ;;  %v3496_v6 = vadd.f32 %v3380_v31, %v8012_v53  ;;  %v4902_v4 = vsel %vm1298_vm3, %v4897_v7, %v4901_v40 }
 0x322   : > { %v6668_v46 = vpack.c.bf16 %v5430_v16, %v5341_v3  ;;  %v3890_v10 = vrot.slane %v3888_v45, 4 }
 0x323   : > { %v5231_v8 = vadd.f32 %v5114_v42, %v4534_v22  ;;  %v3883_v42 = vsel %vm623_vm2, %v3873_v55, %v3882_v27  ;;  %v3885_v55 = vshrl.u32 %v6844_v61, 16  ;;  %v3167_v22 = vshrl.u32 %v8508_v34, 16 }
 0x324   : > { %6983 = vst [vmem:[%s8365_s4 + $0x28] sm:$0xff] %v6668_v46   ;;  %v4903_v34 = vshrl.u32 %v8519_v38, 16 }
 0x325   : > { %v5116_v14 = vpop.f32.mrf.mxu0  ;;  %v5289_v58 = vadd.f32 %v8390_v29, %v5231_v8  ;;  %v3171_v8 = vshll.u32 %v8537_v49, 16 }
 0x326   : > { %v4108_v21 = vpop.f32.mrf.mxu2 }
 0x327   : > { %v4224_v5 = vadd.f32 %v4108_v21, %v3496_v6  ;;  %v5343_v53 = vmax.f32 %v5289_v58, 0.0  ;;  %v3169_v21 = vor.u32 %v3167_v22, %v3165_v47 }
 0x328   : > { %v4424_v36 = vpop.f32.mrf.mxu3  ;;  %v3383_v17 = vpop.f32.mrf.mxu1 }
 0x329   : > { %v4535_v54 = vadd.f32 %v4419_v50, %v4224_v5  ;;  %v3497_v50 = vadd.f32 %v3383_v17, %v8018_v20  ;;  %v5431_v46 = vsel %vm5389_vm4, %v5343_v53, 0.0  ;;  %v4907_v17 = vshll.u32 %v8547_v62, 16 }
 0x32a   : > { %v4905_v53 = vor.u32 %v4903_v34, %v4901_v40 }
 0x32b   : > { %v5232_v52 = vadd.f32 %v5116_v14, %v4535_v54  ;;  %6036 = vmatmul.msk.bf16.gmra.mxu1 %vm363_vm1, %v3166_v11  ;;  %6064 = vmatmul.msk.bf16.gmra.mxu2 %vm363_vm1, %v3883_v42  ;;  %v3887_v14 = vrot.slane %v3885_v55, 3  ;;  %v3173_v11 = vrot.slane %v3171_v8, 1  ;;  %v7298_v55 = vld [vmem:[%s7630_s11 + $0xac] sm:$0xff]   ;;  %v3175_v8 = vshrl.u32 %v8537_v49, 16 }
 0x32d   : > { %v5119_v48 = vpop.f32.mrf.mxu0  ;;  %6093 = vmatmul.msk.bf16.gmra.mxu3 %vm363_vm1, %v7296_v35  ;;  %v5290_v3 = vadd.f32 %v8390_v29, %v5232_v52  ;;  %v3891_v58 = vor.u32 %v3890_v10, %v3887_v14 }
 0x32e   : > { %v4111_v31 = vpop.f32.mrf.mxu2 }
 0x32f   : > { %v5344_v43 = vmax.f32 %v5290_v3, 0.0  ;;  %v4225_v26 = vadd.f32 %v4111_v31, %v3497_v50  ;;  %v3892_v47 = vsel %vm623_vm2, %v3882_v27, %v3891_v58  ;;  %v6845_v3 = vld [vmem:[%s7630_s11 + $0xb0] sm:$0xff]  }
 0x330   : > { %6228 = vmatmul.msk.bf16.gmra.mxu0 %vm363_vm1, %v4902_v4  ;;  %v4427_v16 = vpop.f32.mrf.mxu3  ;;  %v3385_v37 = vpop.f32.mrf.mxu1  ;;  %v4909_v4 = vrot.slane %v4907_v17, 1  ;;  %v3894_v27 = vshrl.u32 %v6845_v3, 16  ;;  %v3897_v40 = vshll.u32 %v6845_v3, 16 }
 0x331   : > { %v6673_v6 = vpack.c.bf16 %v5344_v43, %v5431_v46  ;;  %v4536_v20 = vadd.f32 %v4422_v32, %v4225_v26  ;;  %v3498_v7 = vadd.f32 %v3385_v37, %v8028_v2  ;;  %v3174_v32 = vsel %vm1298_vm3, %v3169_v21, %v3173_v11  ;;  %v8561_v2 = vld [vmem:[%s7630_s11 + $0xa8] sm:$0xff] }
 0x332   : > { %v4910_v31 = vsel %vm1298_vm3, %v4905_v53, %v4909_v4  ;;  %v3179_v14 = vshll.u32 %v8561_v2, 16  ;;  %v3899_v21 = vrot.slane %v3897_v40, 4 }
 0x333   : > { %6984 = vst [vmem:[%s8365_s4 + $0x30] sm:$0xff] %v6673_v6   ;;  %v5233_v42 = vadd.f32 %v5119_v48, %v4536_v20  ;;  %v3896_v20 = vrot.slane %v3894_v27, 3  ;;  %v7300_v27 = vld [vmem:[%s7630_s11 + $0xb4] sm:$0xff]  }
 0x335   : > { %v5121_v5 = vpop.f32.mrf.mxu0  ;;  %v5291_v45 = vadd.f32 %v8390_v29, %v5233_v42  ;;  %v3177_v42 = vor.u32 %v3175_v8, %v3173_v11 }
 0x336   : > { %v4113_v35 = vpop.f32.mrf.mxu2 }
 0x337   : > { %v4226_v54 = vadd.f32 %v4113_v35, %v3498_v7  ;;  %v5345_v43 = vmax.f32 %v5291_v45, 0.0  ;;  %v3181_v7 = vrot.slane %v3179_v14, 1 }
 0x338   : > { %v4429_v61 = vpop.f32.mrf.mxu3  ;;  %v3388_v52 = vpop.f32.mrf.mxu1 }
 0x339   : > { %v4537_v38 = vadd.f32 %v4424_v36, %v4226_v54  ;;  %v3499_v36 = vadd.f32 %v3388_v52, %v8034_v56  ;;  %v5433_v34 = vsel %vm5400_vm5, %v5345_v43, 0.0  ;;  %v3900_v54 = vor.u32 %v3899_v21, %v3896_v20  ;;  %v6846_v43 = vld [vmem:[%s7630_s11 + $0xb8] sm:$0xff]  }
 0x33a   : > { %v4911_v52 = vshrl.u32 %v8547_v62, 16  ;;  %v3182_v45 = vsel %vm1298_vm3, %v3177_v42, %v3181_v7  ;;  %v8599_v42 = vld [vmem:[%s7630_s11 + $0xbc] sm:$0xff] }
 0x33b   : > { %v5234_v50 = vadd.f32 %v5121_v5, %v4537_v38  ;;  %6037 = vmatmul.msk.bf16.gmra.mxu1 %vm363_vm1, %v3174_v32  ;;  %6065 = vmatmul.msk.bf16.gmra.mxu2 %vm363_vm1, %v3892_v47  ;;  %v8571_v5 = vld [vmem:[%s7630_s11 + $0xb4] sm:$0xff] }
 0x33c   : > { %v4915_v32 = vshll.u32 %v8571_v5, 16 }
 0x33d   : > { %v5124_v48 = vpop.f32.mrf.mxu0  ;;  %6094 = vmatmul.msk.bf16.gmra.mxu3 %vm363_vm1, %v7298_v55  ;;  %v5292_v26 = vadd.f32 %v8390_v29, %v5234_v50  ;;  %v3901_v50 = vsel %vm623_vm2, %v3891_v58, %v3900_v54  ;;  %v3903_v58 = vshrl.u32 %v6846_v43, 16 }
 0x33e   : > { %v4116_v22 = vpop.f32.mrf.mxu2 }
 0x33f   : > { %v5346_v46 = vmax.f32 %v5292_v26, 0.0  ;;  %v4227_v10 = vadd.f32 %v4116_v22, %v3499_v36 }
 0x340   : > { %6229 = vmatmul.msk.bf16.gmra.mxu0 %vm363_vm1, %v4910_v31  ;;  %v4432_v37 = vpop.f32.mrf.mxu3  ;;  %v3390_v6 = vpop.f32.mrf.mxu1  ;;  %v4917_v31 = vrot.slane %v4915_v32, 1 }
 0x341   : > { %v5434_v56 = vsel %vm5389_vm4, %v5346_v46, 0.0  ;;  %v4538_v49 = vadd.f32 %v4427_v16, %v4227_v10  ;;  %v3500_v47 = vadd.f32 %v3390_v6, %v8044_v30  ;;  %v4913_v16 = vor.u32 %v4911_v52, %v4909_v4  ;;  %v8588_v30 = vld [vmem:[%s7630_s11 + $0xb0] sm:$0xff] }
 0x342   : > { %v6678_v17 = vpack.c.bf16 %v5434_v56, %v5433_v34  ;;  %v3906_v4 = vshll.u32 %v6846_v43, 16  ;;  %v3183_v6 = vshrl.u32 %v8561_v2, 16  ;;  %v3187_v20 = vshll.u32 %v8588_v30, 16 }
 0x343   : > { %v5235_v11 = vadd.f32 %v5124_v48, %v4538_v49  ;;  %v4918_v48 = vsel %vm1298_vm3, %v4913_v16, %v4917_v31  ;;  %v3905_v56 = vrot.slane %v3903_v58, 3 }
 0x344   : > { %6985 = vst [vmem:[%s8365_s4 + $0x38] sm:$0xff] %v6678_v17   ;;  %v3908_v17 = vrot.slane %v3906_v4, 4  ;;  %v3185_v52 = vor.u32 %v3183_v6, %v3181_v7  ;;  %v3189_v32 = vrot.slane %v3187_v20, 1  ;;  %v3191_v20 = vshrl.u32 %v8588_v30, 16 }
 0x345   : > { %v5126_v35 = vpop.f32.mrf.mxu0  ;;  %v5293_v26 = vadd.f32 %v8390_v29, %v5235_v11  ;;  %v4927_v30 = vshrl.u32 %v8599_v42, 16 }
 0x346   : > { %v4118_v53 = vpop.f32.mrf.mxu2  ;;  %v3909_v2 = vor.u32 %v3908_v17, %v3905_v56  ;;  %v3190_v16 = vsel %vm1298_vm3, %v3185_v52, %v3189_v32  ;;  %v3193_v52 = vor.u32 %v3191_v20, %v3189_v32 }
 0x347   : > { %v4228_v55 = vadd.f32 %v4118_v53, %v3500_v47  ;;  %v5347_v21 = vmax.f32 %v5293_v26, 0.0  ;;  %v7302_v26 = vld [vmem:[%s7630_s11 + $0xbc] sm:$0xff]  }
 0x348   : > { %v4434_v38 = vpop.f32.mrf.mxu3  ;;  %v3393_v3 = vpop.f32.mrf.mxu1 }
 0x349   : > { %v4539_v40 = vadd.f32 %v4429_v61, %v4228_v55  ;;  %v3501_v22 = vadd.f32 %v3393_v3, %v8050_v1  ;;  %v4919_v55 = vshrl.u32 %v8571_v5, 16  ;;  %v6847_v5 = vld [vmem:[%s7630_s11 + $0xc0] sm:$0xff]  }
 0x34b   : > { %v5236_v62 = vadd.f32 %v5126_v35, %v4539_v40  ;;  %6038 = vmatmul.msk.bf16.gmra.mxu1 %vm363_vm1, %v3182_v45  ;;  %6066 = vmatmul.msk.bf16.gmra.mxu2 %vm363_vm1, %v3901_v50  ;;  %v4923_v45 = vshll.u32 %v8599_v42, 16  ;;  %v3910_v40 = vsel %vm623_vm2, %v3900_v54, %v3909_v2  ;;  %v4921_v43 = vor.u32 %v4919_v55, %v4917_v31 }
 0x34c   : > { %v3912_v54 = vshrl.u32 %v6847_v5, 16  ;;  %v3915_v31 = vshll.u32 %v6847_v5, 16  ;;  %v6848_v5 = vld [vmem:[%s7630_s11 + $0xc8] sm:$0xff]  }
 0x34d   : > { %v5129_v36 = vpop.f32.mrf.mxu0  ;;  %6095 = vmatmul.msk.bf16.gmra.mxu3 %vm363_vm1, %v7300_v27  ;;  %v5294_v61 = vadd.f32 %v8390_v29, %v5236_v62  ;;  %v4925_v62 = vrot.slane %v4923_v45, 1 }
 0x34e   : > { %v4121_v46 = vpop.f32.mrf.mxu2  ;;  %v3914_v17 = vrot.slane %v3912_v54, 3 }
 0x34f   : > { %v5348_v8 = vmax.f32 %v5294_v61, 0.0  ;;  %v4229_v14 = vadd.f32 %v4121_v46, %v3501_v22  ;;  %v4926_v4 = vsel %vm1298_vm3, %v4921_v43, %v4925_v62  ;;  %v8617_v61 = vld [vmem:[%s7630_s11 + $0xb8] sm:$0xff] }
 0x350   : > { %6230 = vmatmul.msk.bf16.gmra.mxu0 %vm363_vm1, %v4918_v48  ;;  %v4437_v10 = vpop.f32.mrf.mxu3  ;;  %v3395_v34 = vpop.f32.mrf.mxu1  ;;  %v3195_v56 = vshll.u32 %v8617_v61, 16 }
 0x351   : > { %v5436_v1 = vsel %vm5400_vm5, %v5348_v8, 0.0  ;;  %v4540_v49 = vadd.f32 %v4432_v37, %v4229_v14  ;;  %v3502_v11 = vadd.f32 %v3395_v34, %v8060_v60 }
 0x352   : > { %v6683_v35 = vpack.c.bf16 %v5436_v1, %v5347_v21  ;;  %v3917_v1 = vrot.slane %v3915_v31, 4 }
 0x353   : > { %v5237_v47 = vadd.f32 %v5129_v36, %v4540_v49  ;;  %v8627_v49 = vld [vmem:[%s7630_s11 + $0xc4] sm:$0xff] }
 0x354   : > { %6986 = vst [vmem:[%s8365_s4 + $0x40] sm:$0xff] %v6683_v35   ;;  %v3918_v55 = vor.u32 %v3917_v1, %v3914_v17  ;;  %v4931_v45 = vshll.u32 %v8627_v49, 16 }
 0x355   : > { %v5131_v53 = vpop.f32.mrf.mxu0  ;;  %v5295_v7 = vadd.f32 %v8390_v29, %v5237_v47 }
 0x356   : > { %v4123_v3 = vpop.f32.mrf.mxu2  ;;  %v3919_v32 = vsel %vm623_vm2, %v3909_v2, %v3918_v55  ;;  %v4933_v43 = vrot.slane %v4931_v45, 1  ;;  %v3921_v2 = vshrl.u32 %v6848_v5, 16 }
 0x357   : > { %v4230_v50 = vadd.f32 %v4123_v3, %v3502_v11  ;;  %v5349_v60 = vmax.f32 %v5295_v7, 0.0 }
 0x358   : > { %v4439_v37 = vpop.f32.mrf.mxu3  ;;  %v3398_v27 = vpop.f32.mrf.mxu1 }
 0x359   : > { %v4541_v36 = vadd.f32 %v4434_v38, %v4230_v50  ;;  %v3503_v38 = vadd.f32 %v3398_v27, %v8066_v24  ;;  %v5437_v21 = vsel %vm5389_vm4, %v5349_v60, 0.0 }
 0x35b   : > { %v5238_v48 = vadd.f32 %v5131_v53, %v4541_v36  ;;  %6039 = vmatmul.msk.bf16.gmra.mxu1 %vm363_vm1, %v3190_v16  ;;  %6067 = vmatmul.msk.bf16.gmra.mxu2 %vm363_vm1, %v3910_v40  ;;  %v3197_v53 = vrot.slane %v3195_v56, 1  ;;  %v4929_v40 = vor.u32 %v4927_v30, %v4925_v62  ;;  %v3924_v62 = vshll.u32 %v6848_v5, 16  ;;  %v8651_v56 = vld [vmem:[%s7630_s11 + $0xcc] sm:$0xff] }
 0x35c   : > { %v4935_v30 = vshrl.u32 %v8627_v49, 16  ;;  %v4939_v45 = vshll.u32 %v8651_v56, 16 }
 0x35d   : > { %v5134_v58 = vpop.f32.mrf.mxu0  ;;  %6096 = vmatmul.msk.bf16.gmra.mxu3 %vm363_vm1, %v7302_v26  ;;  %v5296_v22 = vadd.f32 %v8390_v29, %v5238_v48  ;;  %v7304_v26 = vld [vmem:[%s7630_s11 + $0xc4] sm:$0xff]  }
 0x35e   : > { %v4126_v46 = vpop.f32.mrf.mxu2 }
 0x35f   : > { %v5350_v8 = vmax.f32 %v5296_v22, 0.0  ;;  %v4231_v14 = vadd.f32 %v4126_v46, %v3503_v38  ;;  %v3199_v46 = vshrl.u32 %v8617_v61, 16 }
 0x360   : > { %6231 = vmatmul.msk.bf16.gmra.mxu0 %vm363_vm1, %v4926_v4  ;;  %v4442_v6 = vpop.f32.mrf.mxu3  ;;  %v3400_v34 = vpop.f32.mrf.mxu1 }
 0x361   : > { %v6688_v35 = vpack.c.bf16 %v5350_v8, %v5437_v21  ;;  %v4542_v24 = vadd.f32 %v4437_v10, %v4231_v14  ;;  %v3504_v3 = vadd.f32 %v3400_v34, %v8076_v33  ;;  %v3198_v10 = vsel %vm1298_vm3, %v3193_v52, %v3197_v53  ;;  %v8641_v33 = vld [vmem:[%s7630_s11 + $0xc0] sm:$0xff] }
 0x362   : > { %v3203_v8 = vshll.u32 %v8641_v33, 16  ;;  %v3923_v21 = vrot.slane %v3921_v2, 3  ;;  %v3926_v34 = vrot.slane %v3924_v62, 4 }
 0x363   : > { %6987 = vst [vmem:[%s8365_s4 + $0x48] sm:$0xff] %v6688_v35   ;;  %v5239_v11 = vadd.f32 %v5134_v58, %v4542_v24  ;;  %v4934_v58 = vsel %vm1298_vm3, %v4929_v40, %v4933_v43  ;;  %v3201_v35 = vor.u32 %v3199_v46, %v3197_v53  ;;  %v4941_v40 = vrot.slane %v4939_v45, 1 }
 0x364   : > { %v3205_v24 = vrot.slane %v3203_v8, 1 }
 0x365   : > { %v5136_v47 = vpop.f32.mrf.mxu0  ;;  %v5297_v36 = vadd.f32 %v8390_v29, %v5239_v11 }
 0x366   : > { %v4128_v50 = vpop.f32.mrf.mxu2 }
 0x367   : > { %v4232_v16 = vadd.f32 %v4128_v50, %v3504_v3  ;;  %v5351_v4 = vmax.f32 %v5297_v36, 0.0 }
 0x368   : > { %v4444_v7 = vpop.f32.mrf.mxu3  ;;  %v3403_v27 = vpop.f32.mrf.mxu1 }
 0x369   : > { %v4543_v42 = vadd.f32 %v4439_v37, %v4232_v16  ;;  %v3505_v37 = vadd.f32 %v3403_v27, %v8082_v51  ;;  %v5439_v17 = vsel %vm5400_vm5, %v5351_v4, 0.0  ;;  %v3206_v16 = vsel %vm1298_vm3, %v3201_v35, %v3205_v24 }
 0x36a   : > { %v4943_v35 = vshrl.u32 %v8651_v56, 16 }
 0x36b   : > { %v5240_v48 = vadd.f32 %v5136_v47, %v4543_v42  ;;  %6040 = vmatmul.msk.bf16.gmra.mxu1 %vm363_vm1, %v3198_v10  ;;  %6068 = vmatmul.msk.bf16.gmra.mxu2 %vm363_vm1, %v3919_v32  ;;  %v3927_v47 = vor.u32 %v3926_v34, %v3923_v21  ;;  %v6849_v42 = vld [vmem:[%s7630_s11 + $0xd0] sm:$0xff]  }
 0x36d   : > { %v5139_v60 = vpop.f32.mrf.mxu0  ;;  %6097 = vmatmul.msk.bf16.gmra.mxu3 %vm363_vm1, %v7304_v26  ;;  %v5298_v54 = vadd.f32 %v8390_v29, %v5240_v48  ;;  %v3928_v32 = vsel %vm623_vm2, %v3918_v55, %v3927_v47  ;;  %v7306_v26 = vld [vmem:[%s7630_s11 + $0xcc] sm:$0xff]   ;;  %v3930_v55 = vshrl.u32 %v6849_v42, 16 }
 0x36e   : > { %v4131_v31 = vpop.f32.mrf.mxu2 }
 0x36f   : > { %v5352_v22 = vmax.f32 %v5298_v54, 0.0  ;;  %v4233_v14 = vadd.f32 %v4131_v31, %v3505_v37  ;;  %v3207_v37 = vshrl.u32 %v8641_v33, 16  ;;  %v3932_v8 = vrot.slane %v3930_v55, 3 }
 0x370   : > { %6232 = vmatmul.msk.bf16.gmra.mxu0 %vm363_vm1, %v4934_v58  ;;  %v4447_v38 = vpop.f32.mrf.mxu3  ;;  %v3405_v20 = vpop.f32.mrf.mxu1 }
 0x371   : > { %v5440_v51 = vsel %vm5389_vm4, %v5352_v22, 0.0  ;;  %v4544_v61 = vadd.f32 %v4442_v6, %v4233_v14  ;;  %v3506_v11 = vadd.f32 %v3405_v20, %v8092_v18  ;;  %v4937_v6 = vor.u32 %v4935_v30, %v4933_v43  ;;  %v8668_v18 = vld [vmem:[%s7630_s11 + $0xc8] sm:$0xff]  ;;  %v8679_v20 = vld [vmem:[%s7630_s11 + $0xd4] sm:$0xff] }
 0x372   : > { %v6693_v1 = vpack.c.bf16 %v5440_v51, %v5439_v17  ;;  %v3933_v43 = vshll.u32 %v6849_v42, 16  ;;  %v3211_v31 = vshll.u32 %v8668_v18, 16  ;;  %v3209_v34 = vor.u32 %v3207_v37, %v3205_v24  ;;  %v8691_v24 = vld [vmem:[%s8933_s2] ss:$0 sm:$0xff] }
 0x373   : > { %v5241_v53 = vadd.f32 %v5139_v60, %v4544_v61  ;;  %v4942_v60 = vsel %vm1298_vm3, %v4937_v6, %v4941_v40  ;;  %v4947_v61 = vshll.u32 %v8679_v20, 16 }
 0x374   : > { %6988 = vst [vmem:[%s8365_s4 + $0x50] sm:$0xff] %v6693_v1   ;;  %v3935_v14 = vrot.slane %v3933_v43, 4  ;;  %v3213_v17 = vrot.slane %v3211_v31, 1  ;;  %v8712_v31 = vld [vmem:[%s7630_s11 + $0xdc] sm:$0xff] }
 0x375   : > { %v5141_v52 = vpop.f32.mrf.mxu0  ;;  %v5299_v5 = vadd.f32 %v8390_v29, %v5241_v53  ;;  %v4949_v53 = vrot.slane %v4947_v61, 1 }
 0x376   : > { %v4133_v3 = vpop.f32.mrf.mxu2  ;;  %v3936_v33 = vor.u32 %v3935_v14, %v3932_v8 }
 0x377   : > { %v4234_v50 = vadd.f32 %v4133_v3, %v3506_v11  ;;  %v5353_v22 = vmax.f32 %v5299_v5, 0.0  ;;  %v3214_v11 = vsel %vm1298_vm3, %v3209_v34, %v3213_v17 }
 0x378   : > { %v4449_v27 = vpop.f32.mrf.mxu3  ;;  %v3408_v10 = vpop.f32.mrf.mxu1  ;;  %v3937_v56 = vsel %vm623_vm2, %v3927_v47, %v3936_v33 }
 0x379   : > { %v4545_v36 = vadd.f32 %v4444_v7, %v4234_v50  ;;  %v3507_v58 = vadd.f32 %v3408_v10, %v8098_v23  ;;  %v7308_v10 = vld [vmem:[%s7630_s11 + $0xd4] sm:$0xff]  }
 0x37b   : > { %v5242_v49 = vadd.f32 %v5141_v52, %v4545_v36  ;;  %6041 = vmatmul.msk.bf16.gmra.mxu1 %vm363_vm1, %v3206_v16  ;;  %6069 = vmatmul.msk.bf16.gmra.mxu2 %vm363_vm1, %v3928_v32  ;;  %v4945_v16 = vor.u32 %v4943_v35, %v4941_v40  ;;  %v6850_v32 = vld [vmem:[%s7630_s11 + $0xd8] sm:$0xff]  }
 0x37c   : > { %v3939_v47 = vshrl.u32 %v6850_v32, 16  ;;  %v3942_v40 = vshll.u32 %v6850_v32, 16 }
 0x37d   : > { %v5144_v48 = vpop.f32.mrf.mxu0  ;;  %6098 = vmatmul.msk.bf16.gmra.mxu3 %vm363_vm1, %v7306_v26  ;;  %v5300_v7 = vadd.f32 %v8390_v29, %v5242_v49  ;;  %v4950_v42 = vsel %vm1298_vm3, %v4945_v16, %v4949_v53  ;;  %v8702_v49 = vld [vmem:[%s7630_s11 + $0xd0] sm:$0xff] }
 0x37e   : > { %v4136_v2 = vpop.f32.mrf.mxu2  ;;  %v3944_v37 = vrot.slane %v3942_v40, 4 }
 0x37f   : > { %v5354_v62 = vmax.f32 %v5300_v7, 0.0  ;;  %v4235_v4 = vadd.f32 %v4136_v2, %v3507_v58  ;;  %v3215_v7 = vshrl.u32 %v8668_v18, 16  ;;  %v4951_v18 = vshrl.u32 %v8679_v20, 16 }
 0x380   : > { %6233 = vmatmul.msk.bf16.gmra.mxu0 %vm363_vm1, %v4942_v60  ;;  %v4452_v54 = vpop.f32.mrf.mxu3  ;;  %v3410_v46 = vpop.f32.mrf.mxu1 }
 0x381   : > { %v5442_v23 = vsel %vm5400_vm5, %v5354_v62, 0.0  ;;  %v4546_v29 = vadd.f32 %v4447_v38, %v4235_v4  ;;  %v3508_v52 = vadd.f32 %v3410_v46, %v8108_v9  ;;  %v3219_v62 = vshll.u32 %v8702_v49, 16 }
 0x382   : > { %v6698_v21 = vpack.c.bf16 %v5442_v23, %v5353_v22  ;;  %v3941_v4 = vrot.slane %v3939_v47, 3  ;;  %v3217_v46 = vor.u32 %v3215_v7, %v3213_v17 }
 0x383   : > { %v5243_v51 = vadd.f32 %v5144_v48, %v4546_v29  ;;  %v3221_v14 = vrot.slane %v3219_v62, 1  ;;  %v4955_v29 = vshll.u32 %v8712_v31, 16 }
 0x384   : > { %6989 = vst [vmem:[%s8365_s4 + $0x58] sm:$0xff] %v6698_v21   ;;  %v3945_v23 = vor.u32 %v3944_v37, %v3941_v4  ;;  %v4959_v4 = vshrl.u32 %v8712_v31, 16 }
 0x385   : > { %v5146_v1 = vpop.f32.mrf.mxu0  ;;  %v5301_v3 = vadd.f32 %v8691_v24, %v5243_v51 }
 0x386   : > { %v4138_v30 = vpop.f32.mrf.mxu2  ;;  %v3946_v17 = vsel %vm623_vm2, %v3936_v33, %v3945_v23 }
 0x387   : > { %v4236_v45 = vadd.f32 %v4138_v30, %v3508_v52  ;;  %v5355_v26 = vmax.f32 %v5301_v3, 0.0  ;;  %v4953_v52 = vor.u32 %v4951_v18, %v4949_v53  ;;  %v4957_v30 = vrot.slane %v4955_v29, 1  ;;  %v6851_v3 = vld [vmem:[%s7630_s11 + $0xe0] sm:$0xff]  }
 0x388   : > { %v4454_v38 = vpop.f32.mrf.mxu3  ;;  %v3413_v50 = vpop.f32.mrf.mxu1  ;;  %v3948_v33 = vshrl.u32 %v6851_v3, 16  ;;  %v3951_v53 = vshll.u32 %v6851_v3, 16 }
 0x389   : > { %v4547_v9 = vadd.f32 %v4449_v27, %v4236_v45  ;;  %v3509_v27 = vadd.f32 %v3413_v50, %v8114_v63  ;;  %v5443_v58 = vsel %vm5389_vm4, %v5355_v26, 0.0  ;;  %v7310_v45 = vld [vmem:[%s7630_s11 + $0xdc] sm:$0xff]   ;;  %v4958_v16 = vsel %vm1298_vm3, %v4953_v52, %v4957_v30 }
 0x38b   : > { %v5244_v6 = vadd.f32 %v5146_v1, %v4547_v9  ;;  %6042 = vmatmul.msk.bf16.gmra.mxu1 %vm363_vm1, %v3214_v11  ;;  %6070 = vmatmul.msk.bf16.gmra.mxu2 %vm363_vm1, %v3937_v56 }
 0x38d   : > { %v5149_v36 = vpop.f32.mrf.mxu0  ;;  %6099 = vmatmul.msk.bf16.gmra.mxu3 %vm363_vm1, %v7308_v10  ;;  %v5302_v5 = vadd.f32 %v8691_v24, %v5244_v6 }
 0x38e   : > { %v4141_v48 = vpop.f32.mrf.mxu2 }
 0x38f   : > { %v5356_v60 = vmax.f32 %v5302_v5, 0.0  ;;  %v4237_v55 = vadd.f32 %v4141_v48, %v3509_v27  ;;  %v3950_v5 = vrot.slane %v3948_v33, 3  ;;  %v3953_v27 = vrot.slane %v3951_v53, 4  ;;  %v8736_v48 = vld [vmem:[%s7630_s11 + $0xe4] sm:$0xff] }
 0x390   : > { %6234 = vmatmul.msk.bf16.gmra.mxu0 %vm363_vm1, %v4950_v42  ;;  %v4457_v43 = vpop.f32.mrf.mxu3  ;;  %v3415_v2 = vpop.f32.mrf.mxu1  ;;  %v4963_v37 = vshll.u32 %v8736_v48, 16 }
 0x391   : > { %v6703_v22 = vpack.c.bf16 %v5356_v60, %v5443_v58  ;;  %v4548_v63 = vadd.f32 %v4452_v54, %v4237_v55  ;;  %v3510_v34 = vadd.f32 %v3415_v2, %v8124_v25  ;;  %v3222_v54 = vsel %vm1298_vm3, %v3217_v46, %v3221_v14  ;;  %v8726_v25 = vld [vmem:[%s7630_s11 + $0xd8] sm:$0xff] }
 0x392   : > { %v3227_v42 = vshll.u32 %v8726_v25, 16  ;;  %v3954_v62 = vor.u32 %v3953_v27, %v3950_v5  ;;  %v4967_v5 = vshrl.u32 %v8736_v48, 16  ;;  %v8778_v48 = vld [vmem:[%s7630_s11 + $0xe8] sm:$0xff] }
 0x393   : > { %6990 = vst [vmem:[%s8365_s4 + $0x60] sm:$0xff] %v6703_v22   ;;  %v5245_v21 = vadd.f32 %v5149_v36, %v4548_v63  ;;  %v3223_v36 = vshrl.u32 %v8702_v49, 16 }
 0x394   : > { %v3229_v58 = vrot.slane %v3227_v42, 1 }
 0x395   : > { %v5151_v8 = vpop.f32.mrf.mxu0  ;;  %v5303_v11 = vadd.f32 %v8691_v24, %v5245_v21  ;;  %v3225_v7 = vor.u32 %v3223_v36, %v3221_v14  ;;  %v3955_v21 = vsel %vm623_vm2, %v3945_v23, %v3954_v62 }
 0x396   : > { %v4143_v51 = vpop.f32.mrf.mxu2 }
 0x397   : > { %v4238_v1 = vadd.f32 %v4143_v51, %v3510_v34  ;;  %v5357_v10 = vmax.f32 %v5303_v11, 0.0  ;;  %v4965_v34 = vrot.slane %v4963_v37, 1  ;;  %v7312_v51 = vld [vmem:[%s7630_s11 + $0xe4] sm:$0xff]  }
 0x398   : > { %v4459_v35 = vpop.f32.mrf.mxu3  ;;  %v3418_v61 = vpop.f32.mrf.mxu1 }
 0x399   : > { %v4549_v20 = vadd.f32 %v4454_v38, %v4238_v1  ;;  %v3511_v38 = vadd.f32 %v3418_v61, %v8130_v57  ;;  %v5445_v60 = vsel %vm5400_vm5, %v5357_v10, 0.0  ;;  %v6852_v61 = vld [vmem:[%s7630_s11 + $0xe8] sm:$0xff]   ;;  %v4969_v37 = vor.u32 %v4967_v5, %v4965_v34 }
 0x39a   : > { %v3957_v23 = vshrl.u32 %v6852_v61, 16 }
 0x39b   : > { %v5246_v50 = vadd.f32 %v5151_v8, %v4549_v20  ;;  %6043 = vmatmul.msk.bf16.gmra.mxu1 %vm363_vm1, %v3222_v54  ;;  %6071 = vmatmul.msk.bf16.gmra.mxu2 %vm363_vm1, %v3946_v17  ;;  %v3230_v8 = vsel %vm1298_vm3, %v3225_v7, %v3229_v58 }
 0x39c   : > { %v3959_v10 = vrot.slane %v3957_v23, 3 }
 0x39d   : > { %v5154_v56 = vpop.f32.mrf.mxu0  ;;  %6100 = vmatmul.msk.bf16.gmra.mxu3 %vm363_vm1, %v7310_v45  ;;  %v5304_v9 = vadd.f32 %v8691_v24, %v5246_v50 }
 0x39e   : > { %v4146_v32 = vpop.f32.mrf.mxu2 }
 0x39f   : > { %v5358_v6 = vmax.f32 %v5304_v9, 0.0  ;;  %v4239_v47 = vadd.f32 %v4146_v32, %v3511_v38  ;;  %v8764_v38 = vld [vmem:[%s7630_s11 + $0xec] sm:$0xff] }
 0x3a0   : > { %6235 = vmatmul.msk.bf16.gmra.mxu0 %vm363_vm1, %v4958_v16  ;;  %v4462_v26 = vpop.f32.mrf.mxu3  ;;  %v3420_v40 = vpop.f32.mrf.mxu1  ;;  %v4971_v27 = vshll.u32 %v8764_v38, 16 }
 0x3a1   : > { %v5446_v57 = vsel %vm5389_vm4, %v5358_v6, 0.0  ;;  %v4550_v49 = vadd.f32 %v4457_v43, %v4239_v47  ;;  %v3512_v22 = vadd.f32 %v3420_v40, %v8140_v15  ;;  %v4961_v43 = vor.u32 %v4959_v4, %v4957_v30  ;;  %v8753_v15 = vld [vmem:[%s7630_s11 + $0xe0] sm:$0xff] }
 0x3a2   : > { %v6708_v55 = vpack.c.bf16 %v5446_v57, %v5445_v60  ;;  %v3960_v30 = vshll.u32 %v6852_v61, 16  ;;  %v3235_v16 = vshll.u32 %v8753_v15, 16  ;;  %v8983_v60 = vld [vmem:[#allocation20_spill] sm:$0xff]  ;;  %v3239_v61 = vshrl.u32 %v8753_v15, 16  ;;  %v3591_v15 = vld [vmem:[%s7630_s11 + $0xf8] sm:$0xf] }
 0x3a3   : > { %v5247_v14 = vadd.f32 %v5154_v56, %v4550_v49  ;;  %v4966_v52 = vsel %vm1298_vm3, %v4961_v43, %v4965_v34  ;;  %v3231_v56 = vshrl.u32 %v8726_v25, 16 }
 0x3a4   : > { %6991 = vst [vmem:[%s8365_s4 + $0x68] sm:$0xff] %v6708_v55   ;;  %v3962_v9 = vrot.slane %v3960_v30, 4  ;;  %v3237_v42 = vrot.slane %v3235_v16, 1 }
 0x3a5   : > { %v5156_v2 = vpop.f32.mrf.mxu0  ;;  %v5305_v54 = vadd.f32 %v8691_v24, %v5247_v14  ;;  %v3233_v36 = vor.u32 %v3231_v56, %v3229_v58 }
 0x3a6   : > { %v4148_v63 = vpop.f32.mrf.mxu2  ;;  %v3963_v40 = vor.u32 %v3962_v9, %v3959_v10 }
 0x3a7   : > { %v4240_v46 = vadd.f32 %v4148_v63, %v3512_v22  ;;  %v5359_v33 = vmax.f32 %v5305_v54, 0.0  ;;  %v4973_v22 = vrot.slane %v4971_v27, 1  ;;  %v7313_v63 = vld [vmem:[%s7630_s11 + $0xec] sm:$0xff]  }
 0x3a8   : > { %v4464_v18 = vpop.f32.mrf.mxu3  ;;  %v3423_v29 = vpop.f32.mrf.mxu1  ;;  %v3964_v4 = vsel %vm623_vm2, %v3954_v62, %v3963_v40 }
 0x3a9   : > { %v4551_v1 = vadd.f32 %v4459_v35, %v4240_v46  ;;  %v3513_v45 = vadd.f32 %v3423_v29, %v8152_v19  ;;  %v6853_v46 = vld [vmem:[%s7630_s11 + $0xf0] sm:$0xff]  }
 0x3aa   : > { %v3966_v29 = vshrl.u32 %v6853_v46, 16  ;;  %v6639_v9 = vunpack.c.h.b16 %v6853_v46 }
 0x3ab   : > { %v5248_v31 = vadd.f32 %v5156_v2, %v4551_v1  ;;  %6044 = vmatmul.msk.bf16.gmra.mxu1 %vm363_vm1, %v3230_v8  ;;  %6072 = vmatmul.msk.bf16.gmra.mxu2 %vm363_vm1, %v3955_v21  ;;  %v3969_v21 = vshll.u32 %v6853_v46, 16  ;;  %v4974_v1 = vsel %vm1298_vm3, %v4969_v37, %v4973_v22 }
 0x3ac   : > { %v3968_v23 = vrot.slane %v3966_v29, 3 }
 0x3ad   : > { %v5159_v17 = vpop.f32.mrf.mxu0  ;;  %6101 = vmatmul.msk.bf16.gmra.mxu3 %vm363_vm1, %v7312_v51  ;;  %v5306_v35 = vadd.f32 %v8691_v24, %v5248_v31  ;;  %v3243_v31 = vshll.u32 %v8778_v48, 16  ;;  %v3971_v30 = vrot.slane %v3969_v21, 4 }
 0x3ae   : > { %v4151_v11 = vpop.f32.mrf.mxu2 }
 0x3af   : > { %v5360_v20 = vmax.f32 %v5306_v35, 0.0  ;;  %v4241_v3 = vadd.f32 %v4151_v11, %v3513_v45  ;;  %v3245_v56 = vrot.slane %v3243_v31, 1  ;;  %v8798_v16 = vor.u32 %v3971_v30, %v3968_v23 }
 0x3b0   : > { %6236 = vmatmul.msk.bf16.gmra.mxu0 %vm363_vm1, %v4966_v52  ;;  %v4467_v50 = vpop.f32.mrf.mxu3  ;;  %v3425_v53 = vpop.f32.mrf.mxu1 }
 0x3b1   : > { %v5448_v19 = vsel %vm5400_vm5, %v5360_v20, 0.0  ;;  %v4552_v32 = vadd.f32 %v4462_v26, %v4241_v3  ;;  %v3514_v57 = vadd.f32 %v3425_v53, %v8983_v60  ;;  %v3238_v26 = vsel %vm1298_vm3, %v3233_v36, %v3237_v42 }
 0x3b2   : > { %v6713_v6 = vpack.c.bf16 %v5448_v19, %v5359_v33  ;;  %v3241_v3 = vor.u32 %v3239_v61, %v3237_v42  ;;  %v4975_v53 = vshrl.u32 %v8764_v38, 16  ;;  %v3703_v19 = vunpack.c.l.b16 %v3591_v15 }
 0x3b3   : > { %v5249_v47 = vadd.f32 %v5159_v17, %v4552_v32  ;;  %v2894_v32 = vld [vmem:[%s7630_s11 + $0xf0] sm:$0x1]  ;;  %v3973_v42 = vsel %vm623_vm2, %v3963_v40, %v8798_v16 }
 0x3b4   : > { %6992 = vst [vmem:[%s8365_s4 + $0x70] sm:$0xff] %v6713_v6   ;;  %v3006_v27 = vunpack.c.l.b16 %v2894_v32  ;;  %v4977_v38 = vor.u32 %v4975_v53, %v4973_v22 }
 0x3b5   : > { %v5161_v25 = vpop.f32.mrf.mxu0  ;;  %v5307_v58 = vadd.f32 %v8691_v24, %v5249_v47 }
 0x3b6   : > { %v4153_v55 = vpop.f32.mrf.mxu2 }
 0x3b7   : > { %v4242_v7 = vadd.f32 %v4153_v55, %v3514_v57  ;;  %v5361_v43 = vmax.f32 %v5307_v58, 0.0  ;;  %v3731_v55 = vpack.c.b16 %v3703_v19, %v3703_v19 }
 0x3b8   : > { %v4469_v49 = vpop.f32.mrf.mxu3  ;;  %v3428_v2 = vpop.f32.mrf.mxu1 }
 0x3b9   : > { %v4553_v8 = vadd.f32 %v4464_v18, %v4242_v7  ;;  %v3515_v18 = vadd.f32 %v3428_v2, %v8173_v13  ;;  %v5449_v35 = vsel %vm5389_vm4, %v5361_v43, 0.0  ;;  %v8794_v13 = vld [vmem:[%s7630_s11 + $0xf4] sm:$0xff]  ;;  %v4293_v7 = vpack.c.b16 %v3703_v19, %v6639_v9  ;;  %v4630_v2 = vld [vmem:[%s7630_s11 + $0xfc] sm:$0x1] }
 0x3ba   : > { %v4979_v10 = vshll.u32 %v8794_v13, 16  ;;  %v3978_v22 = vshll.u32 %v3731_v55, 16  ;;  %v4742_v46 = vunpack.c.l.b16 %v4630_v2 }
 0x3bb   : > { %v5250_v14 = vadd.f32 %v5161_v25, %v4553_v8  ;;  %6045 = vmatmul.msk.bf16.gmra.mxu1 %vm363_vm1, %v3238_v26  ;;  %6073 = vmatmul.msk.bf16.gmra.mxu2 %vm363_vm1, %v3964_v4  ;;  %v3246_v25 = vsel %vm1298_vm3, %v3241_v3, %v3245_v56 }
 0x3bc   : > { %v4981_v57 = vrot.slane %v4979_v10, 1  ;;  %v3980_v61 = vrot.slane %v3978_v22, 4  ;;  %v4770_v31 = vpack.c.b16 %v4742_v46, %v4742_v46 }
 0x3bd   : > { %v5164_v51 = vpop.f32.mrf.mxu0  ;;  %6102 = vmatmul.msk.bf16.gmra.mxu3 %vm363_vm1, %v7313_v63  ;;  %v5308_v62 = vadd.f32 %v8691_v24, %v5250_v14  ;;  %v3975_v63 = vshrl.u32 %v3731_v55, 16 }
 0x3be   : > { %v4156_v34 = vpop.f32.mrf.mxu2  ;;  %v4982_v40 = vsel %vm1298_vm3, %v4977_v38, %v4981_v57 }
 0x3bf   : > { %v5362_v54 = vmax.f32 %v5308_v62, 0.0  ;;  %v4243_v17 = vadd.f32 %v4156_v34, %v3515_v18  ;;  %v3977_v34 = vrot.slane %v3975_v63, 3 }
 0x3c0   : > { %6237 = vmatmul.msk.bf16.gmra.mxu0 %vm363_vm1, %v4974_v1  ;;  %v8789_v52 = vpop.f32.mrf.mxu3  ;;  %v3430_v45 = vpop.f32.mrf.mxu1 }
 0x3c1   : > { %v6718_v11 = vpack.c.bf16 %v5362_v54, %v5449_v35  ;;  %v4554_v20 = vadd.f32 %v4467_v50, %v4243_v17  ;;  %v3516_v36 = vadd.f32 %v3430_v45, %v8184_v28  ;;  %v3034_v28 = vpack.c.b16 %v3006_v27, %v3006_v27 }
 0x3c3   : > { %6993 = vst [vmem:[%s8365_s4 + $0x78] sm:$0xff] %v6718_v11   ;;  %v5251_v6 = vadd.f32 %v5164_v51, %v4554_v20  ;;  %v3247_v51 = vshrl.u32 %v8778_v48, 16  ;;  %v3251_v1 = vshll.u32 %v3034_v28, 16  ;;  %v3981_v48 = vor.u32 %v3980_v61, %v3977_v34 }
 0x3c4   : > { %v4983_v11 = vshrl.u32 %v8794_v13, 16  ;;  %v4987_v20 = vshll.u32 %v4770_v31, 16 }
 0x3c5   : > { %v5166_v33 = vpop.f32.mrf.mxu0  ;;  %v5309_v26 = vadd.f32 %v8691_v24, %v5251_v6  ;;  %v3249_v23 = vor.u32 %v3247_v51, %v3245_v56  ;;  %v3253_v30 = vrot.slane %v3251_v1, 1  ;;  %v3982_v56 = vsel %vm623_vm2, %v8798_v16, %v3981_v48 }
 0x3c6   : > { %v4158_v47 = vpop.f32.mrf.mxu2  ;;  %v4985_v32 = vor.u32 %v4983_v11, %v4981_v57  ;;  %v4989_v6 = vrot.slane %v4987_v20, 1 }
 0x3c7   : > { %v4244_v50 = vadd.f32 %v4158_v47, %v3516_v36  ;;  %v5363_v8 = vmax.f32 %v5309_v26, 0.0  ;;  %v3254_v53 = vsel %vm1298_vm3, %v3249_v23, %v3253_v30 }
 0x3c8   : > { %v4474_v5 = vpop.f32.mrf.mxu3  ;;  %v3433_v60 = vpop.f32.mrf.mxu1  ;;  %v4990_v47 = vsel %vm1298_vm3, %v4985_v32, %v4989_v6 }
 0x3c9   : > { %v4555_v58 = vadd.f32 %v4469_v49, %v4244_v50  ;;  %v3517_v49 = vadd.f32 %v3433_v60, %v8194_v41  ;;  %v5451_v54 = vsel %vm5400_vm5, %v5363_v8, 0.0 }
 0x3cb   : > { %v5252_v4 = vadd.f32 %v5166_v33, %v4555_v58  ;;  %6046 = vmatmul.msk.bf16.gmra.mxu1 %vm363_vm1, %v3246_v25  ;;  %6074 = vmatmul.msk.bf16.gmra.mxu2 %vm363_vm1, %v3973_v42 }
 0x3cd   : > { %v5169_v37 = vpop.f32.mrf.mxu0  ;;  %6103 = vmatmul.msk.bf16.gmra.mxu3 %vm363_vm1, %v4293_v7  ;;  %v5310_v14 = vadd.f32 %v8691_v24, %v5252_v4 }
 0x3ce   : > { %v4161_v29 = vpop.f32.mrf.mxu2 }
 0x3cf   : > { %v5364_v21 = vmax.f32 %v5310_v14, 0.0  ;;  %v4245_v62 = vadd.f32 %v4161_v29, %v3517_v49  ;;  %v8984_v49 = vld [vmem:[#allocation14_spill] sm:$0xff] }
 0x3d0   : > { %6238 = vmatmul.msk.bf16.gmra.mxu0 %vm363_vm1, %v4982_v40  ;;  %v4477_v43 = vpop.f32.mrf.mxu3  ;;  %v3435_v18 = vpop.f32.mrf.mxu1 }
 0x3d1   : > { %v5452_v41 = vsel %vm5389_vm4, %v5364_v21, 0.0  ;;  %v4556_v35 = vadd.f32 %v8789_v52, %v4245_v62  ;;  %v3518_v15 = vadd.f32 %v3435_v18, %v8205_v44 }
 0x3d2   : > { %v6723_v17 = vpack.c.bf16 %v5452_v41, %v5451_v54  ;;  %v8985_v54 = vld [vmem:[#allocation15_spill] sm:$0xff] }
 0x3d3   : > { %v5253_v9 = vadd.f32 %v5169_v37, %v4556_v35 }
 0x3d4   : > { %6994 = vst [vmem:[%s8365_s4 + $0x80] sm:$0xff] %v6723_v17  }
 0x3d5   : > { %v5171_v45 = vpop.f32.mrf.mxu0  ;;  %v5311_v44 = vadd.f32 %v8691_v24, %v5253_v9 }
 0x3d6   : > { %v4163_v3 = vpop.f32.mrf.mxu2 }
 0x3d7   : > { %v4246_v33 = vadd.f32 %v4163_v3, %v3518_v15  ;;  %v5365_v60 = vmax.f32 %v5311_v44, 0.0 }
 0x3d8   : > { %v4479_v10 = vpop.f32.mrf.mxu3  ;;  %v3438_v19 = vpop.f32.mrf.mxu1 }
 0x3d9   : > { %v4557_v52 = vadd.f32 %v4474_v5, %v4246_v33  ;;  %v3519_v25 = vadd.f32 %v3438_v19, %v8214_v0  ;;  %v8986_v33 = vld [vmem:[#allocation16_spill] sm:$0xff] }
 0x3db   : > { %v5254_v36 = vadd.f32 %v5171_v45, %v4557_v52  ;;  %6047 = vmatmul.msk.bf16.gmra.mxu1 %vm363_vm1, %v3254_v53  ;;  %6075 = vmatmul.msk.bf16.gmra.mxu2 %vm363_vm1, %v3982_v56 }
 0x3dd   : > { %v5174_v13 = vpop.f32.mrf.mxu0  ;;  %v5312_v50 = vadd.f32 %v8691_v24, %v5254_v36 }
 0x3de   : > { %v4166_v42 = vpop.f32.mrf.mxu2 }
 0x3df   : > { %v5366_v16 = vmax.f32 %v5312_v50, 0.0  ;;  %v4247_v5 = vadd.f32 %v4166_v42, %v3519_v25 }
 0x3e0   : > { %6239 = vmatmul.msk.bf16.gmra.mxu0 %vm363_vm1, %v4990_v47  ;;  %v4482_v27 = vpop.f32.mrf.mxu3  ;;  %v3440_v38 = vpop.f32.mrf.mxu1  ;;  %v8987_v47 = vld [vmem:[#allocation17_spill] sm:$0xff] }
 0x3e1   : > { %v5454_v57 = vsel %vm5400_vm5, %v5366_v16, 0.0  ;;  %v4558_v55 = vadd.f32 %v4477_v43, %v4247_v5  ;;  %v3520_v2 = vadd.f32 %v3440_v38, %v8223_v59 }
 0x3e2   : > { %v6728_v7 = vpack.c.bf16 %v5454_v57, %v5365_v60 }
 0x3e3   : > { %v5255_v26 = vadd.f32 %v5174_v13, %v4558_v55 }
 0x3e4   : > { %6995 = vst [vmem:[%s8365_s4 + $0x88] sm:$0xff] %v6728_v7  }
 0x3e5   : > { %v5176_v58 = vpop.f32.mrf.mxu0  ;;  %v5313_v37 = vadd.f32 %v8691_v24, %v5255_v26  ;;  %v8988_v26 = vld [vmem:[#allocation18_spill] sm:$0xff] }
 0x3e6   : > { %v4168_v4 = vpop.f32.mrf.mxu2 }
 0x3e7   : > { %v4248_v0 = vadd.f32 %v4168_v4, %v3520_v2  ;;  %v5367_v46 = vmax.f32 %v5313_v37, 0.0 }
 0x3e8   : > { %v4484_v28 = vpop.f32.mrf.mxu3  ;;  %v3443_v40 = vpop.f32.mrf.mxu1 }
 0x3e9   : > { %v4559_v63 = vadd.f32 %v4479_v10, %v4248_v0  ;;  %v3521_v29 = vadd.f32 %v3443_v40, %v8984_v49  ;;  %v5455_v59 = vsel %vm5389_vm4, %v5367_v46, 0.0  ;;  %v8989_v49 = vld [vmem:[#allocation5_spill] sm:$0xff] }
 0x3eb   : > { %v5256_v22 = vadd.f32 %v5176_v58, %v4559_v63 }
 0x3ed   : > { %v5179_v8 = vpop.f32.mrf.mxu0  ;;  %v5314_v14 = vadd.f32 %v8691_v24, %v5256_v22 }
 0x3ee   : > { %v4171_v21 = vpop.f32.mrf.mxu2 }
 0x3ef   : > { %v5368_v43 = vmax.f32 %v5314_v14, 0.0  ;;  %v4249_v51 = vadd.f32 %v4171_v21, %v3521_v29 }
 0x3f0   : > { %v4487_v1 = vpop.f32.mrf.mxu3  ;;  %v3445_v62 = vpop.f32.mrf.mxu1 }
 0x3f1   : > { %v6733_v18 = vpack.c.bf16 %v5368_v43, %v5455_v59  ;;  %v4560_v34 = vadd.f32 %v4482_v27, %v4249_v51  ;;  %v3522_v41 = vadd.f32 %v3445_v62, %v8985_v54  ;;  %v8990_v54 = vld [vmem:[#allocation6_spill] sm:$0xff] }
 0x3f3   : > { %6996 = vst [vmem:[%s8365_s4 + $0x90] sm:$0xff] %v6733_v18   ;;  %v5257_v31 = vadd.f32 %v5179_v8, %v4560_v34 }
 0x3f5   : > { %v5181_v61 = vpop.f32.mrf.mxu0  ;;  %v5315_v45 = vadd.f32 %v8691_v24, %v5257_v31 }
 0x3f6   : > { %v4173_v17 = vpop.f32.mrf.mxu2 }
 0x3f7   : > { %v4250_v23 = vadd.f32 %v4173_v17, %v3522_v41  ;;  %v5369_v15 = vmax.f32 %v5315_v45, 0.0 }
 0x3f8   : > { %v4489_v30 = vpop.f32.mrf.mxu3  ;;  %v3448_v35 = vpop.f32.mrf.mxu1 }
 0x3f9   : > { %v4561_v48 = vadd.f32 %v4484_v28, %v4250_v23  ;;  %v3523_v53 = vadd.f32 %v3448_v35, %v8986_v33  ;;  %v5457_v6 = vsel %vm5400_vm5, %v5369_v15, 0.0  ;;  %v8991_v33 = vld [vmem:[#allocation7_spill] sm:$0xff] }
 0x3fb   : > { %v5258_v11 = vadd.f32 %v5181_v61, %v4561_v48 }
 0x3fd   : > { %v5184_v20 = vpop.f32.mrf.mxu0  ;;  %v5316_v3 = vadd.f32 %v8691_v24, %v5258_v11 }
 0x3fe   : > { %v4176_v10 = vpop.f32.mrf.mxu2 }
 0x3ff   : > { %v5370_v9 = vmax.f32 %v5316_v3, 0.0  ;;  %v4251_v56 = vadd.f32 %v4176_v10, %v3523_v53 }
 0x400   : > { %v4492_v19 = vpop.f32.mrf.mxu3  ;;  %v3450_v32 = vpop.f32.mrf.mxu1 }
 0x401   : > { %v5458_v52 = vsel %vm5389_vm4, %v5370_v9, 0.0  ;;  %v4562_v44 = vadd.f32 %v4487_v1, %v4251_v56  ;;  %v3524_v50 = vadd.f32 %v3450_v32, %v8987_v47  ;;  %v8992_v47 = vld [vmem:[#allocation8_spill] sm:$0xff] }
 0x402   : > { %v6738_v36 = vpack.c.bf16 %v5458_v52, %v5457_v6 }
 0x403   : > { %v5259_v5 = vadd.f32 %v5184_v20, %v4562_v44 }
 0x404   : > { %6997 = vst [vmem:[%s8365_s4 + $0x98] sm:$0xff] %v6738_v36  }
 0x405   : > { %v5186_v13 = vpop.f32.mrf.mxu0  ;;  %v5317_v57 = vadd.f32 %v8691_v24, %v5259_v5 }
 0x406   : > { %v4178_v25 = vpop.f32.mrf.mxu2 }
 0x407   : > { %v4252_v42 = vadd.f32 %v4178_v25, %v3524_v50  ;;  %v5371_v37 = vmax.f32 %v5317_v57, 0.0 }
 0x408   : > { %v4494_v16 = vpop.f32.mrf.mxu3  ;;  %v3453_v27 = vpop.f32.mrf.mxu1 }
 0x409   : > { %v4563_v60 = vadd.f32 %v4489_v30, %v4252_v42  ;;  %v3525_v58 = vadd.f32 %v3453_v27, %v8988_v26  ;;  %v8993_v26 = vld [vmem:[#allocation9_spill] sm:$0xff] }
 0x40b   : > { %v5260_v38 = vadd.f32 %v5186_v13, %v4563_v60 }
 0x40d   : > { %v5189_v55 = vpop.f32.mrf.mxu0  ;;  %v5318_v7 = vadd.f32 %v8691_v24, %v5260_v38 }
 0x40e   : > { %v4181_v2 = vpop.f32.mrf.mxu2 }
 0x40f   : > { %v5372_v4 = vmax.f32 %v5318_v7, 0.0  ;;  %v4253_v0 = vadd.f32 %v4181_v2, %v3525_v58 }
 0x410   : > { %v4497_v28 = vpop.f32.mrf.mxu3  ;;  %v3455_v40 = vpop.f32.mrf.mxu1 }
 0x411   : > { %v5460_v63 = vsel %vm5400_vm5, %v5372_v4, 0.0  ;;  %v4564_v22 = vadd.f32 %v4492_v19, %v4253_v0  ;;  %v3526_v29 = vadd.f32 %v3455_v40, %v8989_v49 }
 0x412   : > { %v6743_v46 = vpack.c.bf16 %v5460_v63, %v5371_v37 }
 0x413   : > { %v5261_v8 = vadd.f32 %v5189_v55, %v4564_v22 }
 0x414   : > { %6998 = vst [vmem:[%s8365_s4 + $0xa0] sm:$0xff] %v6743_v46  }
 0x415   : > { %v5191_v14 = vpop.f32.mrf.mxu0  ;;  %v5319_v1 = vadd.f32 %v8691_v24, %v5261_v8 }
 0x416   : > { %v4183_v21 = vpop.f32.mrf.mxu2 }
 0x417   : > { %v4254_v43 = vadd.f32 %v4183_v21, %v3526_v29  ;;  %v5373_v34 = vmax.f32 %v5319_v1, 0.0 }
 0x418   : > { %v4499_v51 = vpop.f32.mrf.mxu3  ;;  %v3458_v59 = vpop.f32.mrf.mxu1 }
 0x419   : > { %v4565_v62 = vadd.f32 %v4494_v16, %v4254_v43  ;;  %v3527_v41 = vadd.f32 %v3458_v59, %v8990_v54  ;;  %v5461_v45 = vsel %vm5389_vm4, %v5373_v34, 0.0  ;;  %v8995_v54 = vld [vmem:[#allocation11_spill] sm:$0xff] }
 0x41b   : > { %v5262_v18 = vadd.f32 %v5191_v14, %v4565_v62  ;;  %v8994_v14 = vld [vmem:[#allocation10_spill] sm:$0xff] }
 0x41d   : > { %v5194_v61 = vpop.f32.mrf.mxu0  ;;  %v5320_v31 = vadd.f32 %v8691_v24, %v5262_v18 }
 0x41e   : > { %v4186_v17 = vpop.f32.mrf.mxu2 }
 0x41f   : > { %v5374_v23 = vmax.f32 %v5320_v31, 0.0  ;;  %v4255_v30 = vadd.f32 %v4186_v17, %v3527_v41 }
 0x420   : > { %v4502_v35 = vpop.f32.mrf.mxu3  ;;  %v3460_v48 = vpop.f32.mrf.mxu1 }
 0x421   : > { %v6748_v11 = vpack.c.bf16 %v5374_v23, %v5461_v45  ;;  %v4566_v20 = vadd.f32 %v4497_v28, %v4255_v30  ;;  %v3528_v53 = vadd.f32 %v3460_v48, %v8991_v33  ;;  %v7534_v23 = vmov 0  }
 0x422   : > { %5581 = vst [vmem:[%s8365_s4 + $0xd8] sm:$0xf] %v7534_v23 }
 0x423   : > { %6999 = vst [vmem:[%s8365_s4 + $0xa8] sm:$0xff] %v6748_v11   ;;  %v5263_v3 = vadd.f32 %v5194_v61, %v4566_v20 }
 0x425   : > { %v5196_v15 = vpop.f32.mrf.mxu0  ;;  %v5321_v32 = vadd.f32 %v8691_v24, %v5263_v3 }
 0x426   : > { %v4188_v10 = vpop.f32.mrf.mxu2 }
 0x427   : > { %v4256_v9 = vadd.f32 %v4188_v10, %v3528_v53  ;;  %v5375_v44 = vmax.f32 %v5321_v32, 0.0  ;;  %v8996_v53 = vld [vmem:[#allocation12_spill] sm:$0xff] }
 0x428   : > { %v4504_v19 = vpop.f32.mrf.mxu3  ;;  %v3463_v56 = vpop.f32.mrf.mxu1 }
 0x429   : > { %v4567_v6 = vadd.f32 %v4499_v51, %v4256_v9  ;;  %v3529_v50 = vadd.f32 %v3463_v56, %v8992_v47  ;;  %v5463_v60 = vsel %vm5400_vm5, %v5375_v44, 0.0 }
 0x42b   : > { %v5264_v52 = vadd.f32 %v5196_v15, %v4567_v6 }
 0x42d   : > { %v5199_v36 = vpop.f32.mrf.mxu0  ;;  %v5322_v13 = vadd.f32 %v8691_v24, %v5264_v52 }
 0x42e   : > { %v4191_v25 = vpop.f32.mrf.mxu2 }
 0x42f   : > { %v5376_v42 = vmax.f32 %v5322_v13, 0.0  ;;  %v4257_v5 = vadd.f32 %v4191_v25, %v3529_v50 }
 0x430   : > { %v4507_v16 = vpop.f32.mrf.mxu3  ;;  %v3465_v27 = vpop.f32.mrf.mxu1 }
 0x431   : > { %v5464_v38 = vsel %vm5389_vm4, %v5376_v42, 0.0  ;;  %v4568_v55 = vadd.f32 %v4502_v35, %v4257_v5  ;;  %v3530_v58 = vadd.f32 %v3465_v27, %v8993_v26  ;;  %v8997_v27 = vld [vmem:[#allocation13_spill] sm:$0xff] }
 0x432   : > { %v6753_v57 = vpack.c.bf16 %v5464_v38, %v5463_v60 }
 0x433   : > { %v5265_v28 = vadd.f32 %v5199_v36, %v4568_v55 }
 0x434   : > { %7000 = vst [vmem:[%s8365_s4 + $0xb0] sm:$0xff] %v6753_v57  }
 0x435   : > { %v5201_v7 = vpop.f32.mrf.mxu0  ;;  %v5323_v22 = vadd.f32 %v8691_v24, %v5265_v28 }
 0x436   : > { %v4193_v2 = vpop.f32.mrf.mxu2 }
 0x437   : > { %v4258_v4 = vadd.f32 %v4193_v2, %v3530_v58  ;;  %v5377_v1 = vmax.f32 %v5323_v22, 0.0 }
 0x438   : > { %v4509_v0 = vpop.f32.mrf.mxu3  ;;  %v3468_v37 = vpop.f32.mrf.mxu1 }
 0x439   : > { %v4569_v40 = vadd.f32 %v4504_v19, %v4258_v4  ;;  %v3531_v49 = vadd.f32 %v3468_v37, %v8994_v14 }
 0x43b   : > { %v5266_v63 = vadd.f32 %v5201_v7, %v4569_v40 }
 0x43d   : > { %v5204_v46 = vpop.f32.mrf.mxu0  ;;  %v5324_v8 = vadd.f32 %v8691_v24, %v5266_v63 }
 0x43e   : > { %v4196_v29 = vpop.f32.mrf.mxu2 }
 0x43f   : > { %v5378_v21 = vmax.f32 %v5324_v8, 0.0  ;;  %v4259_v43 = vadd.f32 %v4196_v29, %v3531_v49 }
 0x440   : > { %v4512_v51 = vpop.f32.mrf.mxu3  ;;  %v3470_v59 = vpop.f32.mrf.mxu1 }
 0x441   : > { %v5466_v62 = vsel %vm5400_vm5, %v5378_v21, 0.0  ;;  %v4570_v18 = vadd.f32 %v4507_v16, %v4259_v43  ;;  %v3532_v41 = vadd.f32 %v3470_v59, %v8995_v54 }
 0x442   : > { %v6758_v34 = vpack.c.bf16 %v5466_v62, %v5377_v1 }
 0x443   : > { %v5267_v61 = vadd.f32 %v5204_v46, %v4570_v18 }
 0x444   : > { %7001 = vst [vmem:[%s8365_s4 + $0xb8] sm:$0xff] %v6758_v34  }
 0x445   : > { %v5206_v31 = vpop.f32.mrf.mxu0  ;;  %v5325_v45 = vadd.f32 %v8691_v24, %v5267_v61 }
 0x446   : > { %v4198_v17 = vpop.f32.mrf.mxu2 }
 0x447   : > { %v4260_v30 = vadd.f32 %v4198_v17, %v3532_v41  ;;  %v5379_v15 = vmax.f32 %v5325_v45, 0.0 }
 0x448   : > { %v4514_v35 = vpop.f32.mrf.mxu3  ;;  %v3473_v48 = vpop.f32.mrf.mxu1 }
 0x449   : > { %v4571_v11 = vadd.f32 %v4509_v0, %v4260_v30  ;;  %v3533_v10 = vadd.f32 %v3473_v48, %v8996_v53  ;;  %v5467_v6 = vsel %vm5389_vm4, %v5379_v15, 0.0 }
 0x44b   : > { %v5268_v20 = vadd.f32 %v5206_v31, %v4571_v11 }
 0x44d   : > { %v5209_v3 = vpop.f32.mrf.mxu0  ;;  %v5326_v33 = vadd.f32 %v8691_v24, %v5268_v20 }
 0x44e   : > { %v4201_v9 = vpop.f32.mrf.mxu2 }
 0x44f   : > { %v5380_v19 = vmax.f32 %v5326_v33, 0.0  ;;  %v4261_v56 = vadd.f32 %v4201_v9, %v3533_v10 }
 0x450   : > { %v4517_v32 = vpop.f32.mrf.mxu3  ;;  %v3475_v52 = vpop.f32.mrf.mxu1 }
 0x451   : > { %v6763_v36 = vpack.c.bf16 %v5380_v19, %v5467_v6  ;;  %v4572_v44 = vadd.f32 %v4512_v51, %v4261_v56 }
 0x453   : > { %7002 = vst [vmem:[%s8365_s4 + $0xc0] sm:$0xff] %v6763_v36   ;;  %v5269_v13 = vadd.f32 %v5209_v3, %v4572_v44 }
 0x455   : > { %v5211_v47 = vpop.f32.mrf.mxu0  ;;  %v5327_v50 = vadd.f32 %v8691_v24, %v5269_v13 }
 0x456   : > { %v4203_v25 = vpop.f32.mrf.mxu2 }
 0x457   : > { %v5381_v12 = vmax.f32 %v5327_v50, 0.0 }
 0x458   : > { %v4519_v42 = vpop.f32.mrf.mxu3  ;;  %v3478_v16 = vpop.f32.mrf.mxu1 }
 0x459   : > { %v5469_v5 = vsel %vm5400_vm5, %v5381_v12, 0.0 }
 0x45a   : > { %v6768_v60 = vpack.c.bf16 %v8997_v27, %v5469_v5 }
 0x45c   : > { %7003 = vst [vmem:[%s8365_s4 + $0xc8] sm:$0xff] %v6768_v60  }
 0x45d   : > { %v5214_v38 = vpop.f32.mrf.mxu0 }
 0x45e   : > { %7496 = shalt.err (!%p7493_p3)
}
 0x45f   : > { %s7535_s29 = smov 64   ;;  %s7536_s4 = smov 4   ;;  %v4206_v39 = vpop.f32.mrf.mxu2 }
 0x460   : > { %7423 = dma.vmem_to_hbm [thread:$0]  (%p7595_p5), %s5596_s19, 3520, %s5598_s16, %s5583_s20, %s7535_s29, %s7535_s29, %s7536_s4   ;;  %v3480_v24 = vpop.f32.mrf.mxu1 }
 0x465   : > { %v5216_v57 = vpop.f32.mrf.mxu0 }
 0x467   : > { %v4208_v55 = vpop.f32.mrf.mxu2 }
 0x468 PF: > { %p7429_p4 = scmp.ge.s32.totalorder %s7531_s15, 2  ;;  %s5612_s6 = sand.u32 1, %s7519_s12  }
 0x469   : > { %s5613_s7 = scalar_lea.sflag [#allocation3], %s5612_s6 }
 0x46a   : > { %p7426_p7 = pnand %p7429_p4, %p7599_p6 }
 0x46c   : > { %p7427_p8 = pneg %p7426_p7 }
 0x46e   : > { %7514 = dma.done.wait (%p7427_p8), %s5613_s7, 3520  }
 0x46f   : > { %7516 = vsyncadd (%p7427_p8), %s5613_s7, 4294963776  ;;  %p13_p5 = scmp.ge.s32.totalorder %s7582_s18, 4   ;;  %s8998_s12 = smov %s7523_s13 }
 0x470   : > { %s8999_s13 = smov %s7527_s14  ;;  %s9000_s14 = smov %s7593_s21 }
 0x471   : > { %s9001_s15 = smov %s7582_s18  ;;  %15 = sbr.rel (!%p13_p5) target bundleno = 3 (0x3), region = 75 }
 0x476   :  { %5619 = vsyncpa [#allocation3], 1 }
 0x477   :  { %5621 = vsyncpa [#allocation3 + $0x1], 1 }

</bundles_post_ra>
